<compile_context>
chip_gen: v7x
topology: tpu7x:2x2x1
jax: 0.10.0
libtpu: 0.0.40
codegen_flags: <defaults>
</compile_context>

<pallas_src>
import jax
import jax.numpy as jnp
from jax import lax
from jax.experimental import pallas as pl
from jax.experimental.pallas import tpu as pltpu


# Static problem geometry (fixed by the module: fc0 expects 544 = 16*2*17).
_H, _W = 14, 74            # obs spatial size
_HW = _H * _W              # 1036 flattened obs spatial
_P1H, _P1W = 6, 36         # pooled conv1 spatial (conv1 valid = 12 x 72)
_P1HW = _P1H * _P1W        # 216  flattened pooled conv1 spatial per sample
_C2 = 16                   # conv2 output channels (conv2 valid = 4 x 34)
_P2W = 17                  # pooled conv2 width  (pooled conv2 = 2 x 17)


# -----------------------------------------------------------------------------
# Fused forward kernel
# -----------------------------------------------------------------------------
def _critic_kernel(obs_ref, acts_ref,
                   w1_ref, b1_ref, w2_ref, b2_ref,
                   w0_ref, b0_ref, w2a_ref, w2b_ref, bf2_ref,
                   w3_ref, b3_ref, e1_ref, e2_ref,
                   out_ref,
                   pool1_ref, feat_ref):
    """Whole CriticAC forward; every intermediate stays in VMEM / vregs.

    obs_ref   : (B, 3, 1036)   flattened observations, lane = h*74 + w
    pool1_ref : (6, B*216)     pooled conv1 activations, lane = b*216 + u*36 + v
    feat_ref  : (B, 16, 34)    pooled conv2 features, lane = h*17 + w
    """
    B = out_ref.shape[0]

    def conv3x3(x, w_ref, bias, row_w, n_out):
        # 3x3 valid conv over the whole flattened image: 9 tap matmuls
        # (Cout, Cin) @ (Cin, n_out) on statically shifted lane windows of the
        # once-loaded input, chained into a single accumulator, + bias + ReLU.
        # Positions that mix rows are computed but discarded by the pool stage.
        acc = jnp.dot(w_ref[0], x[:, 0:n_out],
                      preferred_element_type=jnp.float32)
        for k in range(1, 9):
            dh, dw = divmod(k, 3)
            s = dh * row_w + dw
            acc = acc + jnp.dot(w_ref[k], x[:, s:s + n_out],
                                preferred_element_type=jnp.float32)
        return jnp.maximum(acc + bias, 0.0)

    def pool2x2(y, row_w, n_anchor):
        # p[:, g] = max of y over the 2x2 window anchored at flat position g,
        # materialized only for the first n_anchor anchors (all we ever read).
        top = jnp.maximum(y[:, 0:n_anchor], y[:, 1:n_anchor + 1])
        bot = jnp.maximum(y[:, row_w:row_w + n_anchor],
                          y[:, row_w + 1:row_w + n_anchor + 1])
        return jnp.maximum(top, bot)

    b1, b2 = b1_ref[...], b2_ref[...]          # (6, 1), (16, 1)
    e1, e2 = e1_ref[...], e2_ref[...]          # (71, 36), (33, 17) even selectors

    # ---- conv1 -> ReLU -> 2x2 max-pool (per sample; spatial fills lanes) ----
    # Largest pool anchor needed and the conv/anchor widths that implies.
    a1 = 2 * (_P1H - 1) * _W + 2 * (_P1W - 1)          # 810
    l1 = a1 + 1                                        # 811 anchors
    n1 = a1 + _W + 2                                   # 886 conv1 outputs
    for b in range(B):
        y = conv3x3(obs_ref[b], w1_ref, b1, _W, n1)    # (6, 886)
        p = pool2x2(y, _W, l1)                         # (6, 811)
        for u in range(_P1H):
            win = p[:, 2 * u * _W:2 * u * _W + 2 * _P1W - 1]      # (6, 71)
            pool1_ref[:, b * _P1HW + u * _P1W:
                      b * _P1HW + (u + 1) * _P1W] = jnp.dot(
                          win, e1, preferred_element_type=jnp.float32)

    # ---- conv2 -> ReLU -> 2x2 max-pool (whole batch in one shot) ------------
    a2 = (B - 1) * _P1HW + 2 * _P1W + 2 * (_P2W - 1)   # last anchor needed
    l2 = a2 + 1
    n2 = a2 + _P1W + 2
    y2 = conv3x3(pool1_ref[...], w2_ref, b2, _P1W, n2)  # (16, n2)
    p2 = pool2x2(y2, _P1W, l2)                          # (16, l2)
    for b in range(B):
        for h in range(2):
            base = b * _P1HW + 2 * h * _P1W
            win = p2[:, base:base + 2 * _P2W - 1]       # (16, 33)
            feat_ref[b, :, h * _P2W:(h + 1) * _P2W] = jnp.dot(
                win, e2, preferred_element_type=jnp.float32)       # (16, 17)

    # ---- fc0 -> ReLU -> (split fc2, no concat) -> ReLU -> fc3, batched over B
    y0 = None
    for c in range(_C2):                 # contract 544 = 16 chunks of 34
        t = jnp.dot(feat_ref[:, c, :], w0_ref[c],
                    preferred_element_type=jnp.float32)            # (B, 200)
        y0 = t if y0 is None else y0 + t
    y0 = jnp.maximum(y0 + b0_ref[...], 0.0)                        # (B, 200)
    z = (jnp.dot(y0, w2a_ref[...], preferred_element_type=jnp.float32)
         + jnp.dot(acts_ref[...], w2b_ref[...],
                   preferred_element_type=jnp.float32)
         + bf2_ref[...])
    z = jnp.maximum(z, 0.0)                                        # (B, 32)
    out_ref[...] = (jnp.dot(z, w3_ref[...],
                            preferred_element_type=jnp.float32)
                    + b3_ref[...])                                 # (B, 1)


def _full_spec(shape):
    n = len(shape)
    return pl.BlockSpec(shape, lambda i, n=n: (0,) * n)


@jax.jit
def critic_ac_forward(prepped, obs, acts):
    """obs: (B, 3, 14, 74) NCHW, acts: (B, act_dim) -> (B, 1) float32."""
    B = obs.shape[0]
    assert obs.shape[1:] == (3, _H, _W), obs.shape
    obs_f = obs.astype(jnp.float32).reshape(B, 3, _HW)   # free row-major reshape
    acts_f = acts.astype(jnp.float32)
    inputs = (obs_f, acts_f,
              prepped["w1p"], prepped["b1"], prepped["w2p"], prepped["b2"],
              prepped["w0p"], prepped["b0"], prepped["w2a"], prepped["w2b"],
              prepped["bf2"], prepped["w3"], prepped["b3"],
              prepped["e1"], prepped["e2"])
    macs = B * (6 * 12 * 72 * 27            # conv1
                + 16 * 4 * 34 * 54          # conv2
                + 544 * 200                 # fc0
                + (200 + acts.shape[1]) * 32 + 32)   # fc2 + fc3
    nbytes = 4 * (sum(int(x.size) for x in inputs) + B)
    # TODO(synk): for training-size batches, tile the grid over batch (marked
    # "parallel" so v7x's two TensorCores split it) and cast the matmul
    # operands to bf16 (keep f32 epilogues, mandatory on v5e).
    return pl.pallas_call(
        _critic_kernel,
        out_shape=jax.ShapeDtypeStruct((B, 1), jnp.float32),
        grid=(1,),
        in_specs=[_full_spec(x.shape) for x in inputs],
        out_specs=pl.BlockSpec((B, 1), lambda i: (0, 0)),
        scratch_shapes=[
            pltpu.VMEM((6, B * _P1HW), jnp.float32),   # pooled conv1 activations
            pltpu.VMEM((B, _C2, 2 * _P2W), jnp.float32),  # pooled conv2 features
        ],
        compiler_params=pltpu.CompilerParams(
            dimension_semantics=("arbitrary",)),
        cost_estimate=pl.CostEstimate(flops=2 * macs, transcendentals=0,
                                      bytes_accessed=nbytes),
    )(*inputs)


# -----------------------------------------------------------------------------
# One-time weight preparation (all transposes / permutations hoisted here)
# -----------------------------------------------------------------------------
def prepare_params(params):
    def even_selector(n_out):
        # (2*n_out - 1, n_out) 0/1 matrix selecting even columns: S[2v, v] = 1.
        rows = jnp.arange(2 * n_out - 1)[:, None]
        cols = jnp.arange(n_out)[None, :]
        return (rows == 2 * cols).astype(jnp.float32)

    w1 = params["conv1_w"].astype(jnp.float32)           # (6, 3, 3, 3)   OIHW
    w2 = params["conv2_w"].astype(jnp.float32)           # (16, 6, 3, 3)
    fc2w = params["fc2_w"].astype(jnp.float32)           # (32, 200 + act_dim)
    return {
        # conv taps as (9, Cout, Cin): index k = dh*3 + dw
        "w1p": jnp.transpose(w1, (2, 3, 0, 1)).reshape(9, 6, 3),
        "b1": params["conv1_b"].astype(jnp.float32).reshape(6, 1),
        "w2p": jnp.transpose(w2, (2, 3, 0, 1)).reshape(9, 16, 6),
        "b2": params["conv2_b"].astype(jnp.float32).reshape(16, 1),
        # fc0 weight pre-permuted to the kernel's (channel, h*17+w) feature
        # layout, which equals torch's .view(B, -1) order c*34 + h*17 + w.
        "w0p": params["fc0_w"].astype(jnp.float32).T.reshape(16, 34, 200),
        "b0": params["fc0_b"].astype(jnp.float32).reshape(1, 200),
        # fc2 split into activation / action halves (torch.cat never built)
        "w2a": fc2w[:, :200].T,                          # (200, 32)
        "w2b": fc2w[:, 200:].T,                          # (act_dim, 32)
        "bf2": params["fc2_b"].astype(jnp.float32).reshape(1, 32),
        "w3": params["fc3_w"].astype(jnp.float32).T,     # (32, 1)
        "b3": params["fc3_b"].astype(jnp.float32).reshape(1, 1),
        # even-column selectors applied after the shifted-max 2x2 pooling
        "e1": even_selector(_P1W),                       # (71, 36)
        "e2": even_selector(_P2W),                       # (33, 17)
    }


# -----------------------------------------------------------------------------
# Deterministic parameter init (PyTorch-style U(-1/sqrt(fan_in), 1/sqrt(fan_in)))
# -----------------------------------------------------------------------------
def init_params(key, act_dim):
    def uni(k, shape, fan_in):
        bound = 1.0 / jnp.sqrt(jnp.float32(fan_in))
        return jax.random.uniform(k, shape, jnp.float32, -bound, bound)

    ks = jax.random.split(key, 10)
    return {
        "conv1_w": uni(ks[0], (6, 3, 3, 3), 3 * 9),
        "conv1_b": uni(ks[1], (6,), 3 * 9),
        "conv2_w": uni(ks[2], (16, 6, 3, 3), 6 * 9),
        "conv2_b": uni(ks[3], (16,), 6 * 9),
        "fc0_w": uni(ks[4], (200, 544), 544),
        "fc0_b": uni(ks[5], (200,), 544),
        "fc2_w": uni(ks[6], (32, 200 + act_dim), 200 + act_dim),
        "fc2_b": uni(ks[7], (32,), 200 + act_dim),
        "fc3_w": uni(ks[8], (1, 32), 32),
        "fc3_b": uni(ks[9], (1,), 32),
    }


# -----------------------------------------------------------------------------
# Pure-JAX reference (correctness sanity check)
# -----------------------------------------------------------------------------
def reference_forward(params, obs, acts):
    dn = ("NCHW", "OIHW", "NCHW")

    def conv(x, w, b):
        y = lax.conv_general_dilated(x, w, (1, 1), "VALID", dimension_numbers=dn)
        return jax.nn.relu(y + b[None, :, None, None])

    def pool(x):
        return lax.reduce_window(
            x, -jnp.inf, lax.max, (1, 1, 2, 2), (1, 1, 2, 2), "VALID"
        )

    x = pool(conv(obs, params["conv1_w"], params["conv1_b"]))
    x = pool(conv(x, params["conv2_w"], params["conv2_b"]))
    x = x.reshape(x.shape[0], -1)
    x = jax.nn.relu(x @ params["fc0_w"].T + params["fc0_b"])
    combined = jnp.concatenate([x, acts], axis=1)
    x = jax.nn.relu(combined @ params["fc2_w"].T + params["fc2_b"])
    return x @ params["fc3_w"].T + params["fc3_b"]


if __name__ == "__main__":
    # Shapes consistent with the module: n_agent=2, dim_action=4 -> act_dim=8;
    # obs spatial (14, 74) gives the required 544-dim flattened conv feature.
    n_agent, dim_action = 2, 4
    act_dim = n_agent * dim_action
    B = 2

    key = jax.random.PRNGKey(0)
    k_obs, k_act, k_par = jax.random.split(key, 3)
    obs = jax.random.normal(k_obs, (B, 3, _H, _W), jnp.float32)
    acts = jax.random.normal(k_act, (B, act_dim), jnp.float32)
    params = init_params(k_par, act_dim)
    prepped = prepare_params(params)

    out = jax.block_until_ready(critic_ac_forward(prepped, obs, acts))
    ref = jax.block_until_ready(reference_forward(params, obs, acts))

    assert out.shape == (B, 1), out.shape
    assert jnp.allclose(out, ref, rtol=1e-3, atol=2e-3), (out, ref)
    print("KERNEL_OK")
</pallas_src>

<mosaic_0001>
module attributes {stable_mosaic.version = 11 : i64} {
  func.func @_critic_kernel(%arg0: i32, %arg1: memref<2x3x1036xf32, #tpu.memory_space<vmem>>, %arg2: memref<2x8xf32, #tpu.memory_space<vmem>>, %arg3: memref<9x6x3xf32, #tpu.memory_space<vmem>>, %arg4: memref<6x1xf32, #tpu.memory_space<vmem>>, %arg5: memref<9x16x6xf32, #tpu.memory_space<vmem>>, %arg6: memref<16x1xf32, #tpu.memory_space<vmem>>, %arg7: memref<16x34x200xf32, #tpu.memory_space<vmem>>, %arg8: memref<1x200xf32, #tpu.memory_space<vmem>>, %arg9: memref<200x32xf32, #tpu.memory_space<vmem>>, %arg10: memref<8x32xf32, #tpu.memory_space<vmem>>, %arg11: memref<1x32xf32, #tpu.memory_space<vmem>>, %arg12: memref<32x1xf32, #tpu.memory_space<vmem>>, %arg13: memref<1x1xf32, #tpu.memory_space<vmem>>, %arg14: memref<71x36xf32, #tpu.memory_space<vmem>>, %arg15: memref<33x17xf32, #tpu.memory_space<vmem>>, %arg16: memref<2x1xf32, #tpu.memory_space<vmem>>, %arg17: memref<6x432xf32, #tpu.memory_space<vmem>>, %arg18: memref<2x16x34xf32, #tpu.memory_space<vmem>>) attributes {dimension_semantics = [#tpu.dimension_semantics<arbitrary>], iteration_bounds = array<i64: 1>, scalar_prefetch = 0 : i64, scratch_operands = 2 : i64, tpu.core_type = #tpu.core_type<tc>, window_params = [{pipeline_mode = #tpu.pipeline_mode<synchronous>, transform_indices = @transform_0, window_bounds = array<i64: 2, 3, 1036>}, {pipeline_mode = #tpu.pipeline_mode<synchronous>, transform_indices = @transform_1, window_bounds = array<i64: 2, 8>}, {pipeline_mode = #tpu.pipeline_mode<synchronous>, transform_indices = @transform_2, window_bounds = array<i64: 9, 6, 3>}, {pipeline_mode = #tpu.pipeline_mode<synchronous>, transform_indices = @transform_3, window_bounds = array<i64: 6, 1>}, {pipeline_mode = #tpu.pipeline_mode<synchronous>, transform_indices = @transform_4, window_bounds = array<i64: 9, 16, 6>}, {pipeline_mode = #tpu.pipeline_mode<synchronous>, transform_indices = @transform_5, window_bounds = array<i64: 16, 1>}, {pipeline_mode = #tpu.pipeline_mode<synchronous>, transform_indices = @transform_6, window_bounds = array<i64: 16, 34, 200>}, {pipeline_mode = #tpu.pipeline_mode<synchronous>, transform_indices = @transform_7, window_bounds = array<i64: 1, 200>}, {pipeline_mode = #tpu.pipeline_mode<synchronous>, transform_indices = @transform_8, window_bounds = array<i64: 200, 32>}, {pipeline_mode = #tpu.pipeline_mode<synchronous>, transform_indices = @transform_9, window_bounds = array<i64: 8, 32>}, {pipeline_mode = #tpu.pipeline_mode<synchronous>, transform_indices = @transform_10, window_bounds = array<i64: 1, 32>}, {pipeline_mode = #tpu.pipeline_mode<synchronous>, transform_indices = @transform_11, window_bounds = array<i64: 32, 1>}, {pipeline_mode = #tpu.pipeline_mode<synchronous>, transform_indices = @transform_12, window_bounds = array<i64: 1, 1>}, {pipeline_mode = #tpu.pipeline_mode<synchronous>, transform_indices = @transform_13, window_bounds = array<i64: 71, 36>}, {pipeline_mode = #tpu.pipeline_mode<synchronous>, transform_indices = @transform_14, window_bounds = array<i64: 33, 17>}, {pipeline_mode = #tpu.pipeline_mode<synchronous>, transform_indices = @transform_15, window_bounds = array<i64: 2, 1>}]} {
    %c0 = arith.constant 0 : index
    %c0_0 = arith.constant 0 : index
    %0 = vector.load %arg4[%c0, %c0_0] : memref<6x1xf32, #tpu.memory_space<vmem>>, vector<6x1xf32>
    %c0_1 = arith.constant 0 : index
    %c0_2 = arith.constant 0 : index
    %1 = vector.load %arg6[%c0_1, %c0_2] : memref<16x1xf32, #tpu.memory_space<vmem>>, vector<16x1xf32>
    %c0_3 = arith.constant 0 : index
    %c0_4 = arith.constant 0 : index
    %2 = vector.load %arg14[%c0_3, %c0_4] : memref<71x36xf32, #tpu.memory_space<vmem>>, vector<71x36xf32>
    %c0_5 = arith.constant 0 : index
    %c0_6 = arith.constant 0 : index
    %3 = vector.load %arg15[%c0_5, %c0_6] : memref<33x17xf32, #tpu.memory_space<vmem>>, vector<33x17xf32>
    %c0_7 = arith.constant 0 : index
    %c0_8 = arith.constant 0 : index
    %c0_9 = arith.constant 0 : index
    %4 = vector.load %arg1[%c0_7, %c0_8, %c0_9] : memref<2x3x1036xf32, #tpu.memory_space<vmem>>, vector<1x3x1036xf32>
    %5 = vector.shape_cast %4 : vector<1x3x1036xf32> to vector<3x1036xf32>
    %c0_10 = arith.constant 0 : index
    %c0_11 = arith.constant 0 : index
    %c0_12 = arith.constant 0 : index
    %6 = vector.load %arg3[%c0_10, %c0_11, %c0_12] : memref<9x6x3xf32, #tpu.memory_space<vmem>>, vector<1x6x3xf32>
    %7 = vector.shape_cast %6 : vector<1x6x3xf32> to vector<6x3xf32>
    %8 = vector.extract_strided_slice %5 {offsets = [0, 0], sizes = [3, 886], strides = [1, 1]} : vector<3x1036xf32> to vector<3x886xf32>
    %cst = arith.constant dense<0.000000e+00> : vector<6x886xf32>
    %9 = tpu.matmul %7, %8, %cst {dimension_numbers = #tpu.dot_dimension_numbers<[1], [0], [0], [1], [0, 0, 1, 1], [], []>} : vector<6x3xf32>, vector<3x886xf32>, vector<6x886xf32> -> vector<6x886xf32>
    %c1 = arith.constant 1 : index
    %c0_13 = arith.constant 0 : index
    %c0_14 = arith.constant 0 : index
    %10 = vector.load %arg3[%c1, %c0_13, %c0_14] : memref<9x6x3xf32, #tpu.memory_space<vmem>>, vector<1x6x3xf32>
    %11 = vector.shape_cast %10 : vector<1x6x3xf32> to vector<6x3xf32>
    %12 = vector.extract_strided_slice %5 {offsets = [0, 1], sizes = [3, 886], strides = [1, 1]} : vector<3x1036xf32> to vector<3x886xf32>
    %cst_15 = arith.constant dense<0.000000e+00> : vector<6x886xf32>
    %13 = tpu.matmul %11, %12, %cst_15 {dimension_numbers = #tpu.dot_dimension_numbers<[1], [0], [0], [1], [0, 0, 1, 1], [], []>} : vector<6x3xf32>, vector<3x886xf32>, vector<6x886xf32> -> vector<6x886xf32>
    %14 = arith.addf %9, %13 : vector<6x886xf32>
    %c2 = arith.constant 2 : index
    %c0_16 = arith.constant 0 : index
    %c0_17 = arith.constant 0 : index
    %15 = vector.load %arg3[%c2, %c0_16, %c0_17] : memref<9x6x3xf32, #tpu.memory_space<vmem>>, vector<1x6x3xf32>
    %16 = vector.shape_cast %15 : vector<1x6x3xf32> to vector<6x3xf32>
    %17 = vector.extract_strided_slice %5 {offsets = [0, 2], sizes = [3, 886], strides = [1, 1]} : vector<3x1036xf32> to vector<3x886xf32>
    %cst_18 = arith.constant dense<0.000000e+00> : vector<6x886xf32>
    %18 = tpu.matmul %16, %17, %cst_18 {dimension_numbers = #tpu.dot_dimension_numbers<[1], [0], [0], [1], [0, 0, 1, 1], [], []>} : vector<6x3xf32>, vector<3x886xf32>, vector<6x886xf32> -> vector<6x886xf32>
    %19 = arith.addf %14, %18 : vector<6x886xf32>
    %c3 = arith.constant 3 : index
    %c0_19 = arith.constant 0 : index
    %c0_20 = arith.constant 0 : index
    %20 = vector.load %arg3[%c3, %c0_19, %c0_20] : memref<9x6x3xf32, #tpu.memory_space<vmem>>, vector<1x6x3xf32>
    %21 = vector.shape_cast %20 : vector<1x6x3xf32> to vector<6x3xf32>
    %22 = vector.extract_strided_slice %5 {offsets = [0, 74], sizes = [3, 886], strides = [1, 1]} : vector<3x1036xf32> to vector<3x886xf32>
    %cst_21 = arith.constant dense<0.000000e+00> : vector<6x886xf32>
    %23 = tpu.matmul %21, %22, %cst_21 {dimension_numbers = #tpu.dot_dimension_numbers<[1], [0], [0], [1], [0, 0, 1, 1], [], []>} : vector<6x3xf32>, vector<3x886xf32>, vector<6x886xf32> -> vector<6x886xf32>
    %24 = arith.addf %19, %23 : vector<6x886xf32>
    %c4 = arith.constant 4 : index
    %c0_22 = arith.constant 0 : index
    %c0_23 = arith.constant 0 : index
    %25 = vector.load %arg3[%c4, %c0_22, %c0_23] : memref<9x6x3xf32, #tpu.memory_space<vmem>>, vector<1x6x3xf32>
    %26 = vector.shape_cast %25 : vector<1x6x3xf32> to vector<6x3xf32>
    %27 = vector.extract_strided_slice %5 {offsets = [0, 75], sizes = [3, 886], strides = [1, 1]} : vector<3x1036xf32> to vector<3x886xf32>
    %cst_24 = arith.constant dense<0.000000e+00> : vector<6x886xf32>
    %28 = tpu.matmul %26, %27, %cst_24 {dimension_numbers = #tpu.dot_dimension_numbers<[1], [0], [0], [1], [0, 0, 1, 1], [], []>} : vector<6x3xf32>, vector<3x886xf32>, vector<6x886xf32> -> vector<6x886xf32>
    %29 = arith.addf %24, %28 : vector<6x886xf32>
    %c5 = arith.constant 5 : index
    %c0_25 = arith.constant 0 : index
    %c0_26 = arith.constant 0 : index
    %30 = vector.load %arg3[%c5, %c0_25, %c0_26] : memref<9x6x3xf32, #tpu.memory_space<vmem>>, vector<1x6x3xf32>
    %31 = vector.shape_cast %30 : vector<1x6x3xf32> to vector<6x3xf32>
    %32 = vector.extract_strided_slice %5 {offsets = [0, 76], sizes = [3, 886], strides = [1, 1]} : vector<3x1036xf32> to vector<3x886xf32>
    %cst_27 = arith.constant dense<0.000000e+00> : vector<6x886xf32>
    %33 = tpu.matmul %31, %32, %cst_27 {dimension_numbers = #tpu.dot_dimension_numbers<[1], [0], [0], [1], [0, 0, 1, 1], [], []>} : vector<6x3xf32>, vector<3x886xf32>, vector<6x886xf32> -> vector<6x886xf32>
    %34 = arith.addf %29, %33 : vector<6x886xf32>
    %c6 = arith.constant 6 : index
    %c0_28 = arith.constant 0 : index
    %c0_29 = arith.constant 0 : index
    %35 = vector.load %arg3[%c6, %c0_28, %c0_29] : memref<9x6x3xf32, #tpu.memory_space<vmem>>, vector<1x6x3xf32>
    %36 = vector.shape_cast %35 : vector<1x6x3xf32> to vector<6x3xf32>
    %37 = vector.extract_strided_slice %5 {offsets = [0, 148], sizes = [3, 886], strides = [1, 1]} : vector<3x1036xf32> to vector<3x886xf32>
    %cst_30 = arith.constant dense<0.000000e+00> : vector<6x886xf32>
    %38 = tpu.matmul %36, %37, %cst_30 {dimension_numbers = #tpu.dot_dimension_numbers<[1], [0], [0], [1], [0, 0, 1, 1], [], []>} : vector<6x3xf32>, vector<3x886xf32>, vector<6x886xf32> -> vector<6x886xf32>
    %39 = arith.addf %34, %38 : vector<6x886xf32>
    %c7 = arith.constant 7 : index
    %c0_31 = arith.constant 0 : index
    %c0_32 = arith.constant 0 : index
    %40 = vector.load %arg3[%c7, %c0_31, %c0_32] : memref<9x6x3xf32, #tpu.memory_space<vmem>>, vector<1x6x3xf32>
    %41 = vector.shape_cast %40 : vector<1x6x3xf32> to vector<6x3xf32>
    %42 = vector.extract_strided_slice %5 {offsets = [0, 149], sizes = [3, 886], strides = [1, 1]} : vector<3x1036xf32> to vector<3x886xf32>
    %cst_33 = arith.constant dense<0.000000e+00> : vector<6x886xf32>
    %43 = tpu.matmul %41, %42, %cst_33 {dimension_numbers = #tpu.dot_dimension_numbers<[1], [0], [0], [1], [0, 0, 1, 1], [], []>} : vector<6x3xf32>, vector<3x886xf32>, vector<6x886xf32> -> vector<6x886xf32>
    %44 = arith.addf %39, %43 : vector<6x886xf32>
    %c8 = arith.constant 8 : index
    %c0_34 = arith.constant 0 : index
    %c0_35 = arith.constant 0 : index
    %45 = vector.load %arg3[%c8, %c0_34, %c0_35] : memref<9x6x3xf32, #tpu.memory_space<vmem>>, vector<1x6x3xf32>
    %46 = vector.shape_cast %45 : vector<1x6x3xf32> to vector<6x3xf32>
    %47 = vector.extract_strided_slice %5 {offsets = [0, 150], sizes = [3, 886], strides = [1, 1]} : vector<3x1036xf32> to vector<3x886xf32>
    %cst_36 = arith.constant dense<0.000000e+00> : vector<6x886xf32>
    %48 = tpu.matmul %46, %47, %cst_36 {dimension_numbers = #tpu.dot_dimension_numbers<[1], [0], [0], [1], [0, 0, 1, 1], [], []>} : vector<6x3xf32>, vector<3x886xf32>, vector<6x886xf32> -> vector<6x886xf32>
    %49 = arith.addf %44, %48 : vector<6x886xf32>
    %50 = vector.broadcast %0 : vector<6x1xf32> to vector<6x886xf32>
    %51 = arith.addf %49, %50 : vector<6x886xf32>
    %cst_37 = arith.constant 0.000000e+00 : f32
    %52 = vector.broadcast %cst_37 : f32 to vector<6x886xf32>
    %53 = arith.maximumf %51, %52 : vector<6x886xf32>
    %54 = vector.extract_strided_slice %53 {offsets = [0, 0], sizes = [6, 811], strides = [1, 1]} : vector<6x886xf32> to vector<6x811xf32>
    %55 = vector.extract_strided_slice %53 {offsets = [0, 1], sizes = [6, 811], strides = [1, 1]} : vector<6x886xf32> to vector<6x811xf32>
    %56 = arith.maximumf %54, %55 : vector<6x811xf32>
    %57 = vector.extract_strided_slice %53 {offsets = [0, 74], sizes = [6, 811], strides = [1, 1]} : vector<6x886xf32> to vector<6x811xf32>
    %58 = vector.extract_strided_slice %53 {offsets = [0, 75], sizes = [6, 811], strides = [1, 1]} : vector<6x886xf32> to vector<6x811xf32>
    %59 = arith.maximumf %57, %58 : vector<6x811xf32>
    %60 = arith.maximumf %56, %59 : vector<6x811xf32>
    %61 = vector.extract_strided_slice %60 {offsets = [0, 0], sizes = [6, 71], strides = [1, 1]} : vector<6x811xf32> to vector<6x71xf32>
    %cst_38 = arith.constant dense<0.000000e+00> : vector<6x36xf32>
    %62 = tpu.matmul %61, %2, %cst_38 {dimension_numbers = #tpu.dot_dimension_numbers<[1], [0], [0], [1], [0, 0, 1, 1], [], []>} : vector<6x71xf32>, vector<71x36xf32>, vector<6x36xf32> -> vector<6x36xf32>
    %c0_39 = arith.constant 0 : index
    %c0_40 = arith.constant 0 : index
    %63 = vector.load %arg17[%c0_39, %c0_40] : memref<6x432xf32, #tpu.memory_space<vmem>>, vector<6x36xf32>
    tpu.vector_store %arg17[%c0_39, %c0_40], %62 {strides = array<i32>} : memref<6x432xf32, #tpu.memory_space<vmem>>, vector<6x36xf32>,
    %64 = vector.extract_strided_slice %60 {offsets = [0, 148], sizes = [6, 71], strides = [1, 1]} : vector<6x811xf32> to vector<6x71xf32>
    %cst_41 = arith.constant dense<0.000000e+00> : vector<6x36xf32>
    %65 = tpu.matmul %64, %2, %cst_41 {dimension_numbers = #tpu.dot_dimension_numbers<[1], [0], [0], [1], [0, 0, 1, 1], [], []>} : vector<6x71xf32>, vector<71x36xf32>, vector<6x36xf32> -> vector<6x36xf32>
    %c0_42 = arith.constant 0 : index
    %c36 = arith.constant 36 : index
    %66 = vector.load %arg17[%c0_42, %c36] : memref<6x432xf32, #tpu.memory_space<vmem>>, vector<6x36xf32>
    tpu.vector_store %arg17[%c0_42, %c36], %65 {strides = array<i32>} : memref<6x432xf32, #tpu.memory_space<vmem>>, vector<6x36xf32>,
    %67 = vector.extract_strided_slice %60 {offsets = [0, 296], sizes = [6, 71], strides = [1, 1]} : vector<6x811xf32> to vector<6x71xf32>
    %cst_43 = arith.constant dense<0.000000e+00> : vector<6x36xf32>
    %68 = tpu.matmul %67, %2, %cst_43 {dimension_numbers = #tpu.dot_dimension_numbers<[1], [0], [0], [1], [0, 0, 1, 1], [], []>} : vector<6x71xf32>, vector<71x36xf32>, vector<6x36xf32> -> vector<6x36xf32>
    %c0_44 = arith.constant 0 : index
    %c72 = arith.constant 72 : index
    %69 = vector.load %arg17[%c0_44, %c72] : memref<6x432xf32, #tpu.memory_space<vmem>>, vector<6x36xf32>
    tpu.vector_store %arg17[%c0_44, %c72], %68 {strides = array<i32>} : memref<6x432xf32, #tpu.memory_space<vmem>>, vector<6x36xf32>,
    %70 = vector.extract_strided_slice %60 {offsets = [0, 444], sizes = [6, 71], strides = [1, 1]} : vector<6x811xf32> to vector<6x71xf32>
    %cst_45 = arith.constant dense<0.000000e+00> : vector<6x36xf32>
    %71 = tpu.matmul %70, %2, %cst_45 {dimension_numbers = #tpu.dot_dimension_numbers<[1], [0], [0], [1], [0, 0, 1, 1], [], []>} : vector<6x71xf32>, vector<71x36xf32>, vector<6x36xf32> -> vector<6x36xf32>
    %c0_46 = arith.constant 0 : index
    %c108 = arith.constant 108 : index
    %72 = vector.load %arg17[%c0_46, %c108] : memref<6x432xf32, #tpu.memory_space<vmem>>, vector<6x36xf32>
    tpu.vector_store %arg17[%c0_46, %c108], %71 {strides = array<i32>} : memref<6x432xf32, #tpu.memory_space<vmem>>, vector<6x36xf32>,
    %73 = vector.extract_strided_slice %60 {offsets = [0, 592], sizes = [6, 71], strides = [1, 1]} : vector<6x811xf32> to vector<6x71xf32>
    %cst_47 = arith.constant dense<0.000000e+00> : vector<6x36xf32>
    %74 = tpu.matmul %73, %2, %cst_47 {dimension_numbers = #tpu.dot_dimension_numbers<[1], [0], [0], [1], [0, 0, 1, 1], [], []>} : vector<6x71xf32>, vector<71x36xf32>, vector<6x36xf32> -> vector<6x36xf32>
    %c0_48 = arith.constant 0 : index
    %c144 = arith.constant 144 : index
    %75 = vector.load %arg17[%c0_48, %c144] : memref<6x432xf32, #tpu.memory_space<vmem>>, vector<6x36xf32>
    tpu.vector_store %arg17[%c0_48, %c144], %74 {strides = array<i32>} : memref<6x432xf32, #tpu.memory_space<vmem>>, vector<6x36xf32>,
    %76 = vector.extract_strided_slice %60 {offsets = [0, 740], sizes = [6, 71], strides = [1, 1]} : vector<6x811xf32> to vector<6x71xf32>
    %cst_49 = arith.constant dense<0.000000e+00> : vector<6x36xf32>
    %77 = tpu.matmul %76, %2, %cst_49 {dimension_numbers = #tpu.dot_dimension_numbers<[1], [0], [0], [1], [0, 0, 1, 1], [], []>} : vector<6x71xf32>, vector<71x36xf32>, vector<6x36xf32> -> vector<6x36xf32>
    %c0_50 = arith.constant 0 : index
    %c180 = arith.constant 180 : index
    %78 = vector.load %arg17[%c0_50, %c180] : memref<6x432xf32, #tpu.memory_space<vmem>>, vector<6x36xf32>
    tpu.vector_store %arg17[%c0_50, %c180], %77 {strides = array<i32>} : memref<6x432xf32, #tpu.memory_space<vmem>>, vector<6x36xf32>,
    %c1_51 = arith.constant 1 : index
    %c0_52 = arith.constant 0 : index
    %c0_53 = arith.constant 0 : index
    %79 = vector.load %arg1[%c1_51, %c0_52, %c0_53] : memref<2x3x1036xf32, #tpu.memory_space<vmem>>, vector<1x3x1036xf32>
    %80 = vector.shape_cast %79 : vector<1x3x1036xf32> to vector<3x1036xf32>
    %c0_54 = arith.constant 0 : index
    %c0_55 = arith.constant 0 : index
    %c0_56 = arith.constant 0 : index
    %81 = vector.load %arg3[%c0_54, %c0_55, %c0_56] : memref<9x6x3xf32, #tpu.memory_space<vmem>>, vector<1x6x3xf32>
    %82 = vector.shape_cast %81 : vector<1x6x3xf32> to vector<6x3xf32>
    %83 = vector.extract_strided_slice %80 {offsets = [0, 0], sizes = [3, 886], strides = [1, 1]} : vector<3x1036xf32> to vector<3x886xf32>
    %cst_57 = arith.constant dense<0.000000e+00> : vector<6x886xf32>
    %84 = tpu.matmul %82, %83, %cst_57 {dimension_numbers = #tpu.dot_dimension_numbers<[1], [0], [0], [1], [0, 0, 1, 1], [], []>} : vector<6x3xf32>, vector<3x886xf32>, vector<6x886xf32> -> vector<6x886xf32>
    %c1_58 = arith.constant 1 : index
    %c0_59 = arith.constant 0 : index
    %c0_60 = arith.constant 0 : index
    %85 = vector.load %arg3[%c1_58, %c0_59, %c0_60] : memref<9x6x3xf32, #tpu.memory_space<vmem>>, vector<1x6x3xf32>
    %86 = vector.shape_cast %85 : vector<1x6x3xf32> to vector<6x3xf32>
    %87 = vector.extract_strided_slice %80 {offsets = [0, 1], sizes = [3, 886], strides = [1, 1]} : vector<3x1036xf32> to vector<3x886xf32>
    %cst_61 = arith.constant dense<0.000000e+00> : vector<6x886xf32>
    %88 = tpu.matmul %86, %87, %cst_61 {dimension_numbers = #tpu.dot_dimension_numbers<[1], [0], [0], [1], [0, 0, 1, 1], [], []>} : vector<6x3xf32>, vector<3x886xf32>, vector<6x886xf32> -> vector<6x886xf32>
    %89 = arith.addf %84, %88 : vector<6x886xf32>
    %c2_62 = arith.constant 2 : index
    %c0_63 = arith.constant 0 : index
    %c0_64 = arith.constant 0 : index
    %90 = vector.load %arg3[%c2_62, %c0_63, %c0_64] : memref<9x6x3xf32, #tpu.memory_space<vmem>>, vector<1x6x3xf32>
    %91 = vector.shape_cast %90 : vector<1x6x3xf32> to vector<6x3xf32>
    %92 = vector.extract_strided_slice %80 {offsets = [0, 2], sizes = [3, 886], strides = [1, 1]} : vector<3x1036xf32> to vector<3x886xf32>
    %cst_65 = arith.constant dense<0.000000e+00> : vector<6x886xf32>
    %93 = tpu.matmul %91, %92, %cst_65 {dimension_numbers = #tpu.dot_dimension_numbers<[1], [0], [0], [1], [0, 0, 1, 1], [], []>} : vector<6x3xf32>, vector<3x886xf32>, vector<6x886xf32> -> vector<6x886xf32>
    %94 = arith.addf %89, %93 : vector<6x886xf32>
    %c3_66 = arith.constant 3 : index
    %c0_67 = arith.constant 0 : index
    %c0_68 = arith.constant 0 : index
    %95 = vector.load %arg3[%c3_66, %c0_67, %c0_68] : memref<9x6x3xf32, #tpu.memory_space<vmem>>, vector<1x6x3xf32>
    %96 = vector.shape_cast %95 : vector<1x6x3xf32> to vector<6x3xf32>
    %97 = vector.extract_strided_slice %80 {offsets = [0, 74], sizes = [3, 886], strides = [1, 1]} : vector<3x1036xf32> to vector<3x886xf32>
    %cst_69 = arith.constant dense<0.000000e+00> : vector<6x886xf32>
    %98 = tpu.matmul %96, %97, %cst_69 {dimension_numbers = #tpu.dot_dimension_numbers<[1], [0], [0], [1], [0, 0, 1, 1], [], []>} : vector<6x3xf32>, vector<3x886xf32>, vector<6x886xf32> -> vector<6x886xf32>
    %99 = arith.addf %94, %98 : vector<6x886xf32>
    %c4_70 = arith.constant 4 : index
    %c0_71 = arith.constant 0 : index
    %c0_72 = arith.constant 0 : index
    %100 = vector.load %arg3[%c4_70, %c0_71, %c0_72] : memref<9x6x3xf32, #tpu.memory_space<vmem>>, vector<1x6x3xf32>
    %101 = vector.shape_cast %100 : vector<1x6x3xf32> to vector<6x3xf32>
    %102 = vector.extract_strided_slice %80 {offsets = [0, 75], sizes = [3, 886], strides = [1, 1]} : vector<3x1036xf32> to vector<3x886xf32>
    %cst_73 = arith.constant dense<0.000000e+00> : vector<6x886xf32>
    %103 = tpu.matmul %101, %102, %cst_73 {dimension_numbers = #tpu.dot_dimension_numbers<[1], [0], [0], [1], [0, 0, 1, 1], [], []>} : vector<6x3xf32>, vector<3x886xf32>, vector<6x886xf32> -> vector<6x886xf32>
    %104 = arith.addf %99, %103 : vector<6x886xf32>
    %c5_74 = arith.constant 5 : index
    %c0_75 = arith.constant 0 : index
    %c0_76 = arith.constant 0 : index
    %105 = vector.load %arg3[%c5_74, %c0_75, %c0_76] : memref<9x6x3xf32, #tpu.memory_space<vmem>>, vector<1x6x3xf32>
    %106 = vector.shape_cast %105 : vector<1x6x3xf32> to vector<6x3xf32>
    %107 = vector.extract_strided_slice %80 {offsets = [0, 76], sizes = [3, 886], strides = [1, 1]} : vector<3x1036xf32> to vector<3x886xf32>
    %cst_77 = arith.constant dense<0.000000e+00> : vector<6x886xf32>
    %108 = tpu.matmul %106, %107, %cst_77 {dimension_numbers = #tpu.dot_dimension_numbers<[1], [0], [0], [1], [0, 0, 1, 1], [], []>} : vector<6x3xf32>, vector<3x886xf32>, vector<6x886xf32> -> vector<6x886xf32>
    %109 = arith.addf %104, %108 : vector<6x886xf32>
    %c6_78 = arith.constant 6 : index
    %c0_79 = arith.constant 0 : index
    %c0_80 = arith.constant 0 : index
    %110 = vector.load %arg3[%c6_78, %c0_79, %c0_80] : memref<9x6x3xf32, #tpu.memory_space<vmem>>, vector<1x6x3xf32>
    %111 = vector.shape_cast %110 : vector<1x6x3xf32> to vector<6x3xf32>
    %112 = vector.extract_strided_slice %80 {offsets = [0, 148], sizes = [3, 886], strides = [1, 1]} : vector<3x1036xf32> to vector<3x886xf32>
    %cst_81 = arith.constant dense<0.000000e+00> : vector<6x886xf32>
    %113 = tpu.matmul %111, %112, %cst_81 {dimension_numbers = #tpu.dot_dimension_numbers<[1], [0], [0], [1], [0, 0, 1, 1], [], []>} : vector<6x3xf32>, vector<3x886xf32>, vector<6x886xf32> -> vector<6x886xf32>
    %114 = arith.addf %109, %113 : vector<6x886xf32>
    %c7_82 = arith.constant 7 : index
    %c0_83 = arith.constant 0 : index
    %c0_84 = arith.constant 0 : index
    %115 = vector.load %arg3[%c7_82, %c0_83, %c0_84] : memref<9x6x3xf32, #tpu.memory_space<vmem>>, vector<1x6x3xf32>
    %116 = vector.shape_cast %115 : vector<1x6x3xf32> to vector<6x3xf32>
    %117 = vector.extract_strided_slice %80 {offsets = [0, 149], sizes = [3, 886], strides = [1, 1]} : vector<3x1036xf32> to vector<3x886xf32>
    %cst_85 = arith.constant dense<0.000000e+00> : vector<6x886xf32>
    %118 = tpu.matmul %116, %117, %cst_85 {dimension_numbers = #tpu.dot_dimension_numbers<[1], [0], [0], [1], [0, 0, 1, 1], [], []>} : vector<6x3xf32>, vector<3x886xf32>, vector<6x886xf32> -> vector<6x886xf32>
    %119 = arith.addf %114, %118 : vector<6x886xf32>
    %c8_86 = arith.constant 8 : index
    %c0_87 = arith.constant 0 : index
    %c0_88 = arith.constant 0 : index
    %120 = vector.load %arg3[%c8_86, %c0_87, %c0_88] : memref<9x6x3xf32, #tpu.memory_space<vmem>>, vector<1x6x3xf32>
    %121 = vector.shape_cast %120 : vector<1x6x3xf32> to vector<6x3xf32>
    %122 = vector.extract_strided_slice %80 {offsets = [0, 150], sizes = [3, 886], strides = [1, 1]} : vector<3x1036xf32> to vector<3x886xf32>
    %cst_89 = arith.constant dense<0.000000e+00> : vector<6x886xf32>
    %123 = tpu.matmul %121, %122, %cst_89 {dimension_numbers = #tpu.dot_dimension_numbers<[1], [0], [0], [1], [0, 0, 1, 1], [], []>} : vector<6x3xf32>, vector<3x886xf32>, vector<6x886xf32> -> vector<6x886xf32>
    %124 = arith.addf %119, %123 : vector<6x886xf32>
    %125 = vector.broadcast %0 : vector<6x1xf32> to vector<6x886xf32>
    %126 = arith.addf %124, %125 : vector<6x886xf32>
    %cst_90 = arith.constant 0.000000e+00 : f32
    %127 = vector.broadcast %cst_90 : f32 to vector<6x886xf32>
    %128 = arith.maximumf %126, %127 : vector<6x886xf32>
    %129 = vector.extract_strided_slice %128 {offsets = [0, 0], sizes = [6, 811], strides = [1, 1]} : vector<6x886xf32> to vector<6x811xf32>
    %130 = vector.extract_strided_slice %128 {offsets = [0, 1], sizes = [6, 811], strides = [1, 1]} : vector<6x886xf32> to vector<6x811xf32>
    %131 = arith.maximumf %129, %130 : vector<6x811xf32>
    %132 = vector.extract_strided_slice %128 {offsets = [0, 74], sizes = [6, 811], strides = [1, 1]} : vector<6x886xf32> to vector<6x811xf32>
    %133 = vector.extract_strided_slice %128 {offsets = [0, 75], sizes = [6, 811], strides = [1, 1]} : vector<6x886xf32> to vector<6x811xf32>
    %134 = arith.maximumf %132, %133 : vector<6x811xf32>
    %135 = arith.maximumf %131, %134 : vector<6x811xf32>
    %136 = vector.extract_strided_slice %135 {offsets = [0, 0], sizes = [6, 71], strides = [1, 1]} : vector<6x811xf32> to vector<6x71xf32>
    %cst_91 = arith.constant dense<0.000000e+00> : vector<6x36xf32>
    %137 = tpu.matmul %136, %2, %cst_91 {dimension_numbers = #tpu.dot_dimension_numbers<[1], [0], [0], [1], [0, 0, 1, 1], [], []>} : vector<6x71xf32>, vector<71x36xf32>, vector<6x36xf32> -> vector<6x36xf32>
    %c0_92 = arith.constant 0 : index
    %c216 = arith.constant 216 : index
    %138 = vector.load %arg17[%c0_92, %c216] : memref<6x432xf32, #tpu.memory_space<vmem>>, vector<6x36xf32>
    tpu.vector_store %arg17[%c0_92, %c216], %137 {strides = array<i32>} : memref<6x432xf32, #tpu.memory_space<vmem>>, vector<6x36xf32>,
    %139 = vector.extract_strided_slice %135 {offsets = [0, 148], sizes = [6, 71], strides = [1, 1]} : vector<6x811xf32> to vector<6x71xf32>
    %cst_93 = arith.constant dense<0.000000e+00> : vector<6x36xf32>
    %140 = tpu.matmul %139, %2, %cst_93 {dimension_numbers = #tpu.dot_dimension_numbers<[1], [0], [0], [1], [0, 0, 1, 1], [], []>} : vector<6x71xf32>, vector<71x36xf32>, vector<6x36xf32> -> vector<6x36xf32>
    %c0_94 = arith.constant 0 : index
    %c252 = arith.constant 252 : index
    %141 = vector.load %arg17[%c0_94, %c252] : memref<6x432xf32, #tpu.memory_space<vmem>>, vector<6x36xf32>
    tpu.vector_store %arg17[%c0_94, %c252], %140 {strides = array<i32>} : memref<6x432xf32, #tpu.memory_space<vmem>>, vector<6x36xf32>,
    %142 = vector.extract_strided_slice %135 {offsets = [0, 296], sizes = [6, 71], strides = [1, 1]} : vector<6x811xf32> to vector<6x71xf32>
    %cst_95 = arith.constant dense<0.000000e+00> : vector<6x36xf32>
    %143 = tpu.matmul %142, %2, %cst_95 {dimension_numbers = #tpu.dot_dimension_numbers<[1], [0], [0], [1], [0, 0, 1, 1], [], []>} : vector<6x71xf32>, vector<71x36xf32>, vector<6x36xf32> -> vector<6x36xf32>
    %c0_96 = arith.constant 0 : index
    %c288 = arith.constant 288 : index
    %144 = vector.load %arg17[%c0_96, %c288] : memref<6x432xf32, #tpu.memory_space<vmem>>, vector<6x36xf32>
    tpu.vector_store %arg17[%c0_96, %c288], %143 {strides = array<i32>} : memref<6x432xf32, #tpu.memory_space<vmem>>, vector<6x36xf32>,
    %145 = vector.extract_strided_slice %135 {offsets = [0, 444], sizes = [6, 71], strides = [1, 1]} : vector<6x811xf32> to vector<6x71xf32>
    %cst_97 = arith.constant dense<0.000000e+00> : vector<6x36xf32>
    %146 = tpu.matmul %145, %2, %cst_97 {dimension_numbers = #tpu.dot_dimension_numbers<[1], [0], [0], [1], [0, 0, 1, 1], [], []>} : vector<6x71xf32>, vector<71x36xf32>, vector<6x36xf32> -> vector<6x36xf32>
    %c0_98 = arith.constant 0 : index
    %c324 = arith.constant 324 : index
    %147 = vector.load %arg17[%c0_98, %c324] : memref<6x432xf32, #tpu.memory_space<vmem>>, vector<6x36xf32>
    tpu.vector_store %arg17[%c0_98, %c324], %146 {strides = array<i32>} : memref<6x432xf32, #tpu.memory_space<vmem>>, vector<6x36xf32>,
    %148 = vector.extract_strided_slice %135 {offsets = [0, 592], sizes = [6, 71], strides = [1, 1]} : vector<6x811xf32> to vector<6x71xf32>
    %cst_99 = arith.constant dense<0.000000e+00> : vector<6x36xf32>
    %149 = tpu.matmul %148, %2, %cst_99 {dimension_numbers = #tpu.dot_dimension_numbers<[1], [0], [0], [1], [0, 0, 1, 1], [], []>} : vector<6x71xf32>, vector<71x36xf32>, vector<6x36xf32> -> vector<6x36xf32>
    %c0_100 = arith.constant 0 : index
    %c360 = arith.constant 360 : index
    %150 = vector.load %arg17[%c0_100, %c360] : memref<6x432xf32, #tpu.memory_space<vmem>>, vector<6x36xf32>
    tpu.vector_store %arg17[%c0_100, %c360], %149 {strides = array<i32>} : memref<6x432xf32, #tpu.memory_space<vmem>>, vector<6x36xf32>,
    %151 = vector.extract_strided_slice %135 {offsets = [0, 740], sizes = [6, 71], strides = [1, 1]} : vector<6x811xf32> to vector<6x71xf32>
    %cst_101 = arith.constant dense<0.000000e+00> : vector<6x36xf32>
    %152 = tpu.matmul %151, %2, %cst_101 {dimension_numbers = #tpu.dot_dimension_numbers<[1], [0], [0], [1], [0, 0, 1, 1], [], []>} : vector<6x71xf32>, vector<71x36xf32>, vector<6x36xf32> -> vector<6x36xf32>
    %c0_102 = arith.constant 0 : index
    %c396 = arith.constant 396 : index
    %153 = vector.load %arg17[%c0_102, %c396] : memref<6x432xf32, #tpu.memory_space<vmem>>, vector<6x36xf32>
    tpu.vector_store %arg17[%c0_102, %c396], %152 {strides = array<i32>} : memref<6x432xf32, #tpu.memory_space<vmem>>, vector<6x36xf32>,
    %c0_103 = arith.constant 0 : index
    %c0_104 = arith.constant 0 : index
    %154 = vector.load %arg17[%c0_103, %c0_104] : memref<6x432xf32, #tpu.memory_space<vmem>>, vector<6x432xf32>
    %c0_105 = arith.constant 0 : index
    %c0_106 = arith.constant 0 : index
    %c0_107 = arith.constant 0 : index
    %155 = vector.load %arg5[%c0_105, %c0_106, %c0_107] : memref<9x16x6xf32, #tpu.memory_space<vmem>>, vector<1x16x6xf32>
    %156 = vector.shape_cast %155 : vector<1x16x6xf32> to vector<16x6xf32>
    %157 = vector.extract_strided_slice %154 {offsets = [0, 0], sizes = [6, 358], strides = [1, 1]} : vector<6x432xf32> to vector<6x358xf32>
    %cst_108 = arith.constant dense<0.000000e+00> : vector<16x358xf32>
    %158 = tpu.matmul %156, %157, %cst_108 {dimension_numbers = #tpu.dot_dimension_numbers<[1], [0], [0], [1], [0, 0, 1, 1], [], []>} : vector<16x6xf32>, vector<6x358xf32>, vector<16x358xf32> -> vector<16x358xf32>
    %c1_109 = arith.constant 1 : index
    %c0_110 = arith.constant 0 : index
    %c0_111 = arith.constant 0 : index
    %159 = vector.load %arg5[%c1_109, %c0_110, %c0_111] : memref<9x16x6xf32, #tpu.memory_space<vmem>>, vector<1x16x6xf32>
    %160 = vector.shape_cast %159 : vector<1x16x6xf32> to vector<16x6xf32>
    %161 = vector.extract_strided_slice %154 {offsets = [0, 1], sizes = [6, 358], strides = [1, 1]} : vector<6x432xf32> to vector<6x358xf32>
    %cst_112 = arith.constant dense<0.000000e+00> : vector<16x358xf32>
    %162 = tpu.matmul %160, %161, %cst_112 {dimension_numbers = #tpu.dot_dimension_numbers<[1], [0], [0], [1], [0, 0, 1, 1], [], []>} : vector<16x6xf32>, vector<6x358xf32>, vector<16x358xf32> -> vector<16x358xf32>
    %163 = arith.addf %158, %162 : vector<16x358xf32>
    %c2_113 = arith.constant 2 : index
    %c0_114 = arith.constant 0 : index
    %c0_115 = arith.constant 0 : index
    %164 = vector.load %arg5[%c2_113, %c0_114, %c0_115] : memref<9x16x6xf32, #tpu.memory_space<vmem>>, vector<1x16x6xf32>
    %165 = vector.shape_cast %164 : vector<1x16x6xf32> to vector<16x6xf32>
    %166 = vector.extract_strided_slice %154 {offsets = [0, 2], sizes = [6, 358], strides = [1, 1]} : vector<6x432xf32> to vector<6x358xf32>
    %cst_116 = arith.constant dense<0.000000e+00> : vector<16x358xf32>
    %167 = tpu.matmul %165, %166, %cst_116 {dimension_numbers = #tpu.dot_dimension_numbers<[1], [0], [0], [1], [0, 0, 1, 1], [], []>} : vector<16x6xf32>, vector<6x358xf32>, vector<16x358xf32> -> vector<16x358xf32>
    %168 = arith.addf %163, %167 : vector<16x358xf32>
    %c3_117 = arith.constant 3 : index
    %c0_118 = arith.constant 0 : index
    %c0_119 = arith.constant 0 : index
    %169 = vector.load %arg5[%c3_117, %c0_118, %c0_119] : memref<9x16x6xf32, #tpu.memory_space<vmem>>, vector<1x16x6xf32>
    %170 = vector.shape_cast %169 : vector<1x16x6xf32> to vector<16x6xf32>
    %171 = vector.extract_strided_slice %154 {offsets = [0, 36], sizes = [6, 358], strides = [1, 1]} : vector<6x432xf32> to vector<6x358xf32>
    %cst_120 = arith.constant dense<0.000000e+00> : vector<16x358xf32>
    %172 = tpu.matmul %170, %171, %cst_120 {dimension_numbers = #tpu.dot_dimension_numbers<[1], [0], [0], [1], [0, 0, 1, 1], [], []>} : vector<16x6xf32>, vector<6x358xf32>, vector<16x358xf32> -> vector<16x358xf32>
    %173 = arith.addf %168, %172 : vector<16x358xf32>
    %c4_121 = arith.constant 4 : index
    %c0_122 = arith.constant 0 : index
    %c0_123 = arith.constant 0 : index
    %174 = vector.load %arg5[%c4_121, %c0_122, %c0_123] : memref<9x16x6xf32, #tpu.memory_space<vmem>>, vector<1x16x6xf32>
    %175 = vector.shape_cast %174 : vector<1x16x6xf32> to vector<16x6xf32>
    %176 = vector.extract_strided_slice %154 {offsets = [0, 37], sizes = [6, 358], strides = [1, 1]} : vector<6x432xf32> to vector<6x358xf32>
    %cst_124 = arith.constant dense<0.000000e+00> : vector<16x358xf32>
    %177 = tpu.matmul %175, %176, %cst_124 {dimension_numbers = #tpu.dot_dimension_numbers<[1], [0], [0], [1], [0, 0, 1, 1], [], []>} : vector<16x6xf32>, vector<6x358xf32>, vector<16x358xf32> -> vector<16x358xf32>
    %178 = arith.addf %173, %177 : vector<16x358xf32>
    %c5_125 = arith.constant 5 : index
    %c0_126 = arith.constant 0 : index
    %c0_127 = arith.constant 0 : index
    %179 = vector.load %arg5[%c5_125, %c0_126, %c0_127] : memref<9x16x6xf32, #tpu.memory_space<vmem>>, vector<1x16x6xf32>
    %180 = vector.shape_cast %179 : vector<1x16x6xf32> to vector<16x6xf32>
    %181 = vector.extract_strided_slice %154 {offsets = [0, 38], sizes = [6, 358], strides = [1, 1]} : vector<6x432xf32> to vector<6x358xf32>
    %cst_128 = arith.constant dense<0.000000e+00> : vector<16x358xf32>
    %182 = tpu.matmul %180, %181, %cst_128 {dimension_numbers = #tpu.dot_dimension_numbers<[1], [0], [0], [1], [0, 0, 1, 1], [], []>} : vector<16x6xf32>, vector<6x358xf32>, vector<16x358xf32> -> vector<16x358xf32>
    %183 = arith.addf %178, %182 : vector<16x358xf32>
    %c6_129 = arith.constant 6 : index
    %c0_130 = arith.constant 0 : index
    %c0_131 = arith.constant 0 : index
    %184 = vector.load %arg5[%c6_129, %c0_130, %c0_131] : memref<9x16x6xf32, #tpu.memory_space<vmem>>, vector<1x16x6xf32>
    %185 = vector.shape_cast %184 : vector<1x16x6xf32> to vector<16x6xf32>
    %186 = vector.extract_strided_slice %154 {offsets = [0, 72], sizes = [6, 358], strides = [1, 1]} : vector<6x432xf32> to vector<6x358xf32>
    %cst_132 = arith.constant dense<0.000000e+00> : vector<16x358xf32>
    %187 = tpu.matmul %185, %186, %cst_132 {dimension_numbers = #tpu.dot_dimension_numbers<[1], [0], [0], [1], [0, 0, 1, 1], [], []>} : vector<16x6xf32>, vector<6x358xf32>, vector<16x358xf32> -> vector<16x358xf32>
    %188 = arith.addf %183, %187 : vector<16x358xf32>
    %c7_133 = arith.constant 7 : index
    %c0_134 = arith.constant 0 : index
    %c0_135 = arith.constant 0 : index
    %189 = vector.load %arg5[%c7_133, %c0_134, %c0_135] : memref<9x16x6xf32, #tpu.memory_space<vmem>>, vector<1x16x6xf32>
    %190 = vector.shape_cast %189 : vector<1x16x6xf32> to vector<16x6xf32>
    %191 = vector.extract_strided_slice %154 {offsets = [0, 73], sizes = [6, 358], strides = [1, 1]} : vector<6x432xf32> to vector<6x358xf32>
    %cst_136 = arith.constant dense<0.000000e+00> : vector<16x358xf32>
    %192 = tpu.matmul %190, %191, %cst_136 {dimension_numbers = #tpu.dot_dimension_numbers<[1], [0], [0], [1], [0, 0, 1, 1], [], []>} : vector<16x6xf32>, vector<6x358xf32>, vector<16x358xf32> -> vector<16x358xf32>
    %193 = arith.addf %188, %192 : vector<16x358xf32>
    %c8_137 = arith.constant 8 : index
    %c0_138 = arith.constant 0 : index
    %c0_139 = arith.constant 0 : index
    %194 = vector.load %arg5[%c8_137, %c0_138, %c0_139] : memref<9x16x6xf32, #tpu.memory_space<vmem>>, vector<1x16x6xf32>
    %195 = vector.shape_cast %194 : vector<1x16x6xf32> to vector<16x6xf32>
    %196 = vector.extract_strided_slice %154 {offsets = [0, 74], sizes = [6, 358], strides = [1, 1]} : vector<6x432xf32> to vector<6x358xf32>
    %cst_140 = arith.constant dense<0.000000e+00> : vector<16x358xf32>
    %197 = tpu.matmul %195, %196, %cst_140 {dimension_numbers = #tpu.dot_dimension_numbers<[1], [0], [0], [1], [0, 0, 1, 1], [], []>} : vector<16x6xf32>, vector<6x358xf32>, vector<16x358xf32> -> vector<16x358xf32>
    %198 = arith.addf %193, %197 : vector<16x358xf32>
    %199 = vector.broadcast %1 : vector<16x1xf32> to vector<16x358xf32>
    %200 = arith.addf %198, %199 : vector<16x358xf32>
    %cst_141 = arith.constant 0.000000e+00 : f32
    %201 = vector.broadcast %cst_141 : f32 to vector<16x358xf32>
    %202 = arith.maximumf %200, %201 : vector<16x358xf32>
    %203 = vector.extract_strided_slice %202 {offsets = [0, 0], sizes = [16, 321], strides = [1, 1]} : vector<16x358xf32> to vector<16x321xf32>
    %204 = vector.extract_strided_slice %202 {offsets = [0, 1], sizes = [16, 321], strides = [1, 1]} : vector<16x358xf32> to vector<16x321xf32>
    %205 = arith.maximumf %203, %204 : vector<16x321xf32>
    %206 = vector.extract_strided_slice %202 {offsets = [0, 36], sizes = [16, 321], strides = [1, 1]} : vector<16x358xf32> to vector<16x321xf32>
    %207 = vector.extract_strided_slice %202 {offsets = [0, 37], sizes = [16, 321], strides = [1, 1]} : vector<16x358xf32> to vector<16x321xf32>
    %208 = arith.maximumf %206, %207 : vector<16x321xf32>
    %209 = arith.maximumf %205, %208 : vector<16x321xf32>
    %210 = vector.extract_strided_slice %209 {offsets = [0, 0], sizes = [16, 33], strides = [1, 1]} : vector<16x321xf32> to vector<16x33xf32>
    %cst_142 = arith.constant dense<0.000000e+00> : vector<16x17xf32>
    %211 = tpu.matmul %210, %3, %cst_142 {dimension_numbers = #tpu.dot_dimension_numbers<[1], [0], [0], [1], [0, 0, 1, 1], [], []>} : vector<16x33xf32>, vector<33x17xf32>, vector<16x17xf32> -> vector<16x17xf32>
    %c0_143 = arith.constant 0 : index
    %c0_144 = arith.constant 0 : index
    %c0_145 = arith.constant 0 : index
    %212 = vector.load %arg18[%c0_143, %c0_144, %c0_145] : memref<2x16x34xf32, #tpu.memory_space<vmem>>, vector<1x16x17xf32>
    %213 = vector.shape_cast %212 : vector<1x16x17xf32> to vector<16x17xf32>
    %214 = vector.shape_cast %211 : vector<16x17xf32> to vector<1x16x17xf32>
    tpu.vector_store %arg18[%c0_143, %c0_144, %c0_145], %214 {strides = array<i32>} : memref<2x16x34xf32, #tpu.memory_space<vmem>>, vector<1x16x17xf32>,
    %215 = vector.extract_strided_slice %209 {offsets = [0, 72], sizes = [16, 33], strides = [1, 1]} : vector<16x321xf32> to vector<16x33xf32>
    %cst_146 = arith.constant dense<0.000000e+00> : vector<16x17xf32>
    %216 = tpu.matmul %215, %3, %cst_146 {dimension_numbers = #tpu.dot_dimension_numbers<[1], [0], [0], [1], [0, 0, 1, 1], [], []>} : vector<16x33xf32>, vector<33x17xf32>, vector<16x17xf32> -> vector<16x17xf32>
    %c0_147 = arith.constant 0 : index
    %c0_148 = arith.constant 0 : index
    %c17 = arith.constant 17 : index
    %217 = vector.load %arg18[%c0_147, %c0_148, %c17] : memref<2x16x34xf32, #tpu.memory_space<vmem>>, vector<1x16x17xf32>
    %218 = vector.shape_cast %217 : vector<1x16x17xf32> to vector<16x17xf32>
    %219 = vector.shape_cast %216 : vector<16x17xf32> to vector<1x16x17xf32>
    tpu.vector_store %arg18[%c0_147, %c0_148, %c17], %219 {strides = array<i32>} : memref<2x16x34xf32, #tpu.memory_space<vmem>>, vector<1x16x17xf32>,
    %220 = vector.extract_strided_slice %209 {offsets = [0, 216], sizes = [16, 33], strides = [1, 1]} : vector<16x321xf32> to vector<16x33xf32>
    %cst_149 = arith.constant dense<0.000000e+00> : vector<16x17xf32>
    %221 = tpu.matmul %220, %3, %cst_149 {dimension_numbers = #tpu.dot_dimension_numbers<[1], [0], [0], [1], [0, 0, 1, 1], [], []>} : vector<16x33xf32>, vector<33x17xf32>, vector<16x17xf32> -> vector<16x17xf32>
    %c1_150 = arith.constant 1 : index
    %c0_151 = arith.constant 0 : index
    %c0_152 = arith.constant 0 : index
    %222 = vector.load %arg18[%c1_150, %c0_151, %c0_152] : memref<2x16x34xf32, #tpu.memory_space<vmem>>, vector<1x16x17xf32>
    %223 = vector.shape_cast %222 : vector<1x16x17xf32> to vector<16x17xf32>
    %224 = vector.shape_cast %221 : vector<16x17xf32> to vector<1x16x17xf32>
    tpu.vector_store %arg18[%c1_150, %c0_151, %c0_152], %224 {strides = array<i32>} : memref<2x16x34xf32, #tpu.memory_space<vmem>>, vector<1x16x17xf32>,
    %225 = vector.extract_strided_slice %209 {offsets = [0, 288], sizes = [16, 33], strides = [1, 1]} : vector<16x321xf32> to vector<16x33xf32>
    %cst_153 = arith.constant dense<0.000000e+00> : vector<16x17xf32>
    %226 = tpu.matmul %225, %3, %cst_153 {dimension_numbers = #tpu.dot_dimension_numbers<[1], [0], [0], [1], [0, 0, 1, 1], [], []>} : vector<16x33xf32>, vector<33x17xf32>, vector<16x17xf32> -> vector<16x17xf32>
    %c1_154 = arith.constant 1 : index
    %c0_155 = arith.constant 0 : index
    %c17_156 = arith.constant 17 : index
    %227 = vector.load %arg18[%c1_154, %c0_155, %c17_156] : memref<2x16x34xf32, #tpu.memory_space<vmem>>, vector<1x16x17xf32>
    %228 = vector.shape_cast %227 : vector<1x16x17xf32> to vector<16x17xf32>
    %229 = vector.shape_cast %226 : vector<16x17xf32> to vector<1x16x17xf32>
    tpu.vector_store %arg18[%c1_154, %c0_155, %c17_156], %229 {strides = array<i32>} : memref<2x16x34xf32, #tpu.memory_space<vmem>>, vector<1x16x17xf32>,
    %c0_157 = arith.constant 0 : index
    %c0_158 = arith.constant 0 : index
    %c0_159 = arith.constant 0 : index
    %230 = vector.load %arg18[%c0_157, %c0_158, %c0_159] : memref<2x16x34xf32, #tpu.memory_space<vmem>>, vector<2x1x34xf32>
    %231 = vector.shape_cast %230 : vector<2x1x34xf32> to vector<2x34xf32>
    %c0_160 = arith.constant 0 : index
    %c0_161 = arith.constant 0 : index
    %c0_162 = arith.constant 0 : index
    %232 = vector.load %arg7[%c0_160, %c0_161, %c0_162] : memref<16x34x200xf32, #tpu.memory_space<vmem>>, vector<1x34x200xf32>
    %233 = vector.shape_cast %232 : vector<1x34x200xf32> to vector<34x200xf32>
    %cst_163 = arith.constant dense<0.000000e+00> : vector<2x200xf32>
    %234 = tpu.matmul %231, %233, %cst_163 {dimension_numbers = #tpu.dot_dimension_numbers<[1], [0], [0], [1], [0, 0, 1, 1], [], []>} : vector<2x34xf32>, vector<34x200xf32>, vector<2x200xf32> -> vector<2x200xf32>
    %c0_164 = arith.constant 0 : index
    %c1_165 = arith.constant 1 : index
    %c0_166 = arith.constant 0 : index
    %235 = vector.load %arg18[%c0_164, %c1_165, %c0_166] : memref<2x16x34xf32, #tpu.memory_space<vmem>>, vector<2x1x34xf32>
    %236 = vector.shape_cast %235 : vector<2x1x34xf32> to vector<2x34xf32>
    %c1_167 = arith.constant 1 : index
    %c0_168 = arith.constant 0 : index
    %c0_169 = arith.constant 0 : index
    %237 = vector.load %arg7[%c1_167, %c0_168, %c0_169] : memref<16x34x200xf32, #tpu.memory_space<vmem>>, vector<1x34x200xf32>
    %238 = vector.shape_cast %237 : vector<1x34x200xf32> to vector<34x200xf32>
    %cst_170 = arith.constant dense<0.000000e+00> : vector<2x200xf32>
    %239 = tpu.matmul %236, %238, %cst_170 {dimension_numbers = #tpu.dot_dimension_numbers<[1], [0], [0], [1], [0, 0, 1, 1], [], []>} : vector<2x34xf32>, vector<34x200xf32>, vector<2x200xf32> -> vector<2x200xf32>
    %240 = arith.addf %234, %239 : vector<2x200xf32>
    %c0_171 = arith.constant 0 : index
    %c2_172 = arith.constant 2 : index
    %c0_173 = arith.constant 0 : index
    %241 = vector.load %arg18[%c0_171, %c2_172, %c0_173] : memref<2x16x34xf32, #tpu.memory_space<vmem>>, vector<2x1x34xf32>
    %242 = vector.shape_cast %241 : vector<2x1x34xf32> to vector<2x34xf32>
    %c2_174 = arith.constant 2 : index
    %c0_175 = arith.constant 0 : index
    %c0_176 = arith.constant 0 : index
    %243 = vector.load %arg7[%c2_174, %c0_175, %c0_176] : memref<16x34x200xf32, #tpu.memory_space<vmem>>, vector<1x34x200xf32>
    %244 = vector.shape_cast %243 : vector<1x34x200xf32> to vector<34x200xf32>
    %cst_177 = arith.constant dense<0.000000e+00> : vector<2x200xf32>
    %245 = tpu.matmul %242, %244, %cst_177 {dimension_numbers = #tpu.dot_dimension_numbers<[1], [0], [0], [1], [0, 0, 1, 1], [], []>} : vector<2x34xf32>, vector<34x200xf32>, vector<2x200xf32> -> vector<2x200xf32>
    %246 = arith.addf %240, %245 : vector<2x200xf32>
    %c0_178 = arith.constant 0 : index
    %c3_179 = arith.constant 3 : index
    %c0_180 = arith.constant 0 : index
    %247 = vector.load %arg18[%c0_178, %c3_179, %c0_180] : memref<2x16x34xf32, #tpu.memory_space<vmem>>, vector<2x1x34xf32>
    %248 = vector.shape_cast %247 : vector<2x1x34xf32> to vector<2x34xf32>
    %c3_181 = arith.constant 3 : index
    %c0_182 = arith.constant 0 : index
    %c0_183 = arith.constant 0 : index
    %249 = vector.load %arg7[%c3_181, %c0_182, %c0_183] : memref<16x34x200xf32, #tpu.memory_space<vmem>>, vector<1x34x200xf32>
    %250 = vector.shape_cast %249 : vector<1x34x200xf32> to vector<34x200xf32>
    %cst_184 = arith.constant dense<0.000000e+00> : vector<2x200xf32>
    %251 = tpu.matmul %248, %250, %cst_184 {dimension_numbers = #tpu.dot_dimension_numbers<[1], [0], [0], [1], [0, 0, 1, 1], [], []>} : vector<2x34xf32>, vector<34x200xf32>, vector<2x200xf32> -> vector<2x200xf32>
    %252 = arith.addf %246, %251 : vector<2x200xf32>
    %c0_185 = arith.constant 0 : index
    %c4_186 = arith.constant 4 : index
    %c0_187 = arith.constant 0 : index
    %253 = vector.load %arg18[%c0_185, %c4_186, %c0_187] : memref<2x16x34xf32, #tpu.memory_space<vmem>>, vector<2x1x34xf32>
    %254 = vector.shape_cast %253 : vector<2x1x34xf32> to vector<2x34xf32>
    %c4_188 = arith.constant 4 : index
    %c0_189 = arith.constant 0 : index
    %c0_190 = arith.constant 0 : index
    %255 = vector.load %arg7[%c4_188, %c0_189, %c0_190] : memref<16x34x200xf32, #tpu.memory_space<vmem>>, vector<1x34x200xf32>
    %256 = vector.shape_cast %255 : vector<1x34x200xf32> to vector<34x200xf32>
    %cst_191 = arith.constant dense<0.000000e+00> : vector<2x200xf32>
    %257 = tpu.matmul %254, %256, %cst_191 {dimension_numbers = #tpu.dot_dimension_numbers<[1], [0], [0], [1], [0, 0, 1, 1], [], []>} : vector<2x34xf32>, vector<34x200xf32>, vector<2x200xf32> -> vector<2x200xf32>
    %258 = arith.addf %252, %257 : vector<2x200xf32>
    %c0_192 = arith.constant 0 : index
    %c5_193 = arith.constant 5 : index
    %c0_194 = arith.constant 0 : index
    %259 = vector.load %arg18[%c0_192, %c5_193, %c0_194] : memref<2x16x34xf32, #tpu.memory_space<vmem>>, vector<2x1x34xf32>
    %260 = vector.shape_cast %259 : vector<2x1x34xf32> to vector<2x34xf32>
    %c5_195 = arith.constant 5 : index
    %c0_196 = arith.constant 0 : index
    %c0_197 = arith.constant 0 : index
    %261 = vector.load %arg7[%c5_195, %c0_196, %c0_197] : memref<16x34x200xf32, #tpu.memory_space<vmem>>, vector<1x34x200xf32>
    %262 = vector.shape_cast %261 : vector<1x34x200xf32> to vector<34x200xf32>
    %cst_198 = arith.constant dense<0.000000e+00> : vector<2x200xf32>
    %263 = tpu.matmul %260, %262, %cst_198 {dimension_numbers = #tpu.dot_dimension_numbers<[1], [0], [0], [1], [0, 0, 1, 1], [], []>} : vector<2x34xf32>, vector<34x200xf32>, vector<2x200xf32> -> vector<2x200xf32>
    %264 = arith.addf %258, %263 : vector<2x200xf32>
    %c0_199 = arith.constant 0 : index
    %c6_200 = arith.constant 6 : index
    %c0_201 = arith.constant 0 : index
    %265 = vector.load %arg18[%c0_199, %c6_200, %c0_201] : memref<2x16x34xf32, #tpu.memory_space<vmem>>, vector<2x1x34xf32>
    %266 = vector.shape_cast %265 : vector<2x1x34xf32> to vector<2x34xf32>
    %c6_202 = arith.constant 6 : index
    %c0_203 = arith.constant 0 : index
    %c0_204 = arith.constant 0 : index
    %267 = vector.load %arg7[%c6_202, %c0_203, %c0_204] : memref<16x34x200xf32, #tpu.memory_space<vmem>>, vector<1x34x200xf32>
    %268 = vector.shape_cast %267 : vector<1x34x200xf32> to vector<34x200xf32>
    %cst_205 = arith.constant dense<0.000000e+00> : vector<2x200xf32>
    %269 = tpu.matmul %266, %268, %cst_205 {dimension_numbers = #tpu.dot_dimension_numbers<[1], [0], [0], [1], [0, 0, 1, 1], [], []>} : vector<2x34xf32>, vector<34x200xf32>, vector<2x200xf32> -> vector<2x200xf32>
    %270 = arith.addf %264, %269 : vector<2x200xf32>
    %c0_206 = arith.constant 0 : index
    %c7_207 = arith.constant 7 : index
    %c0_208 = arith.constant 0 : index
    %271 = vector.load %arg18[%c0_206, %c7_207, %c0_208] : memref<2x16x34xf32, #tpu.memory_space<vmem>>, vector<2x1x34xf32>
    %272 = vector.shape_cast %271 : vector<2x1x34xf32> to vector<2x34xf32>
    %c7_209 = arith.constant 7 : index
    %c0_210 = arith.constant 0 : index
    %c0_211 = arith.constant 0 : index
    %273 = vector.load %arg7[%c7_209, %c0_210, %c0_211] : memref<16x34x200xf32, #tpu.memory_space<vmem>>, vector<1x34x200xf32>
    %274 = vector.shape_cast %273 : vector<1x34x200xf32> to vector<34x200xf32>
    %cst_212 = arith.constant dense<0.000000e+00> : vector<2x200xf32>
    %275 = tpu.matmul %272, %274, %cst_212 {dimension_numbers = #tpu.dot_dimension_numbers<[1], [0], [0], [1], [0, 0, 1, 1], [], []>} : vector<2x34xf32>, vector<34x200xf32>, vector<2x200xf32> -> vector<2x200xf32>
    %276 = arith.addf %270, %275 : vector<2x200xf32>
    %c0_213 = arith.constant 0 : index
    %c8_214 = arith.constant 8 : index
    %c0_215 = arith.constant 0 : index
    %277 = vector.load %arg18[%c0_213, %c8_214, %c0_215] : memref<2x16x34xf32, #tpu.memory_space<vmem>>, vector<2x1x34xf32>
    %278 = vector.shape_cast %277 : vector<2x1x34xf32> to vector<2x34xf32>
    %c8_216 = arith.constant 8 : index
    %c0_217 = arith.constant 0 : index
    %c0_218 = arith.constant 0 : index
    %279 = vector.load %arg7[%c8_216, %c0_217, %c0_218] : memref<16x34x200xf32, #tpu.memory_space<vmem>>, vector<1x34x200xf32>
    %280 = vector.shape_cast %279 : vector<1x34x200xf32> to vector<34x200xf32>
    %cst_219 = arith.constant dense<0.000000e+00> : vector<2x200xf32>
    %281 = tpu.matmul %278, %280, %cst_219 {dimension_numbers = #tpu.dot_dimension_numbers<[1], [0], [0], [1], [0, 0, 1, 1], [], []>} : vector<2x34xf32>, vector<34x200xf32>, vector<2x200xf32> -> vector<2x200xf32>
    %282 = arith.addf %276, %281 : vector<2x200xf32>
    %c0_220 = arith.constant 0 : index
    %c9 = arith.constant 9 : index
    %c0_221 = arith.constant 0 : index
    %283 = vector.load %arg18[%c0_220, %c9, %c0_221] : memref<2x16x34xf32, #tpu.memory_space<vmem>>, vector<2x1x34xf32>
    %284 = vector.shape_cast %283 : vector<2x1x34xf32> to vector<2x34xf32>
    %c9_222 = arith.constant 9 : index
    %c0_223 = arith.constant 0 : index
    %c0_224 = arith.constant 0 : index
    %285 = vector.load %arg7[%c9_222, %c0_223, %c0_224] : memref<16x34x200xf32, #tpu.memory_space<vmem>>, vector<1x34x200xf32>
    %286 = vector.shape_cast %285 : vector<1x34x200xf32> to vector<34x200xf32>
    %cst_225 = arith.constant dense<0.000000e+00> : vector<2x200xf32>
    %287 = tpu.matmul %284, %286, %cst_225 {dimension_numbers = #tpu.dot_dimension_numbers<[1], [0], [0], [1], [0, 0, 1, 1], [], []>} : vector<2x34xf32>, vector<34x200xf32>, vector<2x200xf32> -> vector<2x200xf32>
    %288 = arith.addf %282, %287 : vector<2x200xf32>
    %c0_226 = arith.constant 0 : index
    %c10 = arith.constant 10 : index
    %c0_227 = arith.constant 0 : index
    %289 = vector.load %arg18[%c0_226, %c10, %c0_227] : memref<2x16x34xf32, #tpu.memory_space<vmem>>, vector<2x1x34xf32>
    %290 = vector.shape_cast %289 : vector<2x1x34xf32> to vector<2x34xf32>
    %c10_228 = arith.constant 10 : index
    %c0_229 = arith.constant 0 : index
    %c0_230 = arith.constant 0 : index
    %291 = vector.load %arg7[%c10_228, %c0_229, %c0_230] : memref<16x34x200xf32, #tpu.memory_space<vmem>>, vector<1x34x200xf32>
    %292 = vector.shape_cast %291 : vector<1x34x200xf32> to vector<34x200xf32>
    %cst_231 = arith.constant dense<0.000000e+00> : vector<2x200xf32>
    %293 = tpu.matmul %290, %292, %cst_231 {dimension_numbers = #tpu.dot_dimension_numbers<[1], [0], [0], [1], [0, 0, 1, 1], [], []>} : vector<2x34xf32>, vector<34x200xf32>, vector<2x200xf32> -> vector<2x200xf32>
    %294 = arith.addf %288, %293 : vector<2x200xf32>
    %c0_232 = arith.constant 0 : index
    %c11 = arith.constant 11 : index
    %c0_233 = arith.constant 0 : index
    %295 = vector.load %arg18[%c0_232, %c11, %c0_233] : memref<2x16x34xf32, #tpu.memory_space<vmem>>, vector<2x1x34xf32>
    %296 = vector.shape_cast %295 : vector<2x1x34xf32> to vector<2x34xf32>
    %c11_234 = arith.constant 11 : index
    %c0_235 = arith.constant 0 : index
    %c0_236 = arith.constant 0 : index
    %297 = vector.load %arg7[%c11_234, %c0_235, %c0_236] : memref<16x34x200xf32, #tpu.memory_space<vmem>>, vector<1x34x200xf32>
    %298 = vector.shape_cast %297 : vector<1x34x200xf32> to vector<34x200xf32>
    %cst_237 = arith.constant dense<0.000000e+00> : vector<2x200xf32>
    %299 = tpu.matmul %296, %298, %cst_237 {dimension_numbers = #tpu.dot_dimension_numbers<[1], [0], [0], [1], [0, 0, 1, 1], [], []>} : vector<2x34xf32>, vector<34x200xf32>, vector<2x200xf32> -> vector<2x200xf32>
    %300 = arith.addf %294, %299 : vector<2x200xf32>
    %c0_238 = arith.constant 0 : index
    %c12 = arith.constant 12 : index
    %c0_239 = arith.constant 0 : index
    %301 = vector.load %arg18[%c0_238, %c12, %c0_239] : memref<2x16x34xf32, #tpu.memory_space<vmem>>, vector<2x1x34xf32>
    %302 = vector.shape_cast %301 : vector<2x1x34xf32> to vector<2x34xf32>
    %c12_240 = arith.constant 12 : index
    %c0_241 = arith.constant 0 : index
    %c0_242 = arith.constant 0 : index
    %303 = vector.load %arg7[%c12_240, %c0_241, %c0_242] : memref<16x34x200xf32, #tpu.memory_space<vmem>>, vector<1x34x200xf32>
    %304 = vector.shape_cast %303 : vector<1x34x200xf32> to vector<34x200xf32>
    %cst_243 = arith.constant dense<0.000000e+00> : vector<2x200xf32>
    %305 = tpu.matmul %302, %304, %cst_243 {dimension_numbers = #tpu.dot_dimension_numbers<[1], [0], [0], [1], [0, 0, 1, 1], [], []>} : vector<2x34xf32>, vector<34x200xf32>, vector<2x200xf32> -> vector<2x200xf32>
    %306 = arith.addf %300, %305 : vector<2x200xf32>
    %c0_244 = arith.constant 0 : index
    %c13 = arith.constant 13 : index
    %c0_245 = arith.constant 0 : index
    %307 = vector.load %arg18[%c0_244, %c13, %c0_245] : memref<2x16x34xf32, #tpu.memory_space<vmem>>, vector<2x1x34xf32>
    %308 = vector.shape_cast %307 : vector<2x1x34xf32> to vector<2x34xf32>
    %c13_246 = arith.constant 13 : index
    %c0_247 = arith.constant 0 : index
    %c0_248 = arith.constant 0 : index
    %309 = vector.load %arg7[%c13_246, %c0_247, %c0_248] : memref<16x34x200xf32, #tpu.memory_space<vmem>>, vector<1x34x200xf32>
    %310 = vector.shape_cast %309 : vector<1x34x200xf32> to vector<34x200xf32>
    %cst_249 = arith.constant dense<0.000000e+00> : vector<2x200xf32>
    %311 = tpu.matmul %308, %310, %cst_249 {dimension_numbers = #tpu.dot_dimension_numbers<[1], [0], [0], [1], [0, 0, 1, 1], [], []>} : vector<2x34xf32>, vector<34x200xf32>, vector<2x200xf32> -> vector<2x200xf32>
    %312 = arith.addf %306, %311 : vector<2x200xf32>
    %c0_250 = arith.constant 0 : index
    %c14 = arith.constant 14 : index
    %c0_251 = arith.constant 0 : index
    %313 = vector.load %arg18[%c0_250, %c14, %c0_251] : memref<2x16x34xf32, #tpu.memory_space<vmem>>, vector<2x1x34xf32>
    %314 = vector.shape_cast %313 : vector<2x1x34xf32> to vector<2x34xf32>
    %c14_252 = arith.constant 14 : index
    %c0_253 = arith.constant 0 : index
    %c0_254 = arith.constant 0 : index
    %315 = vector.load %arg7[%c14_252, %c0_253, %c0_254] : memref<16x34x200xf32, #tpu.memory_space<vmem>>, vector<1x34x200xf32>
    %316 = vector.shape_cast %315 : vector<1x34x200xf32> to vector<34x200xf32>
    %cst_255 = arith.constant dense<0.000000e+00> : vector<2x200xf32>
    %317 = tpu.matmul %314, %316, %cst_255 {dimension_numbers = #tpu.dot_dimension_numbers<[1], [0], [0], [1], [0, 0, 1, 1], [], []>} : vector<2x34xf32>, vector<34x200xf32>, vector<2x200xf32> -> vector<2x200xf32>
    %318 = arith.addf %312, %317 : vector<2x200xf32>
    %c0_256 = arith.constant 0 : index
    %c15 = arith.constant 15 : index
    %c0_257 = arith.constant 0 : index
    %319 = vector.load %arg18[%c0_256, %c15, %c0_257] : memref<2x16x34xf32, #tpu.memory_space<vmem>>, vector<2x1x34xf32>
    %320 = vector.shape_cast %319 : vector<2x1x34xf32> to vector<2x34xf32>
    %c15_258 = arith.constant 15 : index
    %c0_259 = arith.constant 0 : index
    %c0_260 = arith.constant 0 : index
    %321 = vector.load %arg7[%c15_258, %c0_259, %c0_260] : memref<16x34x200xf32, #tpu.memory_space<vmem>>, vector<1x34x200xf32>
    %322 = vector.shape_cast %321 : vector<1x34x200xf32> to vector<34x200xf32>
    %cst_261 = arith.constant dense<0.000000e+00> : vector<2x200xf32>
    %323 = tpu.matmul %320, %322, %cst_261 {dimension_numbers = #tpu.dot_dimension_numbers<[1], [0], [0], [1], [0, 0, 1, 1], [], []>} : vector<2x34xf32>, vector<34x200xf32>, vector<2x200xf32> -> vector<2x200xf32>
    %324 = arith.addf %318, %323 : vector<2x200xf32>
    %c0_262 = arith.constant 0 : index
    %c0_263 = arith.constant 0 : index
    %325 = vector.load %arg8[%c0_262, %c0_263] : memref<1x200xf32, #tpu.memory_space<vmem>>, vector<1x200xf32>
    %326 = vector.broadcast %325 : vector<1x200xf32> to vector<2x200xf32>
    %327 = arith.addf %324, %326 : vector<2x200xf32>
    %cst_264 = arith.constant 0.000000e+00 : f32
    %328 = vector.broadcast %cst_264 : f32 to vector<2x200xf32>
    %329 = arith.maximumf %327, %328 : vector<2x200xf32>
    %c0_265 = arith.constant 0 : index
    %c0_266 = arith.constant 0 : index
    %330 = vector.load %arg9[%c0_265, %c0_266] : memref<200x32xf32, #tpu.memory_space<vmem>>, vector<200x32xf32>
    %cst_267 = arith.constant dense<0.000000e+00> : vector<2x32xf32>
    %331 = tpu.matmul %329, %330, %cst_267 {dimension_numbers = #tpu.dot_dimension_numbers<[1], [0], [0], [1], [0, 0, 1, 1], [], []>} : vector<2x200xf32>, vector<200x32xf32>, vector<2x32xf32> -> vector<2x32xf32>
    %c0_268 = arith.constant 0 : index
    %c0_269 = arith.constant 0 : index
    %332 = vector.load %arg2[%c0_268, %c0_269] : memref<2x8xf32, #tpu.memory_space<vmem>>, vector<2x8xf32>
    %c0_270 = arith.constant 0 : index
    %c0_271 = arith.constant 0 : index
    %333 = vector.load %arg10[%c0_270, %c0_271] : memref<8x32xf32, #tpu.memory_space<vmem>>, vector<8x32xf32>
    %cst_272 = arith.constant dense<0.000000e+00> : vector<2x32xf32>
    %334 = tpu.matmul %332, %333, %cst_272 {dimension_numbers = #tpu.dot_dimension_numbers<[1], [0], [0], [1], [0, 0, 1, 1], [], []>} : vector<2x8xf32>, vector<8x32xf32>, vector<2x32xf32> -> vector<2x32xf32>
    %335 = arith.addf %331, %334 : vector<2x32xf32>
    %c0_273 = arith.constant 0 : index
    %c0_274 = arith.constant 0 : index
    %336 = vector.load %arg11[%c0_273, %c0_274] : memref<1x32xf32, #tpu.memory_space<vmem>>, vector<1x32xf32>
    %337 = vector.broadcast %336 : vector<1x32xf32> to vector<2x32xf32>
    %338 = arith.addf %335, %337 : vector<2x32xf32>
    %cst_275 = arith.constant 0.000000e+00 : f32
    %339 = vector.broadcast %cst_275 : f32 to vector<2x32xf32>
    %340 = arith.maximumf %338, %339 : vector<2x32xf32>
    %c0_276 = arith.constant 0 : index
    %c0_277 = arith.constant 0 : index
    %341 = vector.load %arg12[%c0_276, %c0_277] : memref<32x1xf32, #tpu.memory_space<vmem>>, vector<32x1xf32>
    %cst_278 = arith.constant dense<0.000000e+00> : vector<2x1xf32>
    %342 = tpu.matmul %340, %341, %cst_278 {dimension_numbers = #tpu.dot_dimension_numbers<[1], [0], [0], [1], [0, 0, 1, 1], [], []>} : vector<2x32xf32>, vector<32x1xf32>, vector<2x1xf32> -> vector<2x1xf32>
    %c0_279 = arith.constant 0 : index
    %c0_280 = arith.constant 0 : index
    %343 = vector.load %arg13[%c0_279, %c0_280] : memref<1x1xf32, #tpu.memory_space<vmem>>, vector<1x1xf32>
    %344 = vector.broadcast %343 : vector<1x1xf32> to vector<2x1xf32>
    %345 = arith.addf %342, %344 : vector<2x1xf32>
    %c0_281 = arith.constant 0 : index
    %c0_282 = arith.constant 0 : index
    %346 = vector.load %arg16[%c0_281, %c0_282] : memref<2x1xf32, #tpu.memory_space<vmem>>, vector<2x1xf32>
    tpu.vector_store %arg16[%c0_281, %c0_282], %345 {strides = array<i32>} : memref<2x1xf32, #tpu.memory_space<vmem>>, vector<2x1xf32>,
    return
  }
  func.func @transform_0(%arg0: i32) -> (i32, i32, i32) {
    %c0_i32 = arith.constant 0 : i32
    %c0_i32_0 = arith.constant 0 : i32
    %c0_i32_1 = arith.constant 0 : i32
    %c0_i32_2 = arith.constant 0 : i32
    return %c0_i32, %c0_i32_0, %c0_i32_1 : i32, i32, i32
  }
  func.func @transform_1(%arg0: i32) -> (i32, i32) {
    %c0_i32 = arith.constant 0 : i32
    %c0_i32_0 = arith.constant 0 : i32
    %c0_i32_1 = arith.constant 0 : i32
    return %c0_i32, %c0_i32_0 : i32, i32
  }
  func.func @transform_2(%arg0: i32) -> (i32, i32, i32) {
    %c0_i32 = arith.constant 0 : i32
    %c0_i32_0 = arith.constant 0 : i32
    %c0_i32_1 = arith.constant 0 : i32
    %c0_i32_2 = arith.constant 0 : i32
    return %c0_i32, %c0_i32_0, %c0_i32_1 : i32, i32, i32
  }
  func.func @transform_3(%arg0: i32) -> (i32, i32) {
    %c0_i32 = arith.constant 0 : i32
    %c0_i32_0 = arith.constant 0 : i32
    %c0_i32_1 = arith.constant 0 : i32
    return %c0_i32, %c0_i32_0 : i32, i32
  }
  func.func @transform_4(%arg0: i32) -> (i32, i32, i32) {
    %c0_i32 = arith.constant 0 : i32
    %c0_i32_0 = arith.constant 0 : i32
    %c0_i32_1 = arith.constant 0 : i32
    %c0_i32_2 = arith.constant 0 : i32
    return %c0_i32, %c0_i32_0, %c0_i32_1 : i32, i32, i32
  }
  func.func @transform_5(%arg0: i32) -> (i32, i32) {
    %c0_i32 = arith.constant 0 : i32
    %c0_i32_0 = arith.constant 0 : i32
    %c0_i32_1 = arith.constant 0 : i32
    return %c0_i32, %c0_i32_0 : i32, i32
  }
  func.func @transform_6(%arg0: i32) -> (i32, i32, i32) {
    %c0_i32 = arith.constant 0 : i32
    %c0_i32_0 = arith.constant 0 : i32
    %c0_i32_1 = arith.constant 0 : i32
    %c0_i32_2 = arith.constant 0 : i32
    return %c0_i32, %c0_i32_0, %c0_i32_1 : i32, i32, i32
  }
  func.func @transform_7(%arg0: i32) -> (i32, i32) {
    %c0_i32 = arith.constant 0 : i32
    %c0_i32_0 = arith.constant 0 : i32
    %c0_i32_1 = arith.constant 0 : i32
    return %c0_i32, %c0_i32_0 : i32, i32
  }
  func.func @transform_8(%arg0: i32) -> (i32, i32) {
    %c0_i32 = arith.constant 0 : i32
    %c0_i32_0 = arith.constant 0 : i32
    %c0_i32_1 = arith.constant 0 : i32
    return %c0_i32, %c0_i32_0 : i32, i32
  }
  func.func @transform_9(%arg0: i32) -> (i32, i32) {
    %c0_i32 = arith.constant 0 : i32
    %c0_i32_0 = arith.constant 0 : i32
    %c0_i32_1 = arith.constant 0 : i32
    return %c0_i32, %c0_i32_0 : i32, i32
  }
  func.func @transform_10(%arg0: i32) -> (i32, i32) {
    %c0_i32 = arith.constant 0 : i32
    %c0_i32_0 = arith.constant 0 : i32
    %c0_i32_1 = arith.constant 0 : i32
    return %c0_i32, %c0_i32_0 : i32, i32
  }
  func.func @transform_11(%arg0: i32) -> (i32, i32) {
    %c0_i32 = arith.constant 0 : i32
    %c0_i32_0 = arith.constant 0 : i32
    %c0_i32_1 = arith.constant 0 : i32
    return %c0_i32, %c0_i32_0 : i32, i32
  }
  func.func @transform_12(%arg0: i32) -> (i32, i32) {
    %c0_i32 = arith.constant 0 : i32
    %c0_i32_0 = arith.constant 0 : i32
    %c0_i32_1 = arith.constant 0 : i32
    return %c0_i32, %c0_i32_0 : i32, i32
  }
  func.func @transform_13(%arg0: i32) -> (i32, i32) {
    %c0_i32 = arith.constant 0 : i32
    %c0_i32_0 = arith.constant 0 : i32
    %c0_i32_1 = arith.constant 0 : i32
    return %c0_i32, %c0_i32_0 : i32, i32
  }
  func.func @transform_14(%arg0: i32) -> (i32, i32) {
    %c0_i32 = arith.constant 0 : i32
    %c0_i32_0 = arith.constant 0 : i32
    %c0_i32_1 = arith.constant 0 : i32
    return %c0_i32, %c0_i32_0 : i32, i32
  }
  func.func @transform_15(%arg0: i32) -> (i32, i32) {
    %c0_i32 = arith.constant 0 : i32
    %c0_i32_0 = arith.constant 0 : i32
    %c0_i32_1 = arith.constant 0 : i32
    return %c0_i32, %c0_i32_0 : i32, i32
  }
}

</mosaic_0001>

<bundles_post_ra>
// kernel: critic_ac_forward.1
= control target key start
LH: loop header
LB: loop body
LE: loop exit
PB: predicated region body
PF: predicated region fallthrough
CT: control target
= control target key end

     0   :  { %v12909_v3 = vmov 0.0   ;;  %s12910_s24 = smov 127   ;;  %s12911_s27 = smov 126   ;;  %v12918_v10 = vmov 0   ;;  %vm98_vm0 = vcmask 1039360   ;;  %vm109_vm1 = vcmask 1042432   ;;  %s15356_s0 = inlined_call_operand.vmem [shape: f32[2,3,1036], index: 0, kind: input, shape index: {}]   ;;  %s15357_s2 = inlined_call_operand.vmem [shape: f32[9,6,3], index: 2, kind: input, shape index: {}]   ;;  %s15358_s3 = inlined_call_operand.vmem [shape: f32[6,1], index: 3, kind: input, shape index: {}]   ;;  %s15359_s13 = inlined_call_operand.vmem [shape: f32[71,36], index: 13, kind: input, shape index: {}]   ;;  %s15360_s4 = inlined_call_operand.vmem [shape: f32[9,16,6], index: 4, kind: input, shape index: {}]   ;;  %s15361_s5 = inlined_call_operand.vmem [shape: f32[16,1], index: 5, kind: input, shape index: {}]   ;;  %s15362_s14 = inlined_call_operand.vmem [shape: f32[33,17], index: 14, kind: input, shape index: {}]   ;;  %s15363_s6 = inlined_call_operand.vmem [shape: f32[16,34,200], index: 6, kind: input, shape index: {}]   ;;  %s15364_s9 = inlined_call_operand.vmem [shape: f32[8,32], index: 9, kind: input, shape index: {}]   ;;  %s15365_s1 = inlined_call_operand.vmem [shape: f32[2,8], index: 1, kind: input, shape index: {}]   ;;  %s15366_s8 = inlined_call_operand.vmem [shape: f32[200,32], index: 8, kind: input, shape index: {}]   ;;  %s15367_s7 = inlined_call_operand.vmem [shape: f32[1,200], index: 7, kind: input, shape index: {}]   ;;  %s15368_s11 = inlined_call_operand.vmem [shape: f32[32,1], index: 11, kind: input, shape index: {}]   ;;  %s15369_s12 = inlined_call_operand.<no memory space> [shape: f32[1,1], index: 12, kind: input, shape index: {}]   ;;  %s15370_s10 = inlined_call_operand.vmem [shape: f32[1,32], index: 10, kind: input, shape index: {}]   ;;  %s15371_s15 = inlined_call_operand.vmem [shape: f32[2,1], index: 15, kind: output, shape index: {}]  }
   0x1   :  { %v13023_v0 = vld [vmem:[%s15356_s0 + $0x10] sm:$0x77]  ;;  %v13028_v1 = vld [vmem:[%s15356_s0 + $0x8] sm:$0x77]  ;;  %v13033_v2 = vld [vmem:[%s15356_s0] sm:$0x77]  ;;  %259 = vmatprep.mubr.f32.mxu1 %v12909_v3  ;;  %188 = vmatprep.mubr.f32.mxu0 %v12909_v3 }
   0x2   :  { %92 = vrot.lane.b32.xlu1 %v13023_v0, %s12910_s24  ;;  %88 = vrot.lane.b32.xlu0 %v13028_v1, %s12910_s24  ;;  %v13043_v4 = vcombine.high %v13028_v1, %v13028_v1  ;;  %v13047_v5 = vcombine.high %v13033_v2, %v13033_v2  ;;  %v13055_v6 = vcombine.high %v13023_v0, %v13023_v0  ;;  %v13064_v7 = vld [vmem:[%s15356_s0 + $0x18] sm:$0x77]  ;;  %s12912_s28 = smov 54   ;;  %s12913_s29 = smov 53   ;;  %v73_v9 = vld [vmem:[%s15356_s0 + $0x20] sm:$0x7] }
   0x3   :  { %v13096_v8 = vcombine.high %v13064_v7, %v13064_v7  ;;  %s12914_s30 = smov 52   ;;  %s12915_s16 = smov 108   ;;  %12898 = vset.pattern.permute.xlu0 %v12918_v10  ;;  %12899 = vset.pattern.permute.xlu1 %v12918_v10  ;;  %v11137_v18 = vld [vmem:[%s15357_s2 + $0x8] sm:$0x3f]  ;;  %vm105_vm2 = vcmask 23552   ;;  %vm12919_vm3 = vmmov 0  }
   0x4   :  { %s12916_s19 = smov 107   ;;  %s12917_s20 = smov 106   ;;  %v52_v21 = vld [vmem:[%s15358_s3] sm:$0x3f]  ;;  %vm723_vm4 = vcmask 1031168   ;;  %vm1056_vm5 = vcmask 441344  }
   0x5   :  { %v74_v29 = vld [vmem:[%s15357_s2] sm:$0x3f]  ;;  %v11160_v39 = vld [vmem:[%s15357_s2 + $0x10] sm:$0x3f]  ;;  %v11172_v48 = vld [vmem:[%s15357_s2 + $0x18] sm:$0x3f] }
   0x6   :  { %90 = vrot.lane.b32.xlu1 %v13043_v4, %s12910_s24  ;;  %86 = vrot.lane.b32.xlu0 %v13047_v5, %s12910_s24  ;;  %vm1389_vm6 = vcmask 433152   ;;  %vm1722_vm7 = vcmask 424960   ;;  %vm2056_vm8 = vcmask 883712   ;;  %vm2389_vm9 = vcmask 875520   ;;  %s12921_s17 = smov 88   ;;  %s12922_s18 = smov 28  }
   0x7   :  { %vm2722_vm10 = vcmask 867328   ;;  %vm3142_vm11 = vcmask 1046528   ;;  %vm3138_vm12 = vcmask 580608   ;;  %s12923_s21 = smov 68   ;;  %s12924_s22 = smov 48   ;;  %vm3386_vm13 = vcmask 556032  }
   0x8   :  { %vm3473_vm14 = vcmask 392192   ;;  %vm3558_vm15 = vcmask 228352   ;;  %s12931_s25 = smov 12   ;;  %s12932_s23 = smov 92  }
   0xa   :  { %94 = vrot.lane.b32.xlu1 %v13055_v6, %s12910_s24  ;;  %84 = vrot.lane.b32.xlu0 %v13033_v2, %s12910_s24 }
   0xe   :  { %711 = vrot.lane.b32.xlu1 %v13047_v5, %s12911_s27  ;;  %96 = vrot.lane.b32.xlu0 %v13064_v7, %s12910_s24 }
  0x12   :  { %715 = vrot.lane.b32.xlu1 %v13043_v4, %s12911_s27  ;;  %713 = vrot.lane.b32.xlu0 %v13028_v1, %s12911_s27 }
  0x16   :  { %709 = vrot.lane.b32.xlu1 %v13033_v2, %s12911_s27  ;;  %717 = vrot.lane.b32.xlu0 %v13023_v0, %s12911_s27 }
  0x1a   :  { %721 = vrot.lane.b32.xlu1 %v13064_v7, %s12911_s27  ;;  %719 = vrot.lane.b32.xlu0 %v13055_v6, %s12911_s27 }
  0x1e   :  { %1044 = vrot.lane.b32.xlu1 %v13028_v1, %s12912_s28  ;;  %1042 = vrot.lane.b32.xlu0 %v13047_v5, %s12912_s28 }
  0x22   :  { %1048 = vrot.lane.b32.xlu1 %v13023_v0, %s12912_s28  ;;  %1046 = vrot.lane.b32.xlu0 %v13043_v4, %s12912_s28 }
  0x26   :  { %1050 = vrot.lane.b32.xlu1 %v13055_v6, %s12912_s28  ;;  %1040 = vrot.lane.b32.xlu0 %v13033_v2, %s12912_s28 }
  0x2a   :  { %1054 = vrot.lane.b32.xlu1 %v13096_v8, %s12912_s28  ;;  %1052 = vrot.lane.b32.xlu0 %v13064_v7, %s12912_s28 }
  0x2e   :  { %1377 = vrot.lane.b32.xlu1 %v13028_v1, %s12913_s29  ;;  %1375 = vrot.lane.b32.xlu0 %v13047_v5, %s12913_s29 }
  0x32   :  { %1381 = vrot.lane.b32.xlu1 %v13023_v0, %s12913_s29  ;;  %1379 = vrot.lane.b32.xlu0 %v13043_v4, %s12913_s29 }
  0x36   :  { %1383 = vrot.lane.b32.xlu1 %v13055_v6, %s12913_s29  ;;  %1373 = vrot.lane.b32.xlu0 %v13033_v2, %s12913_s29 }
  0x3a   :  { %1387 = vrot.lane.b32.xlu1 %v13096_v8, %s12913_s29  ;;  %1385 = vrot.lane.b32.xlu0 %v13064_v7, %s12913_s29 }
  0x3e   :  { %1710 = vrot.lane.b32.xlu1 %v13028_v1, %s12914_s30  ;;  %1708 = vrot.lane.b32.xlu0 %v13047_v5, %s12914_s30 }
  0x42   :  { %1714 = vrot.lane.b32.xlu1 %v13023_v0, %s12914_s30  ;;  %1712 = vrot.lane.b32.xlu0 %v13043_v4, %s12914_s30 }
  0x46   :  { %1716 = vrot.lane.b32.xlu1 %v13055_v6, %s12914_s30  ;;  %1706 = vrot.lane.b32.xlu0 %v13033_v2, %s12914_s30 }
  0x4a   :  { %1720 = vrot.lane.b32.xlu1 %v13096_v8, %s12914_s30  ;;  %1718 = vrot.lane.b32.xlu0 %v13064_v7, %s12914_s30 }
  0x4e   :  { %2044 = vrot.lane.b32.xlu1 %v13043_v4, %s12915_s16  ;;  %2042 = vrot.lane.b32.xlu0 %v13028_v1, %s12915_s16 }
  0x52   :  { %2048 = vrot.lane.b32.xlu1 %v13055_v6, %s12915_s16  ;;  %2046 = vrot.lane.b32.xlu0 %v13023_v0, %s12915_s16 }
  0x56   :  { %2050 = vrot.lane.b32.xlu1 %v13064_v7, %s12915_s16  ;;  %2040 = vrot.lane.b32.xlu0 %v13047_v5, %s12915_s16 }
  0x5a   :  { %2054 = vrot.lane.b32.xlu1 %v73_v9, %s12915_s16  ;;  %2052 = vrot.lane.b32.xlu0 %v13096_v8, %s12915_s16 }
  0x5e   :  { %2377 = vrot.lane.b32.xlu1 %v13043_v4, %s12916_s19  ;;  %2375 = vrot.lane.b32.xlu0 %v13028_v1, %s12916_s19 }
  0x62   :  { %2381 = vrot.lane.b32.xlu1 %v13055_v6, %s12916_s19  ;;  %2379 = vrot.lane.b32.xlu0 %v13023_v0, %s12916_s19 }
  0x66   :  { %2383 = vrot.lane.b32.xlu1 %v13064_v7, %s12916_s19  ;;  %2373 = vrot.lane.b32.xlu0 %v13047_v5, %s12916_s19 }
  0x6a   :  { %2387 = vrot.lane.b32.xlu1 %v73_v9, %s12916_s19  ;;  %2385 = vrot.lane.b32.xlu0 %v13096_v8, %s12916_s19 }
  0x6e   :  { %2710 = vrot.lane.b32.xlu1 %v13043_v4, %s12917_s20  ;;  %2708 = vrot.lane.b32.xlu0 %v13028_v1, %s12917_s20 }
  0x72   :  { %2714 = vrot.lane.b32.xlu1 %v13055_v6, %s12917_s20  ;;  %2712 = vrot.lane.b32.xlu0 %v13023_v0, %s12917_s20 }
  0x74   :  { %v93_v11 = vpop.permute.xlu1 %92  ;;  %v89_v12 = vpop.permute.xlu0 %88 }
  0x76   :  { %2716 = vrot.lane.b32.xlu1 %v13064_v7, %s12917_s20  ;;  %2706 = vrot.lane.b32.xlu0 %v13047_v5, %s12917_s20 }
  0x78   :  { %v91_v13 = vpop.permute.xlu1 %90  ;;  %v87_v14 = vpop.permute.xlu0 %86 }
  0x79   :  { %v102_v15 = vsel %vm98_vm0, %v91_v13, %v93_v11  ;;  %v100_v16 = vsel %vm98_vm0, %v87_v14, %v89_v12  ;;  %v101_v17 = vsel %vm98_vm0, %v89_v12, %v91_v13 }
  0x7a   :  { %11141 = vmatprep.subr.msk.mxu1 %vm109_vm1, %v102_v15  ;;  %2720 = vrot.lane.b32.xlu1 %v73_v9, %s12917_s20 }
  0x7b   :  { %2718 = vrot.lane.b32.xlu0 %v13096_v8, %s12917_s20  ;;  %11138 = vmatprep.subr.msk.mxu0 %vm109_vm1, %v100_v16 }
  0x7c   :  { %11142 = vmatpush1.msk.msra.mxu1 %vm109_vm1, %v101_v17  ;;  %v95_v19 = vpop.permute.xlu1 %94  ;;  %v85_v20 = vpop.permute.xlu0 %84  ;;  %v11196_v17 = vld [vmem:[%s15357_s2 + $0x28] sm:$0x3f] }
  0x7d   :  { %v99_v22 = vsel %vm98_vm0, %v85_v20, %v87_v14  ;;  %11143 = vmatmul.mubr.msk.f32.vlgmr.msra.gmra.mrb[0].mxu1 %vm105_vm2, %v11137_v18  ;;  %11892 = vmatprep.subr.mxu1 %v12909_v3  ;;  %v103_v26 = vsel %vm98_vm0, %v93_v11, %v95_v19 }
  0x7e   :  { %11139 = vmatpush1.msk.msra.mxu0 %vm109_vm1, %v99_v22  ;;  %11894 = vmatprep.mubr.msk.f32.mxu1 %vm12919_vm3, %v12909_v3 }
  0x7f   :  { %11140 = vmatmul.mubr.msk.f32.vlgmr.msra.gmra.mrb[0].mxu0 %vm105_vm2, %v11137_v18  ;;  %3039 = vperm.xlu0 %12898, %v52_v21  }
  0x80   :  { %v712_v23 = vpop.permute.xlu1 %711  ;;  %v97_v24 = vpop.permute.xlu0 %96  ;;  %330 = vmatprep.mubr.f32.mxu0 %v12909_v3 }
  0x81   :  { %11893 = vmatpush3.msk.msra.mxu1 %vm109_vm1, %v97_v24  ;;  %v104_v25 = vsel %vm98_vm0, %v95_v19, %v97_v24 }
  0x82   :  { %11144 = vmatprep.subr.msk.mxu0 %vm109_vm1, %v104_v25  ;;  %11895 = vmatmul.mubr.msk.f32.vlgmr.msra.gmra.mrb[2].mxu1 %vm105_vm2, %v11137_v18 }
  0x83   :  { %11145 = vmatpush1.msk.msra.mxu0 %vm109_vm1, %v103_v26  ;;  %11152 = vmatprep.subr.msk.mxu1 %vm109_vm1, %v13043_v4 }
  0x84   :  { %v716_v27 = vpop.permute.xlu1 %715  ;;  %11146 = vmatmul.mubr.msk.f32.vlgmr.msra.gmra.mrb[2].mxu0 %vm105_vm2, %v11137_v18  ;;  %v714_v28 = vpop.permute.xlu0 %713  ;;  %11149 = vmatprep.subr.msk.mxu0 %vm109_vm1, %v13047_v5 }
  0x85   :  { %11150 = vmatpush1.msk.msra.mxu0 %vm109_vm1, %v13033_v2  ;;  %11153 = vmatpush1.msk.msra.mxu1 %vm109_vm1, %v13028_v1  ;;  %v725_v32 = vsel %vm723_vm4, %v712_v23, %v714_v28  ;;  %v726_v34 = vsel %vm723_vm4, %v714_v28, %v716_v27 }
  0x86   :  { %559 = vmatprep.mubr.f32.mxu1 %v12909_v3  ;;  %488 = vmatprep.mubr.f32.mxu0 %v12909_v3 }
  0x87   :  { %11154 = vmatmul.mubr.msk.f32.vlgmr.msra.gmra.mrb[0].mxu1 %vm105_vm2, %v74_v29  ;;  %11155 = vmatprep.subr.msk.mxu0 %vm109_vm1, %v13055_v6 }
  0x88   :  { %v710_v30 = vpop.permute.xlu1 %709  ;;  %11151 = vmatmul.mubr.msk.f32.vlgmr.msra.gmra.mrb[0].mxu0 %vm105_vm2, %v74_v29  ;;  %11897 = vmatprep.subr.mxu1 %v12909_v3  ;;  %v718_v31 = vpop.permute.xlu0 %717 }
  0x89   :  { %11156 = vmatpush1.msk.msra.mxu0 %vm109_vm1, %v13023_v0  ;;  %11898 = vmatpush3.msk.msra.mxu1 %vm109_vm1, %v13064_v7  ;;  %v727_v33 = vsel %vm723_vm4, %v716_v27, %v718_v31  ;;  %v724_v35 = vsel %vm723_vm4, %v710_v30, %v712_v23  ;;  %v11184_v0 = vld [vmem:[%s15357_s2 + $0x20] sm:$0x3f] }
  0x8a   :  { %11161 = vmatprep.subr.msk.mxu0 %vm109_vm1, %v725_v32  ;;  %11899 = vmatprep.mubr.msk.f32.mxu1 %vm12919_vm3, %v12909_v3 }
  0x8b   :  { %11164 = vmatprep.subr.msk.mxu1 %vm109_vm1, %v727_v33  ;;  %630 = vmatprep.mubr.f32.mxu0 %v12909_v3  ;;  %v11208_v33 = vld [vmem:[%s15357_s2 + $0x30] sm:$0x3f] }
  0x8c   :  { %11900 = vmatmul.mubr.msk.f32.vlgmr.msra.gmra.mrb[4].mxu1 %vm105_vm2, %v74_v29  ;;  %v722_v36 = vpop.permute.xlu1 %721  ;;  %11157 = vmatmul.mubr.msk.f32.vlgmr.msra.gmra.mrb[2].mxu0 %vm105_vm2, %v74_v29  ;;  %v720_v37 = vpop.permute.xlu0 %719 }
  0x8d   :  { %11165 = vmatpush1.msk.msra.mxu1 %vm109_vm1, %v726_v34  ;;  %11162 = vmatpush1.msk.msra.mxu0 %vm109_vm1, %v724_v35  ;;  %v729_v38 = vsel %vm723_vm4, %v720_v37, %v722_v36  ;;  %v728_v40 = vsel %vm723_vm4, %v718_v31, %v720_v37 }
  0x8e   :  { %11167 = vmatprep.subr.msk.mxu0 %vm109_vm1, %v729_v38  ;;  %811 = vmatprep.mubr.f32.mxu0 %v12909_v3 }
  0x8f   :  { %882 = vmatprep.mubr.f32.mxu1 %v12909_v3  ;;  %11902 = vmatprep.subr.mxu1 %v12909_v3 }
  0x90   :  { %v1045_v41 = vpop.permute.xlu1 %1044  ;;  %11163 = vmatmul.mubr.msk.f32.vlgmr.msra.gmra.mrb[0].mxu0 %vm105_vm2, %v11160_v39  ;;  %v1043_v42 = vpop.permute.xlu0 %1042  ;;  %11166 = vmatmul.mubr.msk.f32.vlgmr.msra.gmra.mrb[0].mxu1 %vm105_vm2, %v11160_v39 }
  0x91   :  { %11168 = vmatpush1.msk.msra.mxu0 %vm109_vm1, %v728_v40  ;;  %v1058_v43 = vsel %vm1056_vm5, %v1043_v42, %v1045_v41  ;;  %11903 = vmatpush3.msk.msra.mxu1 %vm109_vm1, %v722_v36 }
  0x92   :  { %11173 = vmatprep.subr.msk.mxu0 %vm109_vm1, %v1058_v43  ;;  %11904 = vmatprep.mubr.msk.f32.mxu1 %vm12919_vm3, %v12909_v3 }
  0x93   :  { %953 = vmatprep.mubr.f32.mxu0 %v12909_v3 }
  0x94   :  { %v1049_v44 = vpop.permute.xlu1 %1048  ;;  %v1047_v45 = vpop.permute.xlu0 %1046  ;;  %11905 = vmatmul.mubr.msk.f32.vlgmr.msra.gmra.mrb[6].mxu1 %vm105_vm2, %v11160_v39  ;;  %11169 = vmatmul.mubr.msk.f32.vlgmr.msra.gmra.mrb[2].mxu0 %vm105_vm2, %v11160_v39 }
  0x95   :  { %v1059_v46 = vsel %vm1056_vm5, %v1045_v41, %v1047_v45  ;;  %v1060_v47 = vsel %vm1056_vm5, %v1047_v45, %v1049_v44  ;;  %1216 = vmatprep.mubr.f32.mxu1 %v12909_v3  ;;  %1145 = vmatprep.mubr.f32.mxu0 %v12909_v3 }
  0x96   :  { %11176 = vmatprep.subr.msk.mxu1 %vm109_vm1, %v1060_v47 }
  0x97   :  { %11177 = vmatpush1.msk.msra.mxu1 %vm109_vm1, %v1059_v46 }
  0x98   :  { %v1051_v49 = vpop.permute.xlu1 %1050  ;;  %v1041_v50 = vpop.permute.xlu0 %1040  ;;  %11907 = vmatprep.subr.mxu1 %v12909_v3  ;;  %11178 = vmatmul.mubr.msk.f32.vlgmr.msra.gmra.mrb[0].mxu1 %vm105_vm2, %v11172_v48 }
  0x99   :  { %v1057_v51 = vsel %vm1056_vm5, %v1041_v50, %v1043_v42  ;;  %11909 = vmatprep.mubr.msk.f32.mxu1 %vm12919_vm3, %v12909_v3  ;;  %v1061_v56 = vsel %vm1056_vm5, %v1049_v44, %v1051_v49 }
  0x9a   :  { %11174 = vmatpush1.msk.msra.mxu0 %vm109_vm1, %v1057_v51 }
  0x9b   :  { %11175 = vmatmul.mubr.msk.f32.vlgmr.msra.gmra.mrb[0].mxu0 %vm105_vm2, %v11172_v48 }
  0x9c   :  { %v1055_v52 = vpop.permute.xlu1 %1054  ;;  %v1053_v53 = vpop.permute.xlu0 %1052  ;;  %1287 = vmatprep.mubr.f32.mxu0 %v12909_v3 }
  0x9d   :  { %v1063_v54 = vsel %vm1056_vm5, %v1053_v53, %v1055_v52  ;;  %v1062_v55 = vsel %vm1056_vm5, %v1051_v49, %v1053_v53  ;;  %v11220_v49 = vld [vmem:[%s15357_s2 + $0x38] sm:$0x3f] }
  0x9e   :  { %11179 = vmatprep.subr.msk.mxu0 %vm109_vm1, %v1062_v55  ;;  %11908 = vmatpush3.msk.msra.mxu1 %vm109_vm1, %v1063_v54 }
  0x9f   :  { %11180 = vmatpush1.msk.msra.mxu0 %vm109_vm1, %v1061_v56  ;;  %11910 = vmatmul.mubr.msk.f32.vlgmr.msra.gmra.mrb[8].mxu1 %vm105_vm2, %v11172_v48 }
  0xa0   :  { %v1378_v57 = vpop.permute.xlu1 %1377  ;;  %v1376_v58 = vpop.permute.xlu0 %1375  ;;  %11181 = vmatmul.mubr.msk.f32.vlgmr.msra.gmra.mrb[2].mxu0 %vm105_vm2, %v11172_v48  ;;  %1549 = vmatprep.mubr.f32.mxu1 %v12909_v3 }
  0xa1   :  { %v1391_v59 = vsel %vm1389_vm6, %v1376_v58, %v1378_v57  ;;  %1478 = vmatprep.mubr.f32.mxu0 %v12909_v3 }
  0xa2   :  { %11185 = vmatprep.subr.msk.mxu0 %vm109_vm1, %v1391_v59 }
  0xa4   :  { %v1382_v60 = vpop.permute.xlu1 %1381  ;;  %v1380_v61 = vpop.permute.xlu0 %1379 }
  0xa5   :  { %v1392_v62 = vsel %vm1389_vm6, %v1378_v57, %v1380_v61  ;;  %v1393_v63 = vsel %vm1389_vm6, %v1380_v61, %v1382_v60 }
  0xa6   :  { %11188 = vmatprep.subr.msk.mxu1 %vm109_vm1, %v1393_v63 }
  0xa7   :  { %11189 = vmatpush1.msk.msra.mxu1 %vm109_vm1, %v1392_v62 }
  0xa8   :  { %v1384_v1 = vpop.permute.xlu1 %1383  ;;  %v1374_v2 = vpop.permute.xlu0 %1373  ;;  %11912 = vmatprep.subr.mxu1 %v12909_v3  ;;  %11190 = vmatmul.mubr.msk.f32.vlgmr.msra.gmra.mrb[0].mxu1 %vm105_vm2, %v11184_v0 }
  0xa9   :  { %v1390_v4 = vsel %vm1389_vm6, %v1374_v2, %v1376_v58  ;;  %11914 = vmatprep.mubr.msk.f32.mxu1 %vm12919_vm3, %v12909_v3  ;;  %v1394_v9 = vsel %vm1389_vm6, %v1382_v60, %v1384_v1 }
  0xaa   :  { %11186 = vmatpush1.msk.msra.mxu0 %vm109_vm1, %v1390_v4 }
  0xab   :  { %11187 = vmatmul.mubr.msk.f32.vlgmr.msra.gmra.mrb[0].mxu0 %vm105_vm2, %v11184_v0 }
  0xac   :  { %v1388_v5 = vpop.permute.xlu1 %1387  ;;  %v1386_v6 = vpop.permute.xlu0 %1385  ;;  %1620 = vmatprep.mubr.f32.mxu0 %v12909_v3 }
  0xad   :  { %v1396_v7 = vsel %vm1389_vm6, %v1386_v6, %v1388_v5  ;;  %v1395_v8 = vsel %vm1389_vm6, %v1384_v1, %v1386_v6  ;;  %v11232_v1 = vld [vmem:[%s15357_s2 + $0x40] sm:$0x3f] }
  0xae   :  { %11191 = vmatprep.subr.msk.mxu0 %vm109_vm1, %v1395_v8  ;;  %11913 = vmatpush3.msk.msra.mxu1 %vm109_vm1, %v1396_v7 }
  0xaf   :  { %11192 = vmatpush1.msk.msra.mxu0 %vm109_vm1, %v1394_v9  ;;  %11915 = vmatmul.mubr.msk.f32.vlgmr.msra.gmra.mrb[10].mxu1 %vm105_vm2, %v11184_v0 }
  0xb0   :  { %v1711_v10 = vpop.permute.xlu1 %1710  ;;  %v1709_v11 = vpop.permute.xlu0 %1708  ;;  %11193 = vmatmul.mubr.msk.f32.vlgmr.msra.gmra.mrb[2].mxu0 %vm105_vm2, %v11184_v0  ;;  %1882 = vmatprep.mubr.f32.mxu1 %v12909_v3 }
  0xb1   :  { %v1724_v12 = vsel %vm1722_vm7, %v1709_v11, %v1711_v10  ;;  %1811 = vmatprep.mubr.f32.mxu0 %v12909_v3 }
  0xb2   :  { %11197 = vmatprep.subr.msk.mxu0 %vm109_vm1, %v1724_v12 }
  0xb4   :  { %v1715_v13 = vpop.permute.xlu1 %1714  ;;  %v1713_v14 = vpop.permute.xlu0 %1712 }
  0xb5   :  { %v1725_v15 = vsel %vm1722_vm7, %v1711_v10, %v1713_v14  ;;  %v1726_v16 = vsel %vm1722_vm7, %v1713_v14, %v1715_v13 }
  0xb6   :  { %11200 = vmatprep.subr.msk.mxu1 %vm109_vm1, %v1726_v16 }
  0xb7   :  { %11201 = vmatpush1.msk.msra.mxu1 %vm109_vm1, %v1725_v15 }
  0xb8   :  { %v1717_v18 = vpop.permute.xlu1 %1716  ;;  %v1707_v19 = vpop.permute.xlu0 %1706  ;;  %11202 = vmatmul.mubr.msk.f32.vlgmr.msra.gmra.mrb[0].mxu1 %vm105_vm2, %v11196_v17  ;;  %11917 = vmatprep.subr.mxu1 %v12909_v3 }
  0xb9   :  { %v1723_v20 = vsel %vm1722_vm7, %v1707_v19, %v1709_v11  ;;  %11919 = vmatprep.mubr.msk.f32.mxu1 %vm12919_vm3, %v12909_v3  ;;  %v1727_v25 = vsel %vm1722_vm7, %v1715_v13, %v1717_v18 }
  0xba   :  { %11198 = vmatpush1.msk.msra.mxu0 %vm109_vm1, %v1723_v20 }
  0xbb   :  { %11199 = vmatmul.mubr.msk.f32.vlgmr.msra.gmra.mrb[0].mxu0 %vm105_vm2, %v11196_v17 }
  0xbc   :  { %v1721_v21 = vpop.permute.xlu1 %1720  ;;  %v1719_v22 = vpop.permute.xlu0 %1718  ;;  %1953 = vmatprep.mubr.f32.mxu0 %v12909_v3 }
  0xbd   :  { %v1729_v23 = vsel %vm1722_vm7, %v1719_v22, %v1721_v21  ;;  %v1728_v24 = vsel %vm1722_vm7, %v1717_v18, %v1719_v22 }
  0xbe   :  { %11203 = vmatprep.subr.msk.mxu0 %vm109_vm1, %v1728_v24  ;;  %11918 = vmatpush3.msk.msra.mxu1 %vm109_vm1, %v1729_v23 }
  0xbf   :  { %11204 = vmatpush1.msk.msra.mxu0 %vm109_vm1, %v1727_v25  ;;  %11920 = vmatmul.mubr.msk.f32.vlgmr.msra.gmra.mrb[12].mxu1 %vm105_vm2, %v11196_v17 }
  0xc0   :  { %v2045_v26 = vpop.permute.xlu1 %2044  ;;  %v2043_v27 = vpop.permute.xlu0 %2042  ;;  %11205 = vmatmul.mubr.msk.f32.vlgmr.msra.gmra.mrb[2].mxu0 %vm105_vm2, %v11196_v17  ;;  %2216 = vmatprep.mubr.f32.mxu1 %v12909_v3 }
  0xc1   :  { %v2058_v28 = vsel %vm2056_vm8, %v2043_v27, %v2045_v26  ;;  %2145 = vmatprep.mubr.f32.mxu0 %v12909_v3 }
  0xc2   :  { %11209 = vmatprep.subr.msk.mxu0 %vm109_vm1, %v2058_v28 }
  0xc4   :  { %v2049_v29 = vpop.permute.xlu1 %2048  ;;  %v2047_v30 = vpop.permute.xlu0 %2046 }
  0xc5   :  { %v2059_v31 = vsel %vm2056_vm8, %v2045_v26, %v2047_v30  ;;  %v2060_v32 = vsel %vm2056_vm8, %v2047_v30, %v2049_v29 }
  0xc6   :  { %11212 = vmatprep.subr.msk.mxu1 %vm109_vm1, %v2060_v32 }
  0xc7   :  { %11213 = vmatpush1.msk.msra.mxu1 %vm109_vm1, %v2059_v31 }
  0xc8   :  { %v2051_v34 = vpop.permute.xlu1 %2050  ;;  %v2041_v35 = vpop.permute.xlu0 %2040  ;;  %11214 = vmatmul.mubr.msk.f32.vlgmr.msra.gmra.mrb[0].mxu1 %vm105_vm2, %v11208_v33  ;;  %11922 = vmatprep.subr.mxu1 %v12909_v3 }
  0xc9   :  { %v2057_v36 = vsel %vm2056_vm8, %v2041_v35, %v2043_v27  ;;  %11924 = vmatprep.mubr.msk.f32.mxu1 %vm12919_vm3, %v12909_v3  ;;  %v2061_v41 = vsel %vm2056_vm8, %v2049_v29, %v2051_v34 }
  0xca   :  { %11210 = vmatpush1.msk.msra.mxu0 %vm109_vm1, %v2057_v36 }
  0xcb   :  { %11211 = vmatmul.mubr.msk.f32.vlgmr.msra.gmra.mrb[0].mxu0 %vm105_vm2, %v11208_v33 }
  0xcc   :  { %v2055_v37 = vpop.permute.xlu1 %2054  ;;  %v2053_v38 = vpop.permute.xlu0 %2052  ;;  %2287 = vmatprep.mubr.f32.mxu0 %v12909_v3 }
  0xcd   :  { %v2063_v39 = vsel %vm2056_vm8, %v2053_v38, %v2055_v37  ;;  %v2062_v40 = vsel %vm2056_vm8, %v2051_v34, %v2053_v38 }
  0xce   :  { %11215 = vmatprep.subr.msk.mxu0 %vm109_vm1, %v2062_v40  ;;  %11923 = vmatpush3.msk.msra.mxu1 %vm109_vm1, %v2063_v39 }
  0xcf   :  { %11216 = vmatpush1.msk.msra.mxu0 %vm109_vm1, %v2061_v41  ;;  %11925 = vmatmul.mubr.msk.f32.vlgmr.msra.gmra.mrb[14].mxu1 %vm105_vm2, %v11208_v33 }
  0xd0   :  { %v2378_v42 = vpop.permute.xlu1 %2377  ;;  %v2376_v43 = vpop.permute.xlu0 %2375  ;;  %11217 = vmatmul.mubr.msk.f32.vlgmr.msra.gmra.mrb[2].mxu0 %vm105_vm2, %v11208_v33  ;;  %2549 = vmatprep.mubr.f32.mxu1 %v12909_v3 }
  0xd1   :  { %v2391_v44 = vsel %vm2389_vm9, %v2376_v43, %v2378_v42  ;;  %2478 = vmatprep.mubr.f32.mxu0 %v12909_v3 }
  0xd2   :  { %11221 = vmatprep.subr.msk.mxu0 %vm109_vm1, %v2391_v44 }
  0xd4   :  { %v2382_v45 = vpop.permute.xlu1 %2381  ;;  %v2380_v46 = vpop.permute.xlu0 %2379 }
  0xd5   :  { %v2392_v47 = vsel %vm2389_vm9, %v2378_v42, %v2380_v46  ;;  %v2393_v48 = vsel %vm2389_vm9, %v2380_v46, %v2382_v45 }
  0xd6   :  { %11224 = vmatprep.subr.msk.mxu1 %vm109_vm1, %v2393_v48 }
  0xd7   :  { %11225 = vmatpush1.msk.msra.mxu1 %vm109_vm1, %v2392_v47 }
  0xd8   :  { %v2384_v50 = vpop.permute.xlu1 %2383  ;;  %v2374_v51 = vpop.permute.xlu0 %2373  ;;  %11226 = vmatmul.mubr.msk.f32.vlgmr.msra.gmra.mrb[0].mxu1 %vm105_vm2, %v11220_v49  ;;  %11927 = vmatprep.subr.mxu1 %v12909_v3 }
  0xd9   :  { %v2390_v52 = vsel %vm2389_vm9, %v2374_v51, %v2376_v43  ;;  %11929 = vmatprep.mubr.msk.f32.mxu1 %vm12919_vm3, %v12909_v3  ;;  %v2394_v57 = vsel %vm2389_vm9, %v2382_v45, %v2384_v50 }
  0xda   :  { %11222 = vmatpush1.msk.msra.mxu0 %vm109_vm1, %v2390_v52 }
  0xdb   :  { %11223 = vmatmul.mubr.msk.f32.vlgmr.msra.gmra.mrb[0].mxu0 %vm105_vm2, %v11220_v49 }
  0xdc   :  { %v2388_v53 = vpop.permute.xlu1 %2387  ;;  %v2386_v54 = vpop.permute.xlu0 %2385  ;;  %2620 = vmatprep.mubr.f32.mxu0 %v12909_v3 }
  0xdd   :  { %v2396_v55 = vsel %vm2389_vm9, %v2386_v54, %v2388_v53  ;;  %v2395_v56 = vsel %vm2389_vm9, %v2384_v50, %v2386_v54 }
  0xde   :  { %11227 = vmatprep.subr.msk.mxu0 %vm109_vm1, %v2395_v56  ;;  %11928 = vmatpush3.msk.msra.mxu1 %vm109_vm1, %v2396_v55 }
  0xdf   :  { %11228 = vmatpush1.msk.msra.mxu0 %vm109_vm1, %v2394_v57  ;;  %11930 = vmatmul.mubr.msk.f32.vlgmr.msra.gmra.mrb[16].mxu1 %vm105_vm2, %v11220_v49 }
  0xe0   :  { %v2711_v58 = vpop.permute.xlu1 %2710  ;;  %v2709_v59 = vpop.permute.xlu0 %2708  ;;  %11229 = vmatmul.mubr.msk.f32.vlgmr.msra.gmra.mrb[2].mxu0 %vm105_vm2, %v11220_v49  ;;  %2882 = vmatprep.mubr.f32.mxu1 %v12909_v3 }
  0xe1   :  { %v2724_v60 = vsel %vm2722_vm10, %v2709_v59, %v2711_v58  ;;  %2811 = vmatprep.mubr.f32.mxu0 %v12909_v3 }
  0xe2   :  { %11233 = vmatprep.subr.msk.mxu0 %vm109_vm1, %v2724_v60  ;;  %v56_v60 = vld [vmem:[%s15359_s13 + $0x8] sm:$0xff] }
  0xe4   :  { %v2715_v61 = vpop.permute.xlu1 %2714  ;;  %v2713_v62 = vpop.permute.xlu0 %2712 }
  0xe5   :  { %v2725_v63 = vsel %vm2722_vm10, %v2711_v58, %v2713_v62  ;;  %v2726_v0 = vsel %vm2722_vm10, %v2713_v62, %v2715_v61  ;;  %v12920_v58 = vmov 0.0|0.0   ;;  %v57_v62 = vld [vmem:[%s15359_s13 + $0x10] sm:$0xff] }
  0xe6   :  { %11236 = vmatprep.subr.msk.mxu1 %vm109_vm1, %v2726_v0 }
  0xe7   :  { %11237 = vmatpush1.msk.msra.mxu1 %vm109_vm1, %v2725_v63  ;;  %v58_v63 = vld [vmem:[%s15359_s13 + $0x18] sm:$0xff] }
  0xe8   :  { %v2717_v2 = vpop.permute.xlu1 %2716  ;;  %11238 = vmatmul.mubr.msk.f32.vlgmr.msra.gmra.mrb[0].mxu1 %vm105_vm2, %v11232_v1  ;;  %v2707_v4 = vpop.permute.xlu0 %2706  ;;  %11932 = vmatprep.subr.mxu1 %v12909_v3  ;;  %v13492_v0 = vpack.c.bf16 %v58_v63, %v57_v62  ;;  %v11260_v63 = vld [vmem:[%s15356_s0 + $0x44] sm:$0x7] }
  0xe9   :  { %v2723_v5 = vsel %vm2722_vm10, %v2707_v4, %v2709_v59  ;;  %11934 = vmatprep.mubr.msk.f32.mxu1 %vm12919_vm3, %v12909_v3  ;;  %v2727_v10 = vsel %vm2722_vm10, %v2715_v61, %v2717_v2  ;;  %v55_v59 = vld [vmem:[%s15359_s13] sm:$0xff] }
  0xea   :  { %11234 = vmatpush1.msk.msra.mxu0 %vm109_vm1, %v2723_v5  ;;  %v13481_v61 = vpack.c.bf16 %v56_v60, %v55_v59 }
  0xeb   :  { %11235 = vmatmul.mubr.msk.f32.vlgmr.msra.gmra.mrb[0].mxu0 %vm105_vm2, %v11232_v1 }
  0xec   :  { %v2721_v6 = vpop.permute.xlu1 %2720  ;;  %2953 = vmatprep.mubr.f32.mxu0 %v12909_v3 }
  0xed   :  { %v2719_v7 = vpop.permute.xlu0 %2718 }
  0xee   :  { %v2729_v8 = vsel %vm2722_vm10, %v2719_v7, %v2721_v6  ;;  %v2728_v9 = vsel %vm2722_vm10, %v2717_v2, %v2719_v7  ;;  %v60_v2 = vld [vmem:[%s15359_s13 + $0x28] sm:$0xff]  ;;  %v61_v6 = vld [vmem:[%s15359_s13 + $0x30] sm:$0xff]  ;;  %v62_v7 = vld [vmem:[%s15359_s13 + $0x38] sm:$0xff] }
  0xef   :  { %11239 = vmatprep.subr.msk.mxu0 %vm109_vm1, %v2728_v9  ;;  %11933 = vmatpush3.msk.msra.mxu1 %vm109_vm1, %v2729_v8  ;;  %v13517_v8 = vpack.c.bf16 %v62_v7, %v61_v6 }
  0xf0   :  { %11240 = vmatpush1.msk.msra.mxu0 %vm109_vm1, %v2727_v10  ;;  %11935 = vmatmul.mubr.msk.f32.vlgmr.msra.gmra.mrb[18].mxu1 %vm105_vm2, %v11232_v1 }
  0xf1   :  { %11241 = vmatmul.mubr.msk.f32.vlgmr.msra.gmra.mrb[2].mxu0 %vm105_vm2, %v11232_v1  ;;  %11955 = vmatprep.mubr.msk.f32.mxu1 %vm12919_vm3, %v12909_v3  ;;  %v59_v1 = vld [vmem:[%s15359_s13 + $0x20] sm:$0xff] }
  0xf2   :  { %12039 = vmatprep.mubr.msk.f32.mxu0 %vm12919_vm3, %v12909_v3  ;;  %12347 = vmatprep.subr.bf16.mxu1 %v12920_v58  ;;  %v13505_v4 = vpack.c.bf16 %v60_v2, %v59_v1 }
  0xf3   :  { %12395 = vmatprep.subr.bf16.mxu0 %v12920_v58  ;;  %12349 = vmatpush3.bf16.msra.mxu1 %v13481_v61 }
  0xf4   :  { %12397 = vmatpush3.bf16.msra.mxu0 %v13481_v61  ;;  %12350 = vmatprep.subr.bf16.mxu1 %v12920_v58 }
  0xf5   :  { %12398 = vmatprep.subr.bf16.mxu0 %v12920_v58 }
  0xf7   :  { %12352 = vmatpush3.bf16.msra.mxu1 %v13492_v0 }
  0xf8   :  { %12400 = vmatpush3.bf16.msra.mxu0 %v13492_v0  ;;  %12353 = vmatprep.subr.bf16.mxu1 %v12920_v58 }
  0xf9   :  { %12401 = vmatprep.subr.bf16.mxu0 %v12920_v58 }
  0xfb   :  { %12355 = vmatpush3.bf16.msra.mxu1 %v13505_v4 }
  0xfc   :  { %12403 = vmatpush3.bf16.msra.mxu0 %v13505_v4  ;;  %12356 = vmatprep.subr.bf16.mxu1 %v12920_v58 }
  0xfd   :  { %12404 = vmatprep.subr.bf16.mxu0 %v12920_v58 }
  0xfe   :  { %v13428_v34 = vpop.permute.xlu0 %3039 }
  0xff   :  { %12358 = vmatpush3.bf16.msra.mxu1 %v13517_v8 }
 0x100   :  { %12406 = vmatpush3.bf16.msra.mxu0 %v13517_v8  ;;  %11953 = vmatprep.subr.mxu1 %v12909_v3 }
 0x101   :  { %12037 = vmatprep.subr.mxu0 %v12909_v3 }
 0x155   :  { %v403_v11 = vpop.f32.mrb[2].mxu1 }
 0x156   :  { %v11896_v12 = vpop.f32.mrb[3].mxu1 }
 0x15f   :  { %v703_v13 = vpop.f32.mrb[4].mxu1 }
 0x160   :  { %v704_v14 = vadd.f32 %v703_v13, %v403_v11  ;;  %v11901_v15 = vpop.f32.mrb[5].mxu1  ;;  %v13525_v11 = vld [vmem:[%s15359_s13 + $0x40] sm:$0x7f] }
 0x161   :  { %11954 = vmatpush3.msk.msra.mxu1 %vm3142_vm11, %v13525_v11  ;;  %12038 = vmatpush3.msk.msra.mxu0 %vm3142_vm11, %v13525_v11 }
 0x162   :  { %12359 = vmatprep.subr.bf16.mxu1 %v12920_v58 }
 0x167   :  { %v1026_v16 = vpop.f32.mrb[6].mxu1 }
 0x168   :  { %v1036_v17 = vadd.f32 %v1026_v16, %v704_v14  ;;  %v11906_v18 = vpop.f32.mrb[7].mxu1 }
 0x172   :  { %v1360_v19 = vpop.f32.mrb[8].mxu1 }
 0x173   :  { %v1370_v20 = vadd.f32 %v1360_v19, %v1036_v17  ;;  %v11911_v21 = vpop.f32.mrb[9].mxu1 }
 0x182   :  { %v1693_v22 = vpop.f32.mrb[10].mxu1 }
 0x183   :  { %v1703_v23 = vadd.f32 %v1693_v22, %v1370_v20  ;;  %v11916_v24 = vpop.f32.mrb[11].mxu1 }
 0x192   :  { %v2026_v25 = vpop.f32.mrb[12].mxu1 }
 0x193   :  { %v2036_v26 = vadd.f32 %v2026_v25, %v1703_v23  ;;  %v11921_v27 = vpop.f32.mrb[13].mxu1 }
 0x1a2   :  { %v2360_v28 = vpop.f32.mrb[14].mxu1 }
 0x1a3   :  { %v2370_v29 = vadd.f32 %v2360_v28, %v2036_v26  ;;  %v11926_v30 = vpop.f32.mrb[15].mxu1  ;;  %v13554_v26 = vld [vmem:[%s15356_s0 + $0x24] sm:$0x77] }
 0x1b2   :  { %v2693_v31 = vpop.f32.mrb[16].mxu1 }
 0x1b3   :  { %v2703_v32 = vadd.f32 %v2693_v31, %v2370_v29  ;;  %v11931_v33 = vpop.f32.mrb[17].mxu1  ;;  %v13567_v29 = vcombine.high %v13554_v26, %v13554_v26  ;;  %v13577_v31 = vld [vmem:[%s15356_s0 + $0x2c] sm:$0x77] }
 0x1b4   :  { %v13590_v33 = vld [vmem:[%s15356_s0 + $0x34] sm:$0x77] }
 0x1bb   :  { %v2884_v35 = vpop.f32.mrb[0].mxu1 }
 0x1bc   :  { %v2886_v36 = vpop.f32.mrb[1].mxu1  ;;  %v13442_v43 = vadd.f32 %v13428_v34, %v2884_v35  ;;  %v13596_v35 = vcombine.high %v13590_v33, %v13590_v33 }
 0x1bd   :  { %v13431_v37 = vadd.f32 %v13428_v34, %v2886_v36  ;;  %v13603_v36 = vld [vmem:[%s15356_s0 + $0x3c] sm:$0x77]  ;;  %s12933_s0 = smov 91  }
 0x1be   :  { %v2813_v38 = vpop.f32.mrb[0].mxu0  ;;  %v3051_v51 = vmax.f32 %v13442_v43, 0.0 }
 0x1bf   :  { %v3052_v39 = vmax.f32 %v13431_v37, 0.0  ;;  %v2815_v40 = vpop.f32.mrb[1].mxu0  ;;  %v13453_v52 = vadd.f32 %v13428_v34, %v2813_v38 }
 0x1c0   :  { %v13435_v41 = vadd.f32 %v13428_v34, %v2815_v40 }
 0x1c1   :  { %3069 = vrot.lane.b32.xlu0 %v3052_v39, %s12910_s24  ;;  %v3049_v56 = vmax.f32 %v13453_v52, 0.0 }
 0x1c2   :  { %v3050_v42 = vmax.f32 %v13435_v41, 0.0 }
 0x1c3   :  { %v3026_v44 = vpop.f32.mrb[18].mxu1 }
 0x1c4   :  { %v3036_v45 = vadd.f32 %v3026_v44, %v2703_v32  ;;  %v2955_v46 = vpop.f32.mrb[2].mxu0  ;;  %3065 = vrot.lane.b32.xlu1 %v3050_v42, %s12910_s24  ;;  %v11936_v47 = vpop.f32.mrb[19].mxu1  ;;  %v13583_v32 = vcombine.high %v13577_v31, %v13577_v31 }
 0x1c5   :  { %v2957_v48 = vpop.f32.mrb[3].mxu0  ;;  %v13446_v49 = vadd.f32 %v13428_v34, %v2955_v46 }
 0x1c6   :  { %v13449_v50 = vadd.f32 %v13428_v34, %v2957_v48  ;;  %v13458_v54 = vadd.f32 %v13428_v34, %v3036_v45 }
 0x1c7   :  { %v3053_v55 = vmax.f32 %v13446_v49, 0.0 }
 0x1c8   :  { %v3054_v53 = vmax.f32 %v13449_v50, 0.0  ;;  %3067 = vrot.lane.b32.xlu1 %v3051_v51, %s12910_s24  ;;  %v3055_v57 = vmax.f32 %v13458_v54, 0.0 }
 0x1ca   :  { %3073 = vrot.lane.b32.xlu0 %v3054_v53, %s12910_s24 }
 0x1cc   :  { %3071 = vrot.lane.b32.xlu1 %v3053_v55, %s12910_s24 }
 0x1ce   :  { %3063 = vrot.lane.b32.xlu0 %v3049_v56, %s12910_s24 }
 0x1d0   :  { %3075 = vrot.lane.b32.xlu1 %v3055_v57, %s12910_s24 }
 0x233   :  { %v3070_v9 = vpop.permute.xlu0 %3069 }
 0x236   :  { %v3066_v5 = vpop.permute.xlu1 %3065 }
 0x23a   :  { %v3068_v10 = vpop.permute.xlu1 %3067 }
 0x23b   :  { %v3078_v12 = vsel %vm98_vm0, %v3066_v5, %v3068_v10  ;;  %v3079_v13 = vsel %vm98_vm0, %v3068_v10, %v3070_v9 }
 0x23c   :  { %v3074_v14 = vpop.permute.xlu0 %3073  ;;  %v3091_v15 = vmax.f32 %v3050_v42, %v3078_v12  ;;  %v3092_v16 = vmax.f32 %v3051_v51, %v3079_v13 }
 0x23e   :  { %3106 = vrot.lane.b32.xlu1 %v3091_v15, %s12912_s28  ;;  %v3072_v17 = vpop.permute.xlu1 %3071  ;;  %3108 = vrot.lane.b32.xlu0 %v3092_v16, %s12912_s28 }
 0x23f   :  { %v3080_v18 = vsel %vm98_vm0, %v3070_v9, %v3072_v17  ;;  %v3081_v19 = vsel %vm98_vm0, %v3072_v17, %v3074_v14 }
 0x240   :  { %v3064_v20 = vpop.permute.xlu0 %3063  ;;  %v13541_v21 = vmax.f32 %v3052_v39, %v3080_v18  ;;  %v13543_v22 = vmax.f32 %v3053_v55, %v3081_v19 }
 0x241   :  { %v3077_v23 = vsel %vm98_vm0, %v3064_v20, %v3066_v5 }
 0x242   :  { %3110 = vrot.lane.b32.xlu1 %v13541_v21, %s12912_s28  ;;  %v3076_v24 = vpop.permute.xlu1 %3075  ;;  %3112 = vrot.lane.b32.xlu0 %v13543_v22, %s12912_s28  ;;  %v3090_v27 = vmax.f32 %v3049_v56, %v3077_v23 }
 0x243   :  { %v3082_v25 = vsel %vm98_vm0, %v3074_v14, %v3076_v24  ;;  %v3096_v30 = vmax.f32 %v3055_v57, %v3076_v24  ;;  %v13666_v57 = vcombine.high %v13603_v36, %v13603_v36 }
 0x244   :  { %v13560_v28 = vmax.f32 %v3054_v53, %v3082_v25 }
 0x246   :  { %3114 = vrot.lane.b32.xlu1 %v13560_v28, %s12912_s28  ;;  %3104 = vrot.lane.b32.xlu0 %v3090_v27, %s12912_s28 }
 0x24a   :  { %3116 = vrot.lane.b32.xlu1 %v3096_v30, %s12912_s28  ;;  %3655 = vrot.lane.b32.xlu0 %v13567_v29, %s12910_s24 }
 0x24e   :  { %3657 = vrot.lane.b32.xlu1 %v13577_v31, %s12910_s24  ;;  %3653 = vrot.lane.b32.xlu0 %v13554_v26, %s12910_s24 }
 0x252   :  { %3659 = vrot.lane.b32.xlu1 %v13583_v32, %s12910_s24  ;;  %3661 = vrot.lane.b32.xlu0 %v13590_v33, %s12910_s24 }
 0x256   :  { %3663 = vrot.lane.b32.xlu1 %v13596_v35, %s12910_s24  ;;  %3665 = vrot.lane.b32.xlu0 %v13603_v36, %s12910_s24 }
 0x25a   :  { %4276 = vrot.lane.b32.xlu1 %v13567_v29, %s12911_s27 }
 0x25e   :  { %4274 = vrot.lane.b32.xlu1 %v13554_v26, %s12911_s27 }
 0x262   :  { %4282 = vrot.lane.b32.xlu1 %v13590_v33, %s12911_s27 }
 0x266   :  { %4286 = vrot.lane.b32.xlu1 %v13603_v36, %s12911_s27 }
 0x2b0   :  { %v3107_v37 = vpop.permute.xlu1 %3106  ;;  %v3109_v38 = vpop.permute.xlu0 %3108 }
 0x2b1   :  { %v3119_v39 = vsel %vm1056_vm5, %v3107_v37, %v3109_v38 }
 0x2b2   :  { %v3132_v40 = vmax.f32 %v3091_v15, %v3119_v39 }
 0x2b4   :  { %v3111_v41 = vpop.permute.xlu1 %3110  ;;  %3219 = vrot.lane.b32.xlu0 %v3132_v40, %s12915_s16  ;;  %v3113_v42 = vpop.permute.xlu0 %3112 }
 0x2b5   :  { %v3120_v43 = vsel %vm1056_vm5, %v3109_v38, %v3111_v41  ;;  %v3121_v56 = vsel %vm1056_vm5, %v3111_v41, %v3113_v42 }
 0x2b6   :  { %v3133_v44 = vmax.f32 %v3092_v16, %v3120_v43  ;;  %v3134_v59 = vmax.f32 %v13541_v21, %v3121_v56 }
 0x2b8   :  { %v3115_v45 = vpop.permute.xlu1 %3114  ;;  %3300 = vrot.lane.b32.xlu1 %v3133_v44, %s12921_s17  ;;  %4278 = vrot.lane.b32.xlu0 %v13577_v31, %s12911_s27  ;;  %v3105_v46 = vpop.permute.xlu0 %3104 }
 0x2b9   :  { %v3118_v47 = vsel %vm1056_vm5, %v3105_v46, %v3107_v37  ;;  %v3122_v54 = vsel %vm1056_vm5, %v3113_v42, %v3115_v45 }
 0x2ba   :  { %v3131_v48 = vmax.f32 %v3090_v27, %v3118_v47  ;;  %v3135_v55 = vmax.f32 %v13543_v22, %v3122_v54 }
 0x2bc   :  { %v3117_v49 = vpop.permute.xlu1 %3116  ;;  %4607 = vrot.lane.b32.xlu1 %v13577_v31, %s12912_s28  ;;  %4280 = vrot.lane.b32.xlu0 %v13583_v32, %s12911_s27  ;;  %v13639_v51 = vpop.permute.xlu0 %3655 }
 0x2bd   :  { %11956 = vmatmul.mubr.msk.f32.vlgmr.msra.gmra.mrb[20].mxu1 %vm3138_vm12, %v3131_v48  ;;  %v3137_v53 = vmax.f32 %v3096_v30, %v3117_v49  ;;  %v3123_v60 = vsel %vm1056_vm5, %v3115_v45, %v3117_v49  ;;  %v11261_v49 = vld [vmem:[%s15357_s2 + $0x8] sm:$0x3f] }
 0x2be   :  { %12361 = vmatpush3.bf16.msra.mxu1 %v13481_v61  ;;  %11976 = vmatprep.mubr.msk.f32.mxu1 %vm12919_vm3, %v12909_v3  ;;  %v3136_v62 = vmax.f32 %v13560_v28, %v3123_v60  ;;  %v3644_v60 = vld [vmem:[%s15357_s2] sm:$0x3f] }
 0x2bf   :  { %12362 = vmatprep.subr.bf16.mxu1 %v12920_v58 }
 0x2c0   :  { %4609 = vrot.lane.b32.xlu1 %v13583_v32, %s12912_s28  ;;  %4284 = vrot.lane.b32.xlu0 %v13596_v35, %s12911_s27  ;;  %v13637_v50 = vpop.permute.xlu1 %3657  ;;  %v13749_v6 = vpop.permute.xlu0 %3653 }
 0x2c1   :  { %v3668_v52 = vsel %vm98_vm0, %v13639_v51, %v13637_v50  ;;  %v3667_v47 = vsel %vm98_vm0, %v13749_v6, %v13639_v51 }
 0x2c2   :  { %11262 = vmatprep.subr.msk.mxu0 %vm109_vm1, %v3668_v52  ;;  %12364 = vmatpush3.bf16.msra.mxu1 %v13492_v0 }
 0x2c3   :  { %12365 = vmatprep.subr.bf16.mxu1 %v12920_v58 }
 0x2c4   :  { %3556 = vrot.lane.b32.xlu1 %v3137_v53, %s12922_s18  ;;  %4605 = vrot.lane.b32.xlu0 %v13567_v29, %s12912_s28  ;;  %v13728_v1 = vpop.permute.xlu1 %3659  ;;  %v13757_v9 = vpop.permute.xlu0 %3661 }
 0x2c6   :  { %12367 = vmatpush3.bf16.msra.mxu1 %v13505_v4 }
 0x2c7   :  { %12368 = vmatprep.subr.bf16.mxu1 %v12920_v58 }
 0x2c8   :  { %4603 = vrot.lane.b32.xlu0 %v13554_v26, %s12912_s28  ;;  %3384 = vrot.lane.b32.xlu1 %v3135_v55, %s12923_s21  ;;  %v13736_v2 = vpop.permute.xlu1 %3663  ;;  %v13767_v12 = vpop.permute.xlu0 %3665 }
 0x2c9   :  { %v3672_v48 = vsel %vm98_vm0, %v13736_v2, %v13767_v12  ;;  %v3671_v53 = vsel %vm98_vm0, %v13757_v9, %v13736_v2 }
 0x2ca   :  { %12370 = vmatpush3.bf16.msra.mxu1 %v13517_v8 }
 0x2cb   :  { %11974 = vmatprep.subr.mxu1 %v12909_v3 }
 0x2cc   :  { %4611 = vrot.lane.b32.xlu0 %v13590_v33, %s12912_s28  ;;  %4613 = vrot.lane.b32.xlu1 %v13596_v35, %s12912_s28  ;;  %v13744_v5 = vpop.permute.xlu1 %4276 }
 0x2ce   :  { %11975 = vmatpush3.msk.msra.mxu1 %vm3142_vm11, %v13525_v11 }
 0x2cf   :  { %12371 = vmatprep.subr.bf16.mxu1 %v12920_v58 }
 0x2d0   :  { %4617 = vrot.lane.b32.xlu1 %v13666_v57, %s12912_s28  ;;  %3382 = vrot.lane.b32.xlu0 %v3134_v59, %s12923_s21  ;;  %v13753_v7 = vpop.permute.xlu1 %4274  ;;  %v3669_v59 = vsel %vm98_vm0, %v13637_v50, %v13728_v1 }
 0x2d4   :  { %4938 = vrot.lane.b32.xlu1 %v13577_v31, %s12913_s29  ;;  %4615 = vrot.lane.b32.xlu0 %v13603_v36, %s12912_s28  ;;  %v13763_v10 = vpop.permute.xlu1 %4282 }
 0x2d8   :  { %3471 = vrot.lane.b32.xlu1 %v3136_v62, %s12924_s22  ;;  %4936 = vrot.lane.b32.xlu0 %v13567_v29, %s12913_s29  ;;  %v13773_v13 = vpop.permute.xlu1 %4286 }
 0x2dc   :  { %4934 = vrot.lane.b32.xlu0 %v13554_v26, %s12913_s29  ;;  %4940 = vrot.lane.b32.xlu1 %v13583_v32, %s12913_s29 }
 0x2e0   :  { %3469 = vrot.lane.b32.xlu0 %v3135_v55, %s12924_s22  ;;  %4944 = vrot.lane.b32.xlu1 %v13596_v35, %s12913_s29 }
 0x2e4   :  { %4942 = vrot.lane.b32.xlu0 %v13590_v33, %s12913_s29  ;;  %4948 = vrot.lane.b32.xlu1 %v13666_v57, %s12913_s29 }
 0x2e8   :  { %3554 = vrot.lane.b32.xlu0 %v3136_v62, %s12922_s18  ;;  %5269 = vrot.lane.b32.xlu1 %v13577_v31, %s12914_s30 }
 0x2ec   :  { %4946 = vrot.lane.b32.xlu0 %v13603_v36, %s12913_s29  ;;  %5271 = vrot.lane.b32.xlu1 %v13583_v32, %s12914_s30 }
 0x2f0   :  { %5267 = vrot.lane.b32.xlu0 %v13567_v29, %s12914_s30  ;;  %5275 = vrot.lane.b32.xlu1 %v13596_v35, %s12914_s30 }
 0x2f4   :  { %5265 = vrot.lane.b32.xlu0 %v13554_v26, %s12914_s30  ;;  %5279 = vrot.lane.b32.xlu1 %v13666_v57, %s12914_s30 }
 0x2f8   :  { %5273 = vrot.lane.b32.xlu0 %v13590_v33, %s12914_s30  ;;  %5601 = vrot.lane.b32.xlu1 %v13583_v32, %s12915_s16 }
 0x2fc   :  { %5277 = vrot.lane.b32.xlu0 %v13603_v36, %s12914_s30  ;;  %5603 = vrot.lane.b32.xlu1 %v13590_v33, %s12915_s16 }
 0x300   :  { %5599 = vrot.lane.b32.xlu0 %v13577_v31, %s12915_s16  ;;  %5607 = vrot.lane.b32.xlu1 %v13603_v36, %s12915_s16 }
 0x304   :  { %5597 = vrot.lane.b32.xlu0 %v13567_v29, %s12915_s16  ;;  %5611 = vrot.lane.b32.xlu1 %v11260_v63, %s12915_s16 }
 0x308   :  { %5605 = vrot.lane.b32.xlu0 %v13596_v35, %s12915_s16  ;;  %5932 = vrot.lane.b32.xlu1 %v13583_v32, %s12916_s19 }
 0x30c   :  { %5609 = vrot.lane.b32.xlu0 %v13666_v57, %s12915_s16  ;;  %5934 = vrot.lane.b32.xlu1 %v13590_v33, %s12916_s19 }
 0x310   :  { %5930 = vrot.lane.b32.xlu0 %v13577_v31, %s12916_s19  ;;  %5938 = vrot.lane.b32.xlu1 %v13603_v36, %s12916_s19 }
 0x314   :  { %5928 = vrot.lane.b32.xlu0 %v13567_v29, %s12916_s19  ;;  %5942 = vrot.lane.b32.xlu1 %v11260_v63, %s12916_s19 }
 0x318   :  { %5936 = vrot.lane.b32.xlu0 %v13596_v35, %s12916_s19  ;;  %6263 = vrot.lane.b32.xlu1 %v13583_v32, %s12917_s20 }
 0x31c   :  { %5940 = vrot.lane.b32.xlu0 %v13666_v57, %s12916_s19  ;;  %6265 = vrot.lane.b32.xlu1 %v13590_v33, %s12917_s20  ;;  %s12934_s19 = smov 90  }
 0x320   :  { %6261 = vrot.lane.b32.xlu0 %v13577_v31, %s12917_s20  ;;  %6269 = vrot.lane.b32.xlu1 %v13603_v36, %s12917_s20 }
 0x324   :  { %6259 = vrot.lane.b32.xlu0 %v13567_v29, %s12917_s20  ;;  %6273 = vrot.lane.b32.xlu1 %v11260_v63, %s12917_s20 }
 0x326   :  { %v3220_v14 = vpop.permute.xlu0 %3219 }
 0x327   :  { %11977 = vmatmul.mubr.msk.f32.vlgmr.msra.gmra.mrb[22].mxu1 %vm3138_vm12, %v3220_v14 }
 0x328   :  { %12373 = vmatpush3.bf16.msra.mxu1 %v13481_v61  ;;  %6267 = vrot.lane.b32.xlu0 %v13596_v35, %s12917_s20 }
 0x329   :  { %12374 = vmatprep.subr.bf16.mxu1 %v12920_v58  ;;  %11997 = vmatprep.mubr.msk.f32.mxu1 %vm12919_vm3, %v12909_v3 }
 0x32a   :  { %v3301_v15 = vpop.permute.xlu1 %3300  ;;  %v13783_v16 = vpop.permute.xlu0 %4278 }
 0x32c   :  { %12376 = vmatpush3.bf16.msra.mxu1 %v13492_v0  ;;  %6271 = vrot.lane.b32.xlu0 %v13666_v57, %s12917_s20  ;;  %v3670_v57 = vsel %vm98_vm0, %v13728_v1, %v13757_v9  ;;  %s12929_s20 = smov 72  }
 0x32d   :  { %12377 = vmatprep.subr.bf16.mxu1 %v12920_v58 }
 0x32e   :  { %v13789_v17 = vpop.permute.xlu1 %4607  ;;  %v13791_v18 = vpop.permute.xlu0 %4280 }
 0x330   :  { %12379 = vmatpush3.bf16.msra.mxu1 %v13505_v4 }
 0x331   :  { %12380 = vmatprep.subr.bf16.mxu1 %v12920_v58 }
 0x332   :  { %v13795_v19 = vpop.permute.xlu1 %4609  ;;  %v13797_v20 = vpop.permute.xlu0 %4284 }
 0x334   :  { %12382 = vmatpush3.bf16.msra.mxu1 %v13517_v8 }
 0x335   :  { %11995 = vmatprep.subr.mxu1 %v12909_v3 }
 0x336   :  { %v3557_v21 = vpop.permute.xlu1 %3556  ;;  %v13801_v22 = vpop.permute.xlu0 %4605 }
 0x337   :  { %v4620_v6 = vsel %vm1056_vm5, %v13801_v22, %v13789_v17 }
 0x338   :  { %11996 = vmatpush3.msk.msra.mxu1 %vm3142_vm11, %v13525_v11 }
 0x339   :  { %11998 = vmatmul.mubr.msk.f32.vlgmr.msra.gmra.mrb[24].mxu1 %vm3138_vm12, %v3301_v15  ;;  %12383 = vmatprep.subr.bf16.mxu1 %v12920_v58  ;;  %v11296_v15 = vld [vmem:[%s15357_s2 + $0x18] sm:$0x3f] }
 0x33a   :  { %12385 = vmatpush3.bf16.msra.mxu1 %v13481_v61  ;;  %v3385_v23 = vpop.permute.xlu1 %3384  ;;  %v13808_v24 = vpop.permute.xlu0 %4603  ;;  %12018 = vmatprep.mubr.msk.f32.mxu1 %vm12919_vm3, %v12909_v3 }
 0x33b   :  { %12386 = vmatprep.subr.bf16.mxu1 %v12920_v58 }
 0x33e   :  { %12388 = vmatpush3.bf16.msra.mxu1 %v13492_v0  ;;  %v13814_v25 = vpop.permute.xlu1 %4613  ;;  %v13816_v27 = vpop.permute.xlu0 %4611 }
 0x33f   :  { %12389 = vmatprep.subr.bf16.mxu1 %v12920_v58 }
 0x342   :  { %12391 = vmatpush3.bf16.msra.mxu1 %v13505_v4  ;;  %v13820_v28 = vpop.permute.xlu1 %4617  ;;  %v3383_v30 = vpop.permute.xlu0 %3382 }
 0x343   :  { %12392 = vmatprep.subr.bf16.mxu1 %v12920_v58  ;;  %v3387_v39 = vsel %vm3386_vm13, %v3383_v30, %v3385_v23 }
 0x346   :  { %12394 = vmatpush3.bf16.msra.mxu1 %v13517_v8  ;;  %v13824_v37 = vpop.permute.xlu1 %4938  ;;  %v13826_v38 = vpop.permute.xlu0 %4615 }
 0x347   :  { %12016 = vmatprep.subr.mxu1 %v12909_v3  ;;  %v4625_v30 = vsel %vm1056_vm5, %v13826_v38, %v13820_v28 }
 0x34a   :  { %12017 = vmatpush3.msk.msra.mxu1 %vm3142_vm11, %v13525_v11  ;;  %v3472_v40 = vpop.permute.xlu1 %3471  ;;  %v13832_v41 = vpop.permute.xlu0 %4936 }
 0x34b   :  { %12019 = vmatmul.mubr.msk.f32.vlgmr.msra.gmra.mrb[26].mxu1 %vm3138_vm12, %v3387_v39  ;;  %12407 = vmatprep.subr.bf16.mxu1 %v12920_v58 }
 0x34c   :  { %12409 = vmatpush3.bf16.msra.mxu1 %v13481_v61  ;;  %12060 = vmatprep.mubr.msk.f32.mxu1 %vm12919_vm3, %v12909_v3 }
 0x34d   :  { %12410 = vmatprep.subr.bf16.mxu1 %v12920_v58 }
 0x34e   :  { %v13840_v42 = vpop.permute.xlu0 %4934  ;;  %v13842_v43 = vpop.permute.xlu1 %4940 }
 0x350   :  { %12412 = vmatpush3.bf16.msra.mxu1 %v13492_v0 }
 0x351   :  { %12413 = vmatprep.subr.bf16.mxu1 %v12920_v58 }
 0x352   :  { %v3470_v44 = vpop.permute.xlu0 %3469  ;;  %v13846_v45 = vpop.permute.xlu1 %4944 }
 0x353   :  { %v3474_v46 = vsel %vm3473_vm14, %v3470_v44, %v3472_v40 }
 0x354   :  { %12415 = vmatpush3.bf16.msra.mxu1 %v13505_v4  ;;  %12040 = vmatmul.mubr.msk.f32.vlgmr.msra.gmra.mrb[4].mxu0 %vm3138_vm12, %v3474_v46 }
 0x355   :  { %11263 = vmatpush1.msk.msra.mxu0 %vm109_vm1, %v3667_v47  ;;  %12416 = vmatprep.subr.bf16.mxu1 %v12920_v58 }
 0x356   :  { %11268 = vmatprep.subr.msk.mxu0 %vm109_vm1, %v3672_v48  ;;  %v13863_v52 = vpop.permute.xlu0 %4942  ;;  %3754 = vmatprep.mubr.f32.mxu0 %v12909_v3  ;;  %v13866_v51 = vpop.permute.xlu1 %4948 }
 0x357   :  { %v4954_v39 = vsel %vm1389_vm6, %v13863_v52, %v13846_v45  ;;  %v4953_v40 = vsel %vm1389_vm6, %v13842_v43, %v13863_v52 }
 0x358   :  { %12418 = vmatpush3.bf16.msra.mxu1 %v13517_v8  ;;  %11264 = vmatmul.mubr.msk.f32.vlgmr.msra.gmra.mrb[6].mxu0 %vm105_vm2, %v11261_v49 }
 0x359   :  { %11269 = vmatpush1.msk.msra.mxu0 %vm109_vm1, %v3671_v53  ;;  %12058 = vmatprep.subr.mxu1 %v12909_v3 }
 0x35a   :  { %v3555_v54 = vpop.permute.xlu0 %3554  ;;  %3896 = vmatprep.mubr.f32.mxu0 %v12909_v3  ;;  %11273 = vmatprep.subr.msk.mxu0 %vm109_vm1, %v13567_v29  ;;  %v13878_v55 = vpop.permute.xlu1 %5269 }
 0x35b   :  { %v3559_v56 = vsel %vm3558_vm15, %v3555_v54, %v3557_v21  ;;  %v4951_v21 = vsel %vm1389_vm6, %v13832_v41, %v13824_v37 }
 0x35c   :  { %12059 = vmatpush3.msk.msra.mxu1 %vm3142_vm11, %v13525_v11  ;;  %11270 = vmatmul.mubr.msk.f32.vlgmr.msra.gmra.mrb[8].mxu0 %vm105_vm2, %v11261_v49 }
 0x35d   :  { %12061 = vmatmul.mubr.msk.f32.vlgmr.msra.gmra.mrb[28].mxu1 %vm3138_vm12, %v3559_v56  ;;  %11265 = vmatprep.subr.msk.mxu1 %vm109_vm1, %v3670_v57 }
 0x35e   :  { %11266 = vmatpush1.msk.msra.mxu1 %vm109_vm1, %v3669_v59  ;;  %11274 = vmatpush1.msk.msra.mxu0 %vm109_vm1, %v13554_v26  ;;  %v13895_v29 = vpop.permute.xlu0 %4946  ;;  %v13900_v62 = vpop.permute.xlu1 %5271  ;;  %v4289_v26 = vsel %vm723_vm4, %v13744_v5, %v13783_v16 }
 0x35f   :  { %3825 = vmatprep.mubr.f32.mxu1 %v12909_v3  ;;  %12063 = vmatprep.subr.mxu1 %v12909_v3  ;;  %v4956_v47 = vsel %vm1389_vm6, %v13895_v29, %v13866_v51  ;;  %v5283_v54 = vsel %vm1722_vm7, %v13878_v55, %v13900_v62 }
 0x360   :  { %4054 = vmatprep.mubr.f32.mxu0 %v12909_v3  ;;  %11279 = vmatprep.subr.msk.mxu0 %vm109_vm1, %v13596_v35  ;;  %v4293_v35 = vsel %vm723_vm4, %v13797_v20, %v13773_v13 }
 0x361   :  { %11267 = vmatmul.mubr.msk.f32.vlgmr.msra.gmra.mrb[30].mxu1 %vm105_vm2, %v11261_v49  ;;  %11275 = vmatmul.mubr.msk.f32.vlgmr.msra.gmra.mrb[6].mxu0 %vm105_vm2, %v3644_v60 }
 0x362   :  { %12064 = vmatpush3.msk.msra.mxu1 %vm109_vm1, %v13767_v12  ;;  %11280 = vmatpush1.msk.msra.mxu0 %vm109_vm1, %v13590_v33  ;;  %v13916_v50 = vpop.permute.xlu0 %5267  ;;  %v13918_v63 = vpop.permute.xlu1 %5275  ;;  %v4288_v33 = vsel %vm723_vm4, %v13753_v7, %v13744_v5  ;;  %v4291_v5 = vsel %vm723_vm4, %v13791_v18, %v13763_v10  ;;  %v4624_v12 = vsel %vm1056_vm5, %v13814_v25, %v13826_v38 }
 0x363   :  { %11285 = vmatprep.subr.msk.mxu0 %vm109_vm1, %v4289_v26  ;;  %12065 = vmatprep.mubr.msk.f32.mxu1 %vm12919_vm3, %v12909_v3  ;;  %v5282_v28 = vsel %vm1722_vm7, %v13916_v50, %v13878_v55  ;;  %v11332_v55 = vld [vmem:[%s15357_s2 + $0x30] sm:$0x3f] }
 0x364   :  { %4196 = vmatprep.mubr.f32.mxu0 %v12909_v3  ;;  %11276 = vmatprep.subr.msk.mxu1 %vm109_vm1, %v13583_v32  ;;  %v11284_v32 = vld [vmem:[%s15357_s2 + $0x10] sm:$0x3f] }
 0x365   :  { %12066 = vmatmul.mubr.msk.f32.vlgmr.msra.gmra.mrb[32].mxu1 %vm105_vm2, %v11261_v49  ;;  %11281 = vmatmul.mubr.msk.f32.vlgmr.msra.gmra.mrb[8].mxu0 %vm105_vm2, %v3644_v60 }
 0x366   :  { %11286 = vmatpush1.msk.msra.mxu0 %vm109_vm1, %v4288_v33  ;;  %11277 = vmatpush1.msk.msra.mxu1 %vm109_vm1, %v13577_v31  ;;  %v13937_v1 = vpop.permute.xlu0 %5265  ;;  %v13942_v2 = vpop.permute.xlu1 %5279  ;;  %v4292_v31 = vsel %vm723_vm4, %v13763_v10, %v13797_v20  ;;  %v4619_v10 = vsel %vm1056_vm5, %v13808_v24, %v13801_v22  ;;  %v4622_v20 = vsel %vm1056_vm5, %v13795_v19, %v13816_v27 }
 0x367   :  { %11291 = vmatprep.subr.msk.mxu0 %vm109_vm1, %v4293_v35  ;;  %4125 = vmatprep.mubr.f32.mxu1 %v12909_v3  ;;  %v4950_v24 = vsel %vm1389_vm6, %v13840_v42, %v13832_v41  ;;  %v4952_v42 = vsel %vm1389_vm6, %v13824_v37, %v13842_v43  ;;  %v5281_v44 = vsel %vm1722_vm7, %v13937_v1, %v13916_v50  ;;  %v11320_v37 = vld [vmem:[%s15357_s2 + $0x28] sm:$0x3f] }
 0x368   :  { %12068 = vmatprep.subr.mxu1 %v12909_v3  ;;  %4375 = vmatprep.mubr.f32.mxu0 %v12909_v3 }
 0x369   :  { %11278 = vmatmul.mubr.msk.f32.vlgmr.msra.gmra.mrb[30].mxu1 %vm105_vm2, %v3644_v60  ;;  %11287 = vmatmul.mubr.msk.f32.vlgmr.msra.gmra.mrb[6].mxu0 %vm105_vm2, %v11284_v32 }
 0x36a   :  { %12069 = vmatpush3.msk.msra.mxu1 %vm109_vm1, %v13603_v36  ;;  %11292 = vmatpush1.msk.msra.mxu0 %vm109_vm1, %v4292_v31  ;;  %v13962_v7 = vpop.permute.xlu0 %5273  ;;  %v13964_v9 = vpop.permute.xlu1 %5601  ;;  %v4290_v36 = vsel %vm723_vm4, %v13783_v16, %v13791_v18  ;;  %v4623_v18 = vsel %vm1056_vm5, %v13816_v27, %v13814_v25  ;;  %v4955_v25 = vsel %vm1389_vm6, %v13846_v45, %v13895_v29  ;;  %vm3216_vm6 = vcmask 291840  }
 0x36b   :  { %11288 = vmatprep.subr.msk.mxu1 %vm109_vm1, %v4291_v5  ;;  %11297 = vmatprep.subr.msk.mxu0 %vm109_vm1, %v4620_v6  ;;  %v5285_v48 = vsel %vm1722_vm7, %v13962_v7, %v13918_v63  ;;  %v5284_v49 = vsel %vm1722_vm7, %v13900_v62, %v13962_v7 }
 0x36c   :  { %12070 = vmatprep.mubr.msk.f32.mxu1 %vm12919_vm3, %v12909_v3  ;;  %4517 = vmatprep.mubr.f32.mxu0 %v12909_v3 }
 0x36d   :  { %12071 = vmatmul.mubr.msk.f32.vlgmr.msra.gmra.mrb[34].mxu1 %vm105_vm2, %v3644_v60  ;;  %11293 = vmatmul.mubr.msk.f32.vlgmr.msra.gmra.mrb[8].mxu0 %vm105_vm2, %v11284_v32 }
 0x36e   :  { %11289 = vmatpush1.msk.msra.mxu1 %vm109_vm1, %v4290_v36  ;;  %11298 = vmatpush1.msk.msra.mxu0 %vm109_vm1, %v4619_v10  ;;  %v13984_v14 = vpop.permute.xlu0 %5277  ;;  %v13989_v16 = vpop.permute.xlu1 %5603 }
 0x36f   :  { %11303 = vmatprep.subr.msk.mxu0 %vm109_vm1, %v4624_v12  ;;  %4446 = vmatprep.mubr.f32.mxu1 %v12909_v3  ;;  %v5286_v45 = vsel %vm1722_vm7, %v13918_v63, %v13984_v14  ;;  %v5287_v60 = vsel %vm1722_vm7, %v13984_v14, %v13942_v2  ;;  %v5615_v35 = vsel %vm2056_vm8, %v13964_v9, %v13989_v16  ;;  %v11344_v2 = vld [vmem:[%s15357_s2 + $0x38] sm:$0x3f]  ;;  %vm3636_vm7 = vcmask 718240  }
 0x370   :  { %12073 = vmatprep.subr.mxu1 %v12909_v3  ;;  %4707 = vmatprep.mubr.f32.mxu0 %v12909_v3 }
 0x371   :  { %11290 = vmatmul.mubr.msk.f32.vlgmr.msra.gmra.mrb[30].mxu1 %vm105_vm2, %v11284_v32  ;;  %11299 = vmatmul.mubr.msk.f32.vlgmr.msra.gmra.mrb[6].mxu0 %vm105_vm2, %v11296_v15 }
 0x372   :  { %12074 = vmatpush3.msk.msra.mxu1 %vm109_vm1, %v13773_v13  ;;  %11304 = vmatpush1.msk.msra.mxu0 %vm109_vm1, %v4623_v18  ;;  %v14009_v22 = vpop.permute.xlu0 %5599  ;;  %v14011_v23 = vpop.permute.xlu1 %5607  ;;  %v4621_v13 = vsel %vm1056_vm5, %v13789_v17, %v13795_v19  ;;  %v11308_v17 = vld [vmem:[%s15357_s2 + $0x20] sm:$0x3f] }
 0x373   :  { %11300 = vmatprep.subr.msk.mxu1 %vm109_vm1, %v4622_v20  ;;  %11309 = vmatprep.subr.msk.mxu0 %vm109_vm1, %v4951_v21  ;;  %v5614_v52 = vsel %vm2056_vm8, %v14009_v22, %v13964_v9  ;;  %v11356_v18 = vld [vmem:[%s15357_s2 + $0x40] sm:$0x3f]  ;;  %s12925_s2 = smov 16  }
 0x374   :  { %12075 = vmatprep.mubr.msk.f32.mxu1 %vm12919_vm3, %v12909_v3  ;;  %4849 = vmatprep.mubr.f32.mxu0 %v12909_v3 }
 0x375   :  { %12076 = vmatmul.mubr.msk.f32.vlgmr.msra.gmra.mrb[36].mxu1 %vm105_vm2, %v11284_v32  ;;  %11305 = vmatmul.mubr.msk.f32.vlgmr.msra.gmra.mrb[8].mxu0 %vm105_vm2, %v11296_v15 }
 0x376   :  { %11301 = vmatpush1.msk.msra.mxu1 %vm109_vm1, %v4621_v13  ;;  %11310 = vmatpush1.msk.msra.mxu0 %vm109_vm1, %v4950_v24  ;;  %v5598_v27 = vpop.permute.xlu0 %5597  ;;  %v14034_v19 = vpop.permute.xlu1 %5611 }
 0x377   :  { %11315 = vmatprep.subr.msk.mxu0 %vm109_vm1, %v4955_v25  ;;  %4778 = vmatprep.mubr.f32.mxu1 %v12909_v3  ;;  %v5613_v56 = vsel %vm2056_vm8, %v5598_v27, %v14009_v22 }
 0x378   :  { %12078 = vmatprep.subr.mxu1 %v12909_v3  ;;  %5038 = vmatprep.mubr.f32.mxu0 %v12909_v3 }
 0x379   :  { %11302 = vmatmul.mubr.msk.f32.vlgmr.msra.gmra.mrb[30].mxu1 %vm105_vm2, %v11296_v15  ;;  %11311 = vmatmul.mubr.msk.f32.vlgmr.msra.gmra.mrb[6].mxu0 %vm105_vm2, %v11308_v17 }
 0x37a   :  { %12079 = vmatpush3.msk.msra.mxu1 %vm109_vm1, %v4625_v30  ;;  %11316 = vmatpush1.msk.msra.mxu0 %vm109_vm1, %v4954_v39  ;;  %v5606_v38 = vpop.permute.xlu0 %5605  ;;  %v14056_v41 = vpop.permute.xlu1 %5932 }
 0x37b   :  { %11312 = vmatprep.subr.msk.mxu1 %vm109_vm1, %v4953_v40  ;;  %11321 = vmatprep.subr.msk.mxu0 %vm109_vm1, %v5282_v28  ;;  %v5617_v62 = vsel %vm2056_vm8, %v5606_v38, %v14011_v23  ;;  %v5616_v26 = vsel %vm2056_vm8, %v13989_v16, %v5606_v38 }
 0x37c   :  { %12080 = vmatprep.mubr.msk.f32.mxu1 %vm12919_vm3, %v12909_v3  ;;  %5180 = vmatprep.mubr.f32.mxu0 %v12909_v3 }
 0x37d   :  { %12081 = vmatmul.mubr.msk.f32.vlgmr.msra.gmra.mrb[38].mxu1 %vm105_vm2, %v11296_v15  ;;  %11317 = vmatmul.mubr.msk.f32.vlgmr.msra.gmra.mrb[8].mxu0 %vm105_vm2, %v11308_v17 }
 0x37e   :  { %11313 = vmatpush1.msk.msra.mxu1 %vm109_vm1, %v4952_v42  ;;  %11322 = vmatpush1.msk.msra.mxu0 %vm109_vm1, %v5281_v44  ;;  %v14076_v46 = vpop.permute.xlu0 %5609  ;;  %v14081_v43 = vpop.permute.xlu1 %5934 }
 0x37f   :  { %11327 = vmatprep.subr.msk.mxu0 %vm109_vm1, %v5286_v45  ;;  %5109 = vmatprep.mubr.f32.mxu1 %v12909_v3  ;;  %v5618_v57 = vsel %vm2056_vm8, %v14011_v23, %v14076_v46  ;;  %v5619_v7 = vsel %vm2056_vm8, %v14076_v46, %v14034_v19  ;;  %v5946_v15 = vsel %vm2389_vm9, %v14056_v41, %v14081_v43  ;;  %vm3297_vm8 = vcmask 587040  }
 0x380   :  { %12083 = vmatprep.subr.mxu1 %v12909_v3  ;;  %5369 = vmatprep.mubr.f32.mxu0 %v12909_v3 }
 0x381   :  { %11314 = vmatmul.mubr.msk.f32.vlgmr.msra.gmra.mrb[30].mxu1 %vm105_vm2, %v11308_v17  ;;  %11323 = vmatmul.mubr.msk.f32.vlgmr.msra.gmra.mrb[6].mxu0 %vm105_vm2, %v11320_v37 }
 0x382   :  { %12084 = vmatpush3.msk.msra.mxu1 %vm109_vm1, %v4956_v47  ;;  %11328 = vmatpush1.msk.msra.mxu0 %vm109_vm1, %v5285_v48  ;;  %v5931_v51 = vpop.permute.xlu0 %5930  ;;  %v5939_v53 = vpop.permute.xlu1 %5938 }
 0x383   :  { %11324 = vmatprep.subr.msk.mxu1 %vm109_vm1, %v5284_v49  ;;  %11333 = vmatprep.subr.msk.mxu0 %vm109_vm1, %v5614_v52  ;;  %v5945_v50 = vsel %vm2389_vm9, %v5931_v51, %v14056_v41 }
 0x384   :  { %12085 = vmatprep.mubr.msk.f32.mxu1 %vm12919_vm3, %v12909_v3  ;;  %5511 = vmatprep.mubr.f32.mxu0 %v12909_v3 }
 0x385   :  { %12086 = vmatmul.mubr.msk.f32.vlgmr.msra.gmra.mrb[40].mxu1 %vm105_vm2, %v11308_v17  ;;  %11329 = vmatmul.mubr.msk.f32.vlgmr.msra.gmra.mrb[8].mxu0 %vm105_vm2, %v11320_v37 }
 0x386   :  { %11325 = vmatpush1.msk.msra.mxu1 %vm109_vm1, %v5283_v54  ;;  %11334 = vmatpush1.msk.msra.mxu0 %vm109_vm1, %v5613_v56  ;;  %v5929_v59 = vpop.permute.xlu0 %5928  ;;  %v14123_v29 = vpop.permute.xlu1 %5942 }
 0x387   :  { %11339 = vmatprep.subr.msk.mxu0 %vm109_vm1, %v5618_v57  ;;  %5440 = vmatprep.mubr.f32.mxu1 %v12909_v3  ;;  %v5944_v1 = vsel %vm2389_vm9, %v5929_v59, %v5931_v51 }
 0x388   :  { %12088 = vmatprep.subr.mxu1 %v12909_v3  ;;  %5701 = vmatprep.mubr.f32.mxu0 %v12909_v3 }
 0x389   :  { %11326 = vmatmul.mubr.msk.f32.vlgmr.msra.gmra.mrb[30].mxu1 %vm105_vm2, %v11320_v37  ;;  %11335 = vmatmul.mubr.msk.f32.vlgmr.msra.gmra.mrb[6].mxu0 %vm105_vm2, %v11332_v55 }
 0x38a   :  { %12089 = vmatpush3.msk.msra.mxu1 %vm109_vm1, %v5287_v60  ;;  %11340 = vmatpush1.msk.msra.mxu0 %vm109_vm1, %v5617_v62  ;;  %v5937_v63 = vpop.permute.xlu0 %5936  ;;  %v6264_v33 = vpop.permute.xlu1 %6263 }
 0x38b   :  { %11336 = vmatprep.subr.msk.mxu1 %vm109_vm1, %v5616_v26  ;;  %11345 = vmatprep.subr.msk.mxu0 %vm109_vm1, %v5945_v50  ;;  %v5948_v9 = vsel %vm2389_vm9, %v5937_v63, %v5939_v53  ;;  %v5947_v10 = vsel %vm2389_vm9, %v14081_v43, %v5937_v63 }
 0x38c   :  { %12090 = vmatprep.mubr.msk.f32.mxu1 %vm12919_vm3, %v12909_v3  ;;  %5843 = vmatprep.mubr.f32.mxu0 %v12909_v3 }
 0x38d   :  { %12091 = vmatmul.mubr.msk.f32.vlgmr.msra.gmra.mrb[42].mxu1 %vm105_vm2, %v11320_v37  ;;  %11341 = vmatmul.mubr.msk.f32.vlgmr.msra.gmra.mrb[8].mxu0 %vm105_vm2, %v11332_v55 }
 0x38e   :  { %11337 = vmatpush1.msk.msra.mxu1 %vm109_vm1, %v5615_v35  ;;  %11346 = vmatpush1.msk.msra.mxu0 %vm109_vm1, %v5944_v1  ;;  %v5941_v32 = vpop.permute.xlu0 %5940  ;;  %v6266_v6 = vpop.permute.xlu1 %6265 }
 0x38f   :  { %v5949_v31 = vsel %vm2389_vm9, %v5939_v53, %v5941_v32  ;;  %5772 = vmatprep.mubr.f32.mxu1 %v12909_v3  ;;  %12093 = vmatprep.subr.mxu1 %v12909_v3  ;;  %v5950_v22 = vsel %vm2389_vm9, %v5941_v32, %v14123_v29  ;;  %v6277_v25 = vsel %vm2722_vm10, %v6264_v33, %v6266_v6  ;;  %vm6762_vm9 = vcmask 1013440  }
 0x390   :  { %v3212_v5 = vpop.f32.mrb[20].mxu1  ;;  %6032 = vmatprep.mubr.f32.mxu0 %v12909_v3  ;;  %11351 = vmatprep.subr.msk.mxu0 %vm109_vm1, %v5949_v31 }
 0x391   :  { %3217 = vst.msk [vmem:[#allocation2] sm:$0x3f] %vm3216_vm6, %v3212_v5  ;;  %v11957_v36 = vpop.f32.mrb[21].mxu1  ;;  %11338 = vmatmul.mubr.msk.f32.vlgmr.msra.gmra.mrb[30].mxu1 %vm105_vm2, %v11332_v55  ;;  %11347 = vmatmul.mubr.msk.f32.vlgmr.msra.gmra.mrb[6].mxu0 %vm105_vm2, %v11344_v2  ;;  %vm7011_vm6 = vcmask 849440  }
 0x392   :  { %12094 = vmatpush3.msk.msra.mxu1 %vm109_vm1, %v5619_v7  ;;  %11352 = vmatpush1.msk.msra.mxu0 %vm109_vm1, %v5948_v9  ;;  %v6262_v12 = vpop.permute.xlu0 %6261  ;;  %v6270_v20 = vpop.permute.xlu1 %6269 }
 0x393   :  { %11348 = vmatprep.subr.msk.mxu1 %vm109_vm1, %v5947_v10  ;;  %12095 = vmatprep.mubr.msk.f32.mxu1 %vm12919_vm3, %v12909_v3  ;;  %v6276_v14 = vsel %vm2722_vm10, %v6262_v12, %v6264_v33 }
 0x394   :  { %6174 = vmatprep.mubr.f32.mxu0 %v12909_v3  ;;  %11357 = vmatprep.subr.msk.mxu0 %vm109_vm1, %v6276_v14 }
 0x395   :  { %12096 = vmatmul.mubr.msk.f32.vlgmr.msra.gmra.mrb[44].mxu1 %vm105_vm2, %v11332_v55  ;;  %11353 = vmatmul.mubr.msk.f32.vlgmr.msra.gmra.mrb[8].mxu0 %vm105_vm2, %v11344_v2 }
 0x396   :  { %11349 = vmatpush1.msk.msra.mxu1 %vm109_vm1, %v5946_v15  ;;  %v6260_v16 = vpop.permute.xlu0 %6259  ;;  %6103 = vmatprep.mubr.f32.mxu1 %v12909_v3  ;;  %v6274_v24 = vpop.permute.xlu1 %6273 }
 0x397   :  { %v6275_v21 = vsel %vm2722_vm10, %v6260_v16, %v6262_v12  ;;  %12098 = vmatprep.subr.mxu1 %v12909_v3  ;;  %6363 = vmatprep.mubr.f32.mxu0 %v12909_v3 }
 0x398   :  { %11358 = vmatpush1.msk.msra.mxu0 %vm109_vm1, %v6275_v21 }
 0x399   :  { %11350 = vmatmul.mubr.msk.f32.vlgmr.msra.gmra.mrb[30].mxu1 %vm105_vm2, %v11344_v2  ;;  %11359 = vmatmul.mubr.msk.f32.vlgmr.msra.gmra.mrb[6].mxu0 %vm105_vm2, %v11356_v18 }
 0x39a   :  { %12099 = vmatpush3.msk.msra.mxu1 %vm109_vm1, %v5950_v22  ;;  %v6268_v23 = vpop.permute.xlu0 %6267  ;;  %12100 = vmatprep.mubr.msk.f32.mxu1 %vm12919_vm3, %v12909_v3 }
 0x39b   :  { %v6278_v13 = vsel %vm2722_vm10, %v6266_v6, %v6268_v23  ;;  %6505 = vmatprep.mubr.f32.mxu0 %v12909_v3  ;;  %v6279_v30 = vsel %vm2722_vm10, %v6268_v23, %v6270_v20 }
 0x39c   :  { %11360 = vmatprep.subr.msk.mxu1 %vm109_vm1, %v6278_v13 }
 0x39d   :  { %12101 = vmatmul.mubr.msk.f32.vlgmr.msra.gmra.mrb[46].mxu1 %vm105_vm2, %v11344_v2 }
 0x39e   :  { %11361 = vmatpush1.msk.msra.mxu1 %vm109_vm1, %v6277_v25  ;;  %v6272_v27 = vpop.permute.xlu0 %6271  ;;  %6434 = vmatprep.mubr.f32.mxu1 %v12909_v3 }
 0x39f   :  { %v6280_v17 = vsel %vm2722_vm10, %v6270_v20, %v6272_v27  ;;  %v6281_v19 = vsel %vm2722_vm10, %v6272_v27, %v6274_v24  ;;  %12103 = vmatprep.subr.mxu1 %v12909_v3  ;;  %vm6843_vm10 = vcmask 1046496  }
 0x3a0   :  { %11363 = vmatprep.subr.msk.mxu0 %vm109_vm1, %v6280_v17 }
 0x3a1   :  { %11362 = vmatmul.mubr.msk.f32.vlgmr.msra.gmra.mrb[30].mxu1 %vm105_vm2, %v11356_v18  ;;  %11364 = vmatpush1.msk.msra.mxu0 %vm109_vm1, %v6279_v30 }
 0x3a2   :  { %11365 = vmatmul.mubr.msk.f32.vlgmr.msra.gmra.mrb[8].mxu0 %vm105_vm2, %v11356_v18  ;;  %12104 = vmatpush3.msk.msra.mxu1 %vm109_vm1, %v6281_v19  ;;  %vm3466_vm1 = vcmask 128000  }
 0x3a3   :  { %12105 = vmatprep.mubr.msk.f32.mxu1 %vm12919_vm3, %v12909_v3  ;;  %12419 = vmatprep.subr.bf16.mxu0 %v12920_v58 }
 0x3a4   :  { %12421 = vmatpush3.bf16.msra.mxu0 %v13481_v61  ;;  %12126 = vmatprep.mubr.msk.f32.mxu0 %vm12919_vm3, %v12909_v3 }
 0x3a5   :  { %12106 = vmatmul.mubr.msk.f32.vlgmr.msra.gmra.mrb[48].mxu1 %vm105_vm2, %v11356_v18  ;;  %12422 = vmatprep.subr.bf16.mxu0 %v12920_v58  ;;  %vm3551_vm2 = vcmask 423040  }
 0x3a6   :  { %12431 = vmatprep.subr.bf16.mxu1 %v12920_v58  ;;  %12147 = vmatprep.mubr.msk.f32.mxu1 %vm12919_vm3, %v12909_v3 }
 0x3a7   :  { %12433 = vmatpush3.bf16.msra.mxu1 %v13481_v61 }
 0x3a8   :  { %12424 = vmatpush3.bf16.msra.mxu0 %v13492_v0  ;;  %12434 = vmatprep.subr.bf16.mxu1 %v12920_v58 }
 0x3a9   :  { %12425 = vmatprep.subr.bf16.mxu0 %v12920_v58 }
 0x3ab   :  { %12436 = vmatpush3.bf16.msra.mxu1 %v13492_v0 }
 0x3ac   :  { %12427 = vmatpush3.bf16.msra.mxu0 %v13505_v4  ;;  %12437 = vmatprep.subr.bf16.mxu1 %v12920_v58 }
 0x3ad   :  { %12428 = vmatprep.subr.bf16.mxu0 %v12920_v58 }
 0x3af   :  { %12439 = vmatpush3.bf16.msra.mxu1 %v13505_v4 }
 0x3b0   :  { %12430 = vmatpush3.bf16.msra.mxu0 %v13517_v8  ;;  %12440 = vmatprep.subr.bf16.mxu1 %v12920_v58 }
 0x3b1   :  { %12124 = vmatprep.subr.mxu0 %v12909_v3 }
 0x3b3   :  { %12442 = vmatpush3.bf16.msra.mxu1 %v13517_v8 }
 0x3b4   :  { %12125 = vmatpush3.msk.msra.mxu0 %vm3142_vm11, %v13525_v11  ;;  %12145 = vmatprep.subr.mxu1 %v12909_v3 }
 0x3b5   :  { %12443 = vmatprep.subr.bf16.mxu0 %v12920_v58 }
 0x3b7   :  { %12146 = vmatpush3.msk.msra.mxu1 %vm3142_vm11, %v13525_v11 }
 0x3b8   :  { %12455 = vmatprep.subr.bf16.mxu1 %v12920_v58 }
 0x3fa   :  { %v14247_v39 = vpop.f32.mrb[22].mxu1 }
 0x3fb   :  { %v11978_v40 = vpop.f32.mrb[23].mxu1 }
 0x40c   :  { %v14249_v28 = vpop.f32.mrb[24].mxu1 }
 0x40d   :  { %v11999_v38 = vpop.f32.mrb[25].mxu1 }
 0x41e   :  { %v14251_v41 = vpop.f32.mrb[26].mxu1 }
 0x41f   :  { %v12020_v42 = vpop.f32.mrb[27].mxu1 }
 0x427   :  { %v14253_v44 = vpop.f32.mrb[4].mxu0 }
 0x428   :  { %v12041_v45 = vpop.f32.mrb[5].mxu0 }
 0x430   :  { %v14255_v46 = vpop.f32.mrb[28].mxu1 }
 0x431   :  { %v12062_v37 = vpop.f32.mrb[29].mxu1 }
 0x438   :  { %v3969_v43 = vpop.f32.mrb[32].mxu1 }
 0x439   :  { %v12067_v47 = vpop.f32.mrb[33].mxu1 }
 0x440   :  { %v4269_v11 = vpop.f32.mrb[34].mxu1 }
 0x441   :  { %v4270_v48 = vadd.f32 %v4269_v11, %v3969_v43  ;;  %v12072_v49 = vpop.f32.mrb[35].mxu1 }
 0x448   :  { %v4590_v52 = vpop.f32.mrb[36].mxu1 }
 0x449   :  { %v4600_v51 = vadd.f32 %v4590_v52, %v4270_v48  ;;  %v12077_v53 = vpop.f32.mrb[37].mxu1 }
 0x450   :  { %v4922_v54 = vpop.f32.mrb[38].mxu1 }
 0x451   :  { %v4932_v56 = vadd.f32 %v4922_v54, %v4600_v51  ;;  %v12082_v57 = vpop.f32.mrb[39].mxu1 }
 0x458   :  { %v5253_v59 = vpop.f32.mrb[40].mxu1 }
 0x459   :  { %v5263_v55 = vadd.f32 %v5253_v59, %v4932_v56  ;;  %v12087_v29 = vpop.f32.mrb[41].mxu1 }
 0x460   :  { %v5584_v60 = vpop.f32.mrb[42].mxu1 }
 0x461   :  { %v5594_v62 = vadd.f32 %v5584_v60, %v5263_v55  ;;  %v12092_v26 = vpop.f32.mrb[43].mxu1 }
 0x468   :  { %v5916_v50 = vpop.f32.mrb[44].mxu1 }
 0x469   :  { %v5926_v63 = vadd.f32 %v5916_v50, %v5594_v62  ;;  %v12097_v33 = vpop.f32.mrb[45].mxu1 }
 0x46c   :  { %v6365_v35 = vpop.f32.mrb[6].mxu0 }
 0x46d   :  { %v6367_v1 = vpop.f32.mrb[7].mxu0  ;;  %v6589_v25 = vadd.f32 %v6365_v35, %v13428_v34 }
 0x46e   :  { %v6590_v32 = vadd.f32 %v6367_v1, %v13428_v34 }
 0x46f   :  { %v6596_v19 = vmax.f32 %v6589_v25, 0.0 }
 0x470   :  { %v6597_v2 = vmax.f32 %v6590_v32, 0.0  ;;  %v6247_v31 = vpop.f32.mrb[46].mxu1 }
 0x471   :  { %v6257_v5 = vadd.f32 %v6247_v31, %v5926_v63  ;;  %v12102_v6 = vpop.f32.mrb[47].mxu1 }
 0x472   :  { %6612 = vrot.lane.b32.xlu0 %v6597_v2, %s12910_s24 }
 0x474   :  { %v6436_v7 = vpop.f32.mrb[30].mxu1 }
 0x475   :  { %v6591_v9 = vadd.f32 %v6436_v7, %v13428_v34  ;;  %v6438_v36 = vpop.f32.mrb[31].mxu1  ;;  %v6507_v10 = vpop.f32.mrb[8].mxu0 }
 0x476   :  { %v6592_v12 = vadd.f32 %v6438_v36, %v13428_v34  ;;  %v6509_v14 = vpop.f32.mrb[9].mxu0  ;;  %v6593_v16 = vadd.f32 %v6507_v10, %v13428_v34 }
 0x477   :  { %v6598_v15 = vmax.f32 %v6591_v9, 0.0  ;;  %v6594_v20 = vadd.f32 %v6509_v14, %v13428_v34 }
 0x478   :  { %v6599_v18 = vmax.f32 %v6592_v12, 0.0  ;;  %v6578_v21 = vpop.f32.mrb[48].mxu1  ;;  %v6600_v13 = vmax.f32 %v6593_v16, 0.0 }
 0x479   :  { %v6588_v22 = vadd.f32 %v6578_v21, %v6257_v5  ;;  %6614 = vrot.lane.b32.xlu1 %v6598_v15, %s12910_s24  ;;  %v12107_v23 = vpop.f32.mrb[49].mxu1  ;;  %v6601_v27 = vmax.f32 %v6594_v20, 0.0 }
 0x47a   :  { %6616 = vrot.lane.b32.xlu0 %v6599_v18, %s12910_s24 }
 0x47b   :  { %v6595_v24 = vadd.f32 %v6588_v22, %v13428_v34 }
 0x47d   :  { %6618 = vrot.lane.b32.xlu1 %v6600_v13, %s12910_s24  ;;  %v6602_v17 = vmax.f32 %v6595_v24, 0.0 }
 0x47e   :  { %6620 = vrot.lane.b32.xlu0 %v6601_v27, %s12910_s24 }
 0x481   :  { %6622 = vrot.lane.b32.xlu1 %v6602_v17, %s12910_s24 }
 0x482   :  { %6610 = vrot.lane.b32.xlu0 %v6596_v19, %s12910_s24 }
 0x4e4   :  { %v6613_v30 = vpop.permute.xlu0 %6612 }
 0x4eb   :  { %v6615_v40 = vpop.permute.xlu1 %6614 }
 0x4ec   :  { %v6625_v38 = vsel %vm98_vm0, %v6613_v30, %v6615_v40  ;;  %v6617_v42 = vpop.permute.xlu0 %6616 }
 0x4ed   :  { %v6638_v45 = vmax.f32 %v6597_v2, %v6625_v38  ;;  %v6626_v37 = vsel %vm98_vm0, %v6615_v40, %v6617_v42 }
 0x4ee   :  { %v6639_v34 = vmax.f32 %v6598_v15, %v6626_v37 }
 0x4ef   :  { %v6619_v43 = vpop.permute.xlu1 %6618  ;;  %6653 = vrot.lane.b32.xlu1 %v6638_v45, %s12912_s28 }
 0x4f0   :  { %v6627_v47 = vsel %vm98_vm0, %v6617_v42, %v6619_v43  ;;  %6655 = vrot.lane.b32.xlu0 %v6639_v34, %s12912_s28  ;;  %v6621_v11 = vpop.permute.xlu0 %6620 }
 0x4f1   :  { %v6640_v48 = vmax.f32 %v6599_v18, %v6627_v47  ;;  %v6628_v49 = vsel %vm98_vm0, %v6619_v43, %v6621_v11 }
 0x4f2   :  { %v6641_v52 = vmax.f32 %v6600_v13, %v6628_v49 }
 0x4f3   :  { %v6623_v51 = vpop.permute.xlu1 %6622  ;;  %6657 = vrot.lane.b32.xlu1 %v6640_v48, %s12912_s28 }
 0x4f4   :  { %v6629_v53 = vsel %vm98_vm0, %v6621_v11, %v6623_v51  ;;  %6659 = vrot.lane.b32.xlu0 %v6641_v52, %s12912_s28  ;;  %v6611_v54 = vpop.permute.xlu0 %6610  ;;  %v6643_v57 = vmax.f32 %v6602_v17, %v6623_v51  ;;  %v14378_v51 = vld [vmem:[%s15360_s4] sm:$0xff] }
 0x4f5   :  { %v6642_v56 = vmax.f32 %v6601_v27, %v6629_v53  ;;  %v6624_v59 = vsel %vm98_vm0, %v6611_v54, %v6613_v30  ;;  %v14386_v54 = vld [vmem:[%s15360_s4 + $0x8] sm:$0xff] }
 0x4f6   :  { %v6637_v55 = vmax.f32 %v6596_v19, %v6624_v59 }
 0x4f7   :  { %6661 = vrot.lane.b32.xlu1 %v6642_v56, %s12912_s28 }
 0x4f8   :  { %6663 = vrot.lane.b32.xlu0 %v6643_v57, %s12912_s28 }
 0x4fb   :  { %6651 = vrot.lane.b32.xlu1 %v6637_v55, %s12912_s28 }
 0x561   :  { %v6654_v29 = vpop.permute.xlu1 %6653 }
 0x562   :  { %v6656_v60 = vpop.permute.xlu0 %6655 }
 0x563   :  { %v6666_v62 = vsel %vm1056_vm5, %v6654_v29, %v6656_v60 }
 0x564   :  { %v6679_v26 = vmax.f32 %v6638_v45, %v6666_v62 }
 0x565   :  { %v6658_v50 = vpop.permute.xlu1 %6657 }
 0x566   :  { %v6667_v63 = vsel %vm1056_vm5, %v6656_v60, %v6658_v50  ;;  %6765 = vrot.lane.b32.xlu0 %v6679_v26, %s12915_s16  ;;  %v6660_v33 = vpop.permute.xlu0 %6659 }
 0x567   :  { %v6680_v35 = vmax.f32 %v6639_v34, %v6667_v63  ;;  %v6668_v1 = vsel %vm1056_vm5, %v6658_v50, %v6660_v33 }
 0x568   :  { %v6681_v32 = vmax.f32 %v6640_v48, %v6668_v1 }
 0x569   :  { %v6662_v2 = vpop.permute.xlu1 %6661  ;;  %6848 = vrot.lane.b32.xlu1 %v6680_v35, %s12921_s17 }
 0x56a   :  { %v6669_v31 = vsel %vm1056_vm5, %v6660_v33, %v6662_v2  ;;  %6930 = vrot.lane.b32.xlu0 %v6681_v32, %s12923_s21  ;;  %v6664_v5 = vpop.permute.xlu0 %6663  ;;  %v11380_v33 = vld [vmem:[%s15360_s4 + $0x10] sm:$0xff] }
 0x56b   :  { %v6682_v6 = vmax.f32 %v6641_v52, %v6669_v31  ;;  %v6670_v7 = vsel %vm1056_vm5, %v6662_v2, %v6664_v5  ;;  %v6684_v14 = vmax.f32 %v6643_v57, %v6664_v5  ;;  %v11381_v31 = vld [vmem:[%s15360_s4 + $0x18] sm:$0xff] }
 0x56c   :  { %v6683_v10 = vmax.f32 %v6642_v56, %v6670_v7  ;;  %v11396_v7 = vld [vmem:[%s15360_s4 + $0x20] sm:$0xff] }
 0x56d   :  { %v6652_v9 = vpop.permute.xlu1 %6651  ;;  %6932 = vrot.lane.b32.xlu1 %v6682_v6, %s12923_s21 }
 0x56e   :  { %v6665_v36 = vsel %vm1056_vm5, %v6652_v9, %v6654_v29  ;;  %7014 = vrot.lane.b32.xlu0 %v6682_v6, %s12924_s22  ;;  %v53_v29 = vld [vmem:[%s15361_s5] sm:$0xff] }
 0x56f   :  { %v6678_v12 = vmax.f32 %v6637_v55, %v6665_v36  ;;  %v54_v55 = vld [vmem:[%s15361_s5 + $0x8] sm:$0xff] }
 0x571   :  { %12127 = vmatmul.mubr.msk.f32.vlgmr.msra.gmra.mrb[10].mxu0 %vm3138_vm12, %v6678_v12  ;;  %7016 = vrot.lane.b32.xlu1 %v6683_v10, %s12924_s22  ;;  %v11397_v12 = vld [vmem:[%s15360_s4 + $0x28] sm:$0xff] }
 0x572   :  { %7100 = vrot.lane.b32.xlu0 %v6683_v10, %s12922_s18  ;;  %12445 = vmatpush3.bf16.msra.mxu0 %v13481_v61 }
 0x573   :  { %12446 = vmatprep.subr.bf16.mxu0 %v12920_v58  ;;  %12168 = vmatprep.mubr.msk.f32.mxu0 %vm12919_vm3, %v12909_v3 }
 0x575   :  { %7102 = vrot.lane.b32.xlu1 %v6684_v14, %s12922_s18  ;;  %s12926_s18 = smov 36  }
 0x576   :  { %3461 = vrot.lane.b32.xlu0 %v14251_v41, %s12915_s16  ;;  %12448 = vmatpush3.bf16.msra.mxu0 %v13492_v0  ;;  %v12908_v41 = vld [vmem:[%s15359_s13 + $0x40] sm:$0x7f]  ;;  %s12927_s13 = smov 124  }
 0x577   :  { %12449 = vmatprep.subr.bf16.mxu0 %v12920_v58 }
 0x579   :  { %3548 = vrot.lane.b32.xlu1 %v14253_v44, %s12925_s2  ;;  %s12935_s2 = smov 56  }
 0x57a   :  { %12451 = vmatpush3.bf16.msra.mxu0 %v13505_v4 }
 0x57b   :  { %12452 = vmatprep.subr.bf16.mxu0 %v12920_v58 }
 0x57d   :  { %3633 = vrot.lane.b32.xlu1 %v14255_v46, %s12914_s30  ;;  %s12928_s30 = smov 32  }
 0x57e   :  { %12454 = vmatpush3.bf16.msra.mxu0 %v13517_v8 }
 0x57f   :  { %12166 = vmatprep.subr.mxu0 %v12909_v3 }
 0x581   :  { %3294 = vrot.lane.b32.xlu1 %v14247_v39, %s12926_s18 }
 0x582   :  { %12167 = vmatpush3.msk.msra.mxu0 %vm3142_vm11, %v12908_v41 }
 0x583   :  { %12467 = vmatprep.subr.bf16.mxu0 %v12920_v58 }
 0x5d8   :  { %v6766_v44 = vpop.permute.xlu0 %6765 }
 0x5d9   :  { %12148 = vmatmul.mubr.msk.f32.vlgmr.msra.gmra.mrb[50].mxu1 %vm3138_vm12, %v6766_v44 }
 0x5da   :  { %12457 = vmatpush3.bf16.msra.mxu1 %v13481_v61  ;;  %12189 = vmatprep.mubr.msk.f32.mxu1 %vm12919_vm3, %v12909_v3 }
 0x5db   :  { %v6849_v46 = vpop.permute.xlu1 %6848  ;;  %12458 = vmatprep.subr.bf16.mxu1 %v12920_v58 }
 0x5dc   :  { %12169 = vmatmul.mubr.msk.f32.vlgmr.msra.gmra.mrb[12].mxu0 %vm3138_vm12, %v6849_v46  ;;  %v6931_v39 = vpop.permute.xlu0 %6930 }
 0x5dd   :  { %12469 = vmatpush3.bf16.msra.mxu0 %v13481_v61  ;;  %12210 = vmatprep.mubr.msk.f32.mxu0 %vm12919_vm3, %v12909_v3 }
 0x5de   :  { %12460 = vmatpush3.bf16.msra.mxu1 %v13492_v0  ;;  %12470 = vmatprep.subr.bf16.mxu0 %v12920_v58 }
 0x5df   :  { %v6933_v15 = vpop.permute.xlu1 %6932  ;;  %12461 = vmatprep.subr.bf16.mxu1 %v12920_v58 }
 0x5e0   :  { %v7015_v16 = vpop.permute.xlu0 %7014  ;;  %v6934_v23 = vsel %vm3386_vm13, %v6931_v39, %v6933_v15  ;;  %vm3378_vm13 = vcmask 882240   ;;  %v11405_v39 = vld [vmem:[%s15360_s4 + $0x30] sm:$0xff] }
 0x5e1   :  { %12472 = vmatpush3.bf16.msra.mxu0 %v13492_v0 }
 0x5e2   :  { %12463 = vmatpush3.bf16.msra.mxu1 %v13505_v4  ;;  %12473 = vmatprep.subr.bf16.mxu0 %v12920_v58 }
 0x5e3   :  { %v7017_v18 = vpop.permute.xlu1 %7016  ;;  %12464 = vmatprep.subr.bf16.mxu1 %v12920_v58 }
 0x5e4   :  { %v7101_v20 = vpop.permute.xlu0 %7100  ;;  %v7018_v24 = vsel %vm3473_vm14, %v7015_v16, %v7017_v18  ;;  %vm7210_vm14 = vcmask 1045504   ;;  %v11406_v18 = vld [vmem:[%s15360_s4 + $0x38] sm:$0xff] }
 0x5e5   :  { %12475 = vmatpush3.bf16.msra.mxu0 %v13505_v4 }
 0x5e6   :  { %12466 = vmatpush3.bf16.msra.mxu1 %v13517_v8  ;;  %12476 = vmatprep.subr.bf16.mxu0 %v12920_v58 }
 0x5e7   :  { %v7103_v21 = vpop.permute.xlu1 %7102  ;;  %12187 = vmatprep.subr.mxu1 %v12909_v3 }
 0x5e8   :  { %v14340_v22 = vpop.permute.xlu0 %3461  ;;  %v7104_v27 = vsel %vm3558_vm15, %v7101_v20, %v7103_v21  ;;  %vm3464_vm15 = vcmask 1046368  }
 0x5e9   :  { %12478 = vmatpush3.bf16.msra.mxu0 %v13517_v8  ;;  %3467 = vst.msk [vmem:[#allocation2 + $0x8] sm:$0x3f] %vm3466_vm1, %v14340_v22  ;;  %vm7203_vm1 = vcmask 48128  }
 0x5ea   :  { %12188 = vmatpush3.msk.msra.mxu1 %vm3142_vm11, %v12908_v41  ;;  %12208 = vmatprep.subr.mxu0 %v12909_v3 }
 0x5eb   :  { %12190 = vmatmul.mubr.msk.f32.vlgmr.msra.gmra.mrb[52].mxu1 %vm3138_vm12, %v6934_v23  ;;  %12479 = vmatprep.subr.bf16.mxu1 %v12920_v58  ;;  %v3549_v13 = vpop.permute.xlu1 %3548 }
 0x5ec   :  { %3552 = vst.msk [vmem:[#allocation2 + $0x8] sm:$0x3f] %vm3551_vm2, %v3549_v13  ;;  %12481 = vmatpush3.bf16.msra.mxu1 %v13481_v61  ;;  %12231 = vmatprep.mubr.msk.f32.mxu1 %vm12919_vm3, %v12909_v3  ;;  %vm7095_vm2 = vcmask 1046336  }
 0x5ed   :  { %12209 = vmatpush3.msk.msra.mxu0 %vm3142_vm11, %v12908_v41  ;;  %12482 = vmatprep.subr.bf16.mxu1 %v12920_v58 }
 0x5ee   :  { %12211 = vmatmul.mubr.msk.f32.vlgmr.msra.gmra.mrb[14].mxu0 %vm3138_vm12, %v7018_v24  ;;  %v11414_v24 = vld [vmem:[%s15360_s4 + $0x40] sm:$0xff] }
 0x5ef   :  { %v3634_v25 = vpop.permute.xlu1 %3633  ;;  %7445 = vmatprep.mubr.f32.mxu0 %v12909_v3 }
 0x5f0   :  { %3637 = vst.msk [vmem:[#allocation2 + $0x8] sm:$0x3f] %vm3636_vm7, %v3634_v25  ;;  %12484 = vmatpush3.bf16.msra.mxu1 %v13492_v0  ;;  %vm7097_vm7 = vcmask 95232  }
 0x5f1   :  { %12485 = vmatprep.subr.bf16.mxu1 %v12920_v58 }
 0x5f3   :  { %v3295_v61 = vpop.permute.xlu1 %3294 }
 0x5f4   :  { %3298 = vst.msk [vmem:[#allocation2] sm:$0x3f] %vm3297_vm8, %v3295_v61  ;;  %12487 = vmatpush3.bf16.msra.mxu1 %v13505_v4  ;;  %vm7181_vm8 = vcmask 390240  }
 0x5f5   :  { %12488 = vmatprep.subr.bf16.mxu1 %v12920_v58 }
 0x5f8   :  { %12490 = vmatpush3.bf16.msra.mxu1 %v13517_v8 }
 0x5f9   :  { %12229 = vmatprep.subr.mxu1 %v12909_v3 }
 0x5fc   :  { %12230 = vmatpush3.msk.msra.mxu1 %vm3142_vm11, %v12908_v41  ;;  %vm6845_vm11 = vcmask 259072  }
 0x5fd   :  { %12232 = vmatmul.mubr.msk.f32.vlgmr.msra.gmra.mrb[54].mxu1 %vm3138_vm12, %v7104_v27  ;;  %vm6926_vm12 = vcmask 554240   ;;  %v11415_v27 = vld [vmem:[%s15360_s4 + $0x48] sm:$0xff] }
 0x5fe   :  { %7281 = vmatprep.mubr.f32.mxu1 %v12909_v3 }
 0x644   :  { %v6754_v0 = vpop.f32.mrb[10].mxu0 }
 0x645   :  { %v12128_v17 = vpop.f32.mrb[11].mxu0  ;;  %6759 = vrot.lane.b32.xlu0 %v6754_v0, %s12921_s17  ;;  %s12930_s17 = smov 104  }
 0x6ac   :  { %v6835_v19 = vpop.f32.mrb[50].mxu1 }
 0x6ad   :  { %6840 = vrot.lane.b32.xlu0 %v6835_v19, %s12927_s13  ;;  %v12149_v4 = vpop.f32.mrb[51].mxu1 }
 0x6af   :  { %v6918_v30 = vpop.f32.mrb[12].mxu0 }
 0x6b0   :  { %v12170_v8 = vpop.f32.mrb[13].mxu0 }
 0x6b1   :  { %6923 = vrot.lane.b32.xlu0 %v6918_v30, %s12928_s30  ;;  %v11423_v8 = vld [vmem:[%s15360_s4 + $0x50] sm:$0xff] }
 0x6b5   :  { %3375 = vrot.lane.b32.xlu0 %v14249_v28, %s12929_s20 }
 0x6b7   :  { %v6760_v40 = vpop.permute.xlu0 %6759 }
 0x6b8   :  { %6763 = vst.msk [vmem:[#allocation2 + $0x8] sm:$0x3f] %vm6762_vm9, %v6760_v40  ;;  %vm7726_vm9 = vcmask 752640  }
 0x6be   :  { %v7003_v38 = vpop.f32.mrb[52].mxu1 }
 0x6bf   :  { %7008 = vrot.lane.b32.xlu1 %v7003_v38, %s12923_s21  ;;  %v12191_v42 = vpop.f32.mrb[53].mxu1 }
 0x6c0   :  { %v11424_v42 = vld [vmem:[%s15360_s4 + $0x58] sm:$0xff] }
 0x6c1   :  { %v7087_v45 = vpop.f32.mrb[14].mxu0 }
 0x6c2   :  { %v12212_v37 = vpop.f32.mrb[15].mxu0 }
 0x6c3   :  { %7092 = vrot.lane.b32.xlu1 %v7087_v45, %s12930_s17 }
 0x6d0   :  { %v7173_v34 = vpop.f32.mrb[54].mxu1 }
 0x6d1   :  { %7178 = vrot.lane.b32.xlu0 %v7173_v34, %s12931_s25  ;;  %v12233_v43 = vpop.f32.mrb[55].mxu1 }
 0x71f   :  { %v6841_v47 = vpop.permute.xlu0 %6840 }
 0x720   :  { %6844 = vst.msk [vmem:[#allocation2 + $0x8] sm:$0x3f] %vm6843_vm10, %v6841_v47  ;;  %vm8096_vm10 = vcmask 736256  }
 0x721   :  { %6846 = vst.msk [vmem:[#allocation2 + $0x10] sm:$0x3f] %vm6845_vm11, %v6841_v47  ;;  %vm8281_vm11 = vcmask 457728  }
 0x723   :  { %v6924_v28 = vpop.permute.xlu0 %6923 }
 0x724   :  { %6927 = vst.msk [vmem:[#allocation2 + $0x10] sm:$0x3f] %vm6926_vm12, %v6924_v28  ;;  %v11432_v28 = vld [vmem:[%s15360_s4 + $0x60] sm:$0xff]  ;;  %vm8466_vm12 = vcmask 449536  }
 0x727   :  { %v3376_v11 = vpop.permute.xlu0 %3375  ;;  %v7184_v48 = vld [vmem:[#allocation2 + $0x8] sm:$0x3f] }
 0x728   :  { %3379 = vst.msk [vmem:[#allocation2] sm:$0x3f] %vm3378_vm13, %v3376_v11  ;;  %7197 = vrot.lane.b32.xlu1 %v7184_v48, %s12910_s24  ;;  %11389 = vmatprep.subr.msk.mxu0 %vm7210_vm14, %v7184_v48  ;;  %vm8914_vm13 = vcmask 269312  }
 0x729   :  { %3465 = vst.msk [vmem:[#allocation2] sm:$0x3f] %vm3464_vm15, %v14340_v22  ;;  %vm9094_vm15 = vcmask 277640  }
 0x730   :  { %v7183_v49 = vld [vmem:[#allocation2] sm:$0x3f] }
 0x731   :  { %v7009_v52 = vpop.permute.xlu1 %7008  ;;  %7195 = vrot.lane.b32.xlu1 %v7183_v49, %s12910_s24  ;;  %11390 = vmatpush1.msk.msra.mxu0 %vm7210_vm14, %v7183_v49 }
 0x732   :  { %7012 = vst.msk [vmem:[#allocation2 + $0x10] sm:$0x3f] %vm7011_vm6, %v7009_v52  ;;  %11391 = vmatmul.mubr.msk.f32.vlgmr.msra.gmra.mrb[16].mxu0 %vm7203_vm1, %v14378_v51  ;;  %vm9308_vm6 = vcmask 1041409  }
 0x733   :  { %7451 = vmatprep.mubr.f32.mxu0 %v12909_v3 }
 0x735   :  { %v7093_v53 = vpop.permute.xlu1 %7092 }
 0x736   :  { %7096 = vst.msk [vmem:[#allocation2 + $0x10] sm:$0x3f] %vm7095_vm2, %v7093_v53  ;;  %11392 = vmatmul.mubr.msk.f32.gmra.mrb[18].mxu0 %vm7203_vm1, %v14386_v54  ;;  %vm10889_vm2 = vcmask 64512  }
 0x737   :  { %7098 = vst.msk [vmem:[#allocation2 + $0x18] sm:$0x3f] %vm7097_vm7, %v7093_v53  ;;  %7620 = vmatprep.mubr.f32.mxu0 %v12909_v3  ;;  %vm10963_vm7 = vcmask 588800  }
 0x73d   :  { %v14391_v56 = vld [vmem:[#allocation2 + $0x10] sm:$0x3f] }
 0x73e   :  { %7199 = vrot.lane.b32.xlu0 %v14391_v56, %s12910_s24  ;;  %7540 = vrot.lane.b32.xlu1 %v14391_v56, %s12911_s27 }
 0x742   :  { %7538 = vrot.lane.b32.xlu0 %v7184_v48, %s12911_s27  ;;  %7720 = vrot.lane.b32.xlu1 %v7184_v48, %s12932_s23 }
 0x743   :  { %v7179_v57 = vpop.permute.xlu0 %7178 }
 0x744   :  { %7182 = vst.msk [vmem:[#allocation2 + $0x18] sm:$0x3f] %vm7181_vm8, %v7179_v57  ;;  %vm11131_vm8 = vcmask 1024  }
 0x746   :  { %7536 = vrot.lane.b32.xlu0 %v7183_v49, %s12911_s27  ;;  %7718 = vrot.lane.b32.xlu1 %v7183_v49, %s12932_s23  ;;  %s12936_s27 = smov 55  }
 0x74a   :  { %7722 = vrot.lane.b32.xlu0 %v14391_v56, %s12932_s23  ;;  %7905 = vrot.lane.b32.xlu1 %v7184_v48, %s12933_s0 }
 0x74b   :  { %v7186_v59 = vld [vmem:[#allocation2 + $0x18] sm:$0x3f] }
 0x74e   :  { %7903 = vrot.lane.b32.xlu1 %v7183_v49, %s12933_s0  ;;  %7724 = vrot.lane.b32.xlu0 %v7186_v59, %s12932_s23 }
 0x752   :  { %8090 = vrot.lane.b32.xlu1 %v7184_v48, %s12934_s19  ;;  %7907 = vrot.lane.b32.xlu0 %v14391_v56, %s12933_s0 }
 0x756   :  { %8088 = vrot.lane.b32.xlu1 %v7183_v49, %s12934_s19  ;;  %7909 = vrot.lane.b32.xlu0 %v7186_v59, %s12933_s0 }
 0x75a   :  { %8275 = vrot.lane.b32.xlu1 %v7184_v48, %s12935_s2  ;;  %8092 = vrot.lane.b32.xlu0 %v14391_v56, %s12934_s19 }
 0x75e   :  { %8273 = vrot.lane.b32.xlu1 %v7183_v49, %s12935_s2  ;;  %8094 = vrot.lane.b32.xlu0 %v7186_v59, %s12934_s19 }
 0x762   :  { %8460 = vrot.lane.b32.xlu1 %v7184_v48, %s12936_s27  ;;  %8277 = vrot.lane.b32.xlu0 %v14391_v56, %s12935_s2 }
 0x766   :  { %8458 = vrot.lane.b32.xlu1 %v7183_v49, %s12936_s27  ;;  %8279 = vrot.lane.b32.xlu0 %v7186_v59, %s12935_s2 }
 0x76a   :  { %8645 = vrot.lane.b32.xlu1 %v7184_v48, %s12912_s28  ;;  %8462 = vrot.lane.b32.xlu0 %v14391_v56, %s12936_s27  ;;  %v11433_v48 = vld [vmem:[%s15360_s4 + $0x68] sm:$0xff] }
 0x76e   :  { %8643 = vrot.lane.b32.xlu1 %v7183_v49, %s12912_s28  ;;  %8464 = vrot.lane.b32.xlu0 %v7186_v59, %s12936_s27 }
 0x772   :  { %8647 = vrot.lane.b32.xlu0 %v14391_v56, %s12912_s28  ;;  %8826 = vperm.xlu1 %12899, %v53_v29  }
 0x776   :  { %8649 = vrot.lane.b32.xlu0 %v7186_v59, %s12912_s28 }
 0x77a   :  { %8831 = vperm.xlu0 %12898, %v54_v55   ;;  %v11442_v55 = vld [vmem:[%s15360_s4 + $0x78] sm:$0xff] }
 0x79a   :  { %v7198_v60 = vpop.permute.xlu1 %7197 }
 0x7a3   :  { %v7196_v62 = vpop.permute.xlu1 %7195 }
 0x7a4   :  { %v7201_v35 = vsel %vm98_vm0, %v7196_v62, %v7198_v60 }
 0x7b0   :  { %v7541_v26 = vpop.permute.xlu1 %7540  ;;  %v7200_v50 = vpop.permute.xlu0 %7199 }
 0x7b1   :  { %v7202_v63 = vsel %vm98_vm0, %v7198_v60, %v7200_v50 }
 0x7b2   :  { %11382 = vmatprep.subr.msk.mxu1 %vm7210_vm14, %v7202_v63  ;;  %v11451_v63 = vld [vmem:[%s15360_s4 + $0x88] sm:$0xff] }
 0x7b3   :  { %11383 = vmatpush1.msk.msra.mxu1 %vm7210_vm14, %v7201_v35 }
 0x7b4   :  { %v7721_v1 = vpop.permute.xlu1 %7720  ;;  %11384 = vmatmul.mubr.msk.f32.vlgmr.msra.gmra.mrb[56].mxu1 %vm7203_vm1, %v11380_v33  ;;  %12234 = vmatprep.subr.msk.mxu1 %vm7210_vm14, %v7200_v50  ;;  %v7539_v32 = vpop.permute.xlu0 %7538 }
 0x7b5   :  { %v7543_v2 = vsel %vm723_vm4, %v7539_v32, %v7541_v26  ;;  %12235 = vmatpush3.msk.msra.mxu1 %vm7210_vm14, %v7200_v50  ;;  %7287 = vmatprep.mubr.f32.mxu1 %v12909_v3 }
 0x7b6   :  { %12239 = vmatprep.subr.msk.mxu1 %vm7210_vm14, %v14391_v56  ;;  %11398 = vmatprep.subr.msk.mxu0 %vm7210_vm14, %v7543_v2 }
 0x7b8   :  { %v7719_v5 = vpop.permute.xlu1 %7718  ;;  %11385 = vmatmul.mubr.msk.f32.gmra.mrb[58].mxu1 %vm7203_vm1, %v11381_v31  ;;  %v7537_v6 = vpop.permute.xlu0 %7536 }
 0x7b9   :  { %v7542_v9 = vsel %vm723_vm4, %v7537_v6, %v7539_v32  ;;  %12236 = vmatprep.mubr.msk.f32.mxu1 %vm7203_vm1, %v11380_v33  ;;  %v7727_v41 = vsel %vm7726_vm9, %v7719_v5, %v7721_v1  ;;  %vm7911_vm4 = vcmask 744448  }
 0x7ba   :  { %11399 = vmatpush1.msk.msra.mxu0 %vm7210_vm14, %v7542_v9 }
 0x7bb   :  { %11400 = vmatmul.mubr.msk.f32.vlgmr.msra.gmra.mrb[16].mxu0 %vm7203_vm1, %v11396_v7 }
 0x7bc   :  { %v7906_v36 = vpop.permute.xlu1 %7905  ;;  %12237 = vmatmul.mubr.msk.f32.vlgmr.msra.gmra.mrb[60].mxu1 %vm7203_vm1, %v11381_v31  ;;  %v7723_v10 = vpop.permute.xlu0 %7722  ;;  %7626 = vmatprep.mubr.f32.mxu0 %v12909_v3 }
 0x7bd   :  { %12240 = vmatpush3.msk.msra.mxu1 %vm7210_vm14, %v14391_v56  ;;  %v7728_v14 = vsel %vm7726_vm9, %v7721_v1, %v7723_v10  ;;  %12241 = vmatprep.mubr.msk.f32.mxu1 %vm7203_vm1, %v14378_v51  ;;  %v11441_v56 = vld [vmem:[%s15360_s4 + $0x70] sm:$0xff] }
 0x7be   :  { %12244 = vmatprep.subr.msk.mxu1 %vm7210_vm14, %v7541_v26  ;;  %11407 = vmatprep.subr.msk.mxu0 %vm7210_vm14, %v7728_v14 }
 0x7bf   :  { %11401 = vmatmul.mubr.msk.f32.gmra.mrb[18].mxu0 %vm7203_vm1, %v11397_v12 }
 0x7c0   :  { %11408 = vmatpush1.msk.msra.mxu0 %vm7210_vm14, %v7727_v41  ;;  %v7904_v44 = vpop.permute.xlu1 %7903  ;;  %v7725_v46 = vpop.permute.xlu0 %7724  ;;  %7806 = vmatprep.mubr.f32.mxu0 %v12909_v3 }
 0x7c1   :  { %v7729_v20 = vsel %vm7726_vm9, %v7723_v10, %v7725_v46  ;;  %v7912_v22 = vsel %vm7911_vm4, %v7904_v44, %v7906_v36 }
 0x7c3   :  { %11409 = vmatmul.mubr.msk.f32.vlgmr.msra.gmra.mrb[16].mxu0 %vm7203_vm1, %v11405_v39 }
 0x7c4   :  { %v8091_v15 = vpop.permute.xlu1 %8090  ;;  %12242 = vmatmul.mubr.msk.f32.vlgmr.msra.gmra.mrb[60].mxu1 %vm7203_vm1, %v14386_v54  ;;  %v7908_v16 = vpop.permute.xlu0 %7907  ;;  %7812 = vmatprep.mubr.f32.mxu0 %v12909_v3 }
 0x7c5   :  { %12245 = vmatpush3.msk.msra.mxu1 %vm7210_vm14, %v7541_v26  ;;  %v7913_v21 = vsel %vm7911_vm4, %v7906_v36, %v7908_v16  ;;  %12246 = vmatprep.mubr.msk.f32.mxu1 %vm7203_vm1, %v11396_v7  ;;  %v11450_v26 = vld [vmem:[%s15360_s4 + $0x80] sm:$0xff] }
 0x7c6   :  { %12249 = vmatprep.subr.msk.mxu1 %vm7210_vm14, %v7729_v20  ;;  %11416 = vmatprep.subr.msk.mxu0 %vm7210_vm14, %v7913_v21 }
 0x7c7   :  { %11410 = vmatmul.mubr.msk.f32.gmra.mrb[18].mxu0 %vm7203_vm1, %v11406_v18 }
 0x7c8   :  { %11417 = vmatpush1.msk.msra.mxu0 %vm7210_vm14, %v7912_v22  ;;  %v8089_v23 = vpop.permute.xlu1 %8088  ;;  %v7910_v13 = vpop.permute.xlu0 %7909  ;;  %7991 = vmatprep.mubr.f32.mxu0 %v12909_v3 }
 0x7c9   :  { %v7914_v0 = vsel %vm7911_vm4, %v7908_v16, %v7910_v13  ;;  %v8097_v19 = vsel %vm8096_vm10, %v8089_v23, %v8091_v15 }
 0x7cb   :  { %11418 = vmatmul.mubr.msk.f32.vlgmr.msra.gmra.mrb[16].mxu0 %vm7203_vm1, %v11414_v24 }
 0x7cc   :  { %v8276_v25 = vpop.permute.xlu1 %8275  ;;  %12247 = vmatmul.mubr.msk.f32.vlgmr.msra.gmra.mrb[60].mxu1 %vm7203_vm1, %v11397_v12  ;;  %v8093_v61 = vpop.permute.xlu0 %8092  ;;  %7997 = vmatprep.mubr.f32.mxu0 %v12909_v3 }
 0x7cd   :  { %12250 = vmatpush3.msk.msra.mxu1 %vm7210_vm14, %v7729_v20  ;;  %v8098_v17 = vsel %vm8096_vm10, %v8091_v15, %v8093_v61  ;;  %12251 = vmatprep.mubr.msk.f32.mxu1 %vm7203_vm1, %v11405_v39 }
 0x7ce   :  { %12254 = vmatprep.subr.msk.mxu1 %vm7210_vm14, %v7914_v0  ;;  %11425 = vmatprep.subr.msk.mxu0 %vm7210_vm14, %v8098_v17 }
 0x7cf   :  { %11419 = vmatmul.mubr.msk.f32.gmra.mrb[18].mxu0 %vm7203_vm1, %v11415_v27 }
 0x7d0   :  { %11426 = vmatpush1.msk.msra.mxu0 %vm7210_vm14, %v8097_v19  ;;  %v8274_v4 = vpop.permute.xlu1 %8273  ;;  %v8095_v30 = vpop.permute.xlu0 %8094  ;;  %8176 = vmatprep.mubr.f32.mxu0 %v12909_v3 }
 0x7d1   :  { %v8099_v45 = vsel %vm8096_vm10, %v8093_v61, %v8095_v30  ;;  %v8282_v34 = vsel %vm8281_vm11, %v8274_v4, %v8276_v25 }
 0x7d3   :  { %11427 = vmatmul.mubr.msk.f32.vlgmr.msra.gmra.mrb[16].mxu0 %vm7203_vm1, %v11423_v8 }
 0x7d4   :  { %v8461_v40 = vpop.permute.xlu1 %8460  ;;  %12252 = vmatmul.mubr.msk.f32.vlgmr.msra.gmra.mrb[60].mxu1 %vm7203_vm1, %v11406_v18  ;;  %v8278_v38 = vpop.permute.xlu0 %8277  ;;  %8182 = vmatprep.mubr.f32.mxu0 %v12909_v3 }
 0x7d5   :  { %12255 = vmatpush3.msk.msra.mxu1 %vm7210_vm14, %v7914_v0  ;;  %v8283_v37 = vsel %vm8281_vm11, %v8276_v25, %v8278_v38  ;;  %12256 = vmatprep.mubr.msk.f32.mxu1 %vm7203_vm1, %v11414_v24  ;;  %v65_v0 = vld [vmem:[%s15362_s14 + $0x8] sm:$0xff] }
 0x7d6   :  { %12259 = vmatprep.subr.msk.mxu1 %vm7210_vm14, %v8099_v45  ;;  %11434 = vmatprep.subr.msk.mxu0 %vm7210_vm14, %v8283_v37 }
 0x7d7   :  { %11428 = vmatmul.mubr.msk.f32.gmra.mrb[18].mxu0 %vm7203_vm1, %v11424_v42 }
 0x7d8   :  { %11435 = vmatpush1.msk.msra.mxu0 %vm7210_vm14, %v8282_v34  ;;  %v8459_v43 = vpop.permute.xlu1 %8458  ;;  %v8280_v47 = vpop.permute.xlu0 %8279  ;;  %8361 = vmatprep.mubr.f32.mxu0 %v12909_v3 }
 0x7d9   :  { %v8284_v49 = vsel %vm8281_vm11, %v8278_v38, %v8280_v47  ;;  %v8467_v53 = vsel %vm8466_vm12, %v8459_v43, %v8461_v40  ;;  %v67_v38 = vld [vmem:[%s15362_s14 + $0x18] sm:$0xff] }
 0x7db   :  { %11436 = vmatmul.mubr.msk.f32.vlgmr.msra.gmra.mrb[16].mxu0 %vm7203_vm1, %v11432_v28 }
 0x7dc   :  { %12257 = vmatmul.mubr.msk.f32.vlgmr.msra.gmra.mrb[60].mxu1 %vm7203_vm1, %v11415_v27  ;;  %v8463_v11 = vpop.permute.xlu0 %8462  ;;  %8367 = vmatprep.mubr.f32.mxu0 %v12909_v3  ;;  %v8646_v51 = vpop.permute.xlu1 %8645  ;;  %v64_v27 = vld [vmem:[%s15362_s14] sm:$0xff] }
 0x7dd   :  { %12260 = vmatpush3.msk.msra.mxu1 %vm7210_vm14, %v8099_v45  ;;  %v8468_v52 = vsel %vm8466_vm12, %v8461_v40, %v8463_v11  ;;  %12261 = vmatprep.mubr.msk.f32.mxu1 %vm7203_vm1, %v11423_v8  ;;  %v14592_v17 = vpack.c.bf16 %v65_v0, %v64_v27  ;;  %v66_v40 = vld [vmem:[%s15362_s14 + $0x10] sm:$0xff]  ;;  %v14611_v45 = vld [vmem:[%s15362_s14 + $0x20] sm:$0x1]  ;;  %s12937_s14 = smov 40   ;;  %v11480_v0 = vld [vmem:[%s15363_s6 + $0x98] sm:$0x3] }
 0x7de   :  { %12264 = vmatprep.subr.msk.mxu1 %vm7210_vm14, %v8284_v49  ;;  %11443 = vmatprep.subr.msk.mxu0 %vm7210_vm14, %v8468_v52 }
 0x7df   :  { %11437 = vmatmul.mubr.msk.f32.gmra.mrb[18].mxu0 %vm7203_vm1, %v11433_v48 }
 0x7e0   :  { %11444 = vmatpush1.msk.msra.mxu0 %vm7210_vm14, %v8467_v53  ;;  %v8465_v54 = vpop.permute.xlu0 %8464  ;;  %8546 = vmatprep.mubr.f32.mxu0 %v12909_v3  ;;  %v8644_v57 = vpop.permute.xlu1 %8643 }
 0x7e1   :  { %v8469_v29 = vsel %vm8466_vm12, %v8463_v11, %v8465_v54  ;;  %v8651_v62 = vsel %vm1056_vm5, %v8644_v57, %v8646_v51 }
 0x7e3   :  { %11445 = vmatmul.mubr.msk.f32.vlgmr.msra.gmra.mrb[16].mxu0 %vm7203_vm1, %v11441_v56 }
 0x7e4   :  { %12262 = vmatmul.mubr.msk.f32.vlgmr.msra.gmra.mrb[60].mxu1 %vm7203_vm1, %v11424_v42  ;;  %v8648_v59 = vpop.permute.xlu0 %8647  ;;  %8552 = vmatprep.mubr.f32.mxu0 %v12909_v3  ;;  %v14604_v42 = vpack.c.bf16 %v67_v38, %v66_v40 }
 0x7e5   :  { %12265 = vmatpush3.msk.msra.mxu1 %vm7210_vm14, %v8284_v49  ;;  %v8652_v60 = vsel %vm1056_vm5, %v8646_v51, %v8648_v59  ;;  %12266 = vmatprep.mubr.msk.f32.mxu1 %vm7203_vm1, %v11432_v28 }
 0x7e6   :  { %12269 = vmatprep.subr.msk.mxu1 %vm7210_vm14, %v8469_v29  ;;  %11452 = vmatprep.subr.msk.mxu0 %vm7210_vm14, %v8652_v60 }
 0x7e7   :  { %11446 = vmatmul.mubr.msk.f32.gmra.mrb[18].mxu0 %vm7203_vm1, %v11442_v55 }
 0x7e8   :  { %11453 = vmatpush1.msk.msra.mxu0 %vm7210_vm14, %v8651_v62  ;;  %8730 = vmatprep.mubr.f32.mxu0 %v12909_v3  ;;  %v8650_v50 = vpop.permute.xlu0 %8649 }
 0x7e9   :  { %v8653_v33 = vsel %vm1056_vm5, %v8648_v59, %v8650_v50  ;;  %vm8921_vm5 = vcmask 1040384  }
 0x7eb   :  { %11454 = vmatmul.mubr.msk.f32.vlgmr.msra.gmra.mrb[16].mxu0 %vm7203_vm1, %v11450_v26 }
 0x7ec   :  { %12267 = vmatmul.mubr.msk.f32.vlgmr.msra.gmra.mrb[60].mxu1 %vm7203_vm1, %v11433_v48  ;;  %8736 = vmatprep.mubr.f32.mxu0 %v12909_v3 }
 0x7ed   :  { %12270 = vmatpush3.msk.msra.mxu1 %vm7210_vm14, %v8469_v29  ;;  %12271 = vmatprep.mubr.msk.f32.mxu1 %vm7203_vm1, %v11441_v56 }
 0x7ee   :  { %12274 = vmatprep.subr.msk.mxu1 %vm7210_vm14, %v8653_v33 }
 0x7ef   :  { %11455 = vmatmul.mubr.msk.f32.gmra.mrb[18].mxu0 %vm7203_vm1, %v11451_v63 }
 0x7f0   :  { %9384 = vmatprep.mubr.f32.mxu0 %v12909_v3 }
 0x7f1   :  { %v8827_v5 = vpop.permute.xlu1 %8826 }
 0x7f4   :  { %12272 = vmatmul.mubr.msk.f32.vlgmr.msra.gmra.mrb[60].mxu1 %vm7203_vm1, %v11442_v55 }
 0x7f5   :  { %12275 = vmatpush3.msk.msra.mxu1 %vm7210_vm14, %v8653_v33  ;;  %12276 = vmatprep.mubr.msk.f32.mxu1 %vm7203_vm1, %v11450_v26  ;;  %vm9313_vm14 = vcmask 1041408  }
 0x7f6   :  { %12492 = vmatprep.subr.bf16.mxu1 %v14592_v17 }
 0x7f9   :  { %v8832_v46 = vpop.permute.xlu0 %8831 }
 0x7fc   :  { %12277 = vmatmul.mubr.msk.f32.vlgmr.msra.gmra.mrb[60].mxu1 %vm7203_vm1, %v11451_v63  ;;  %vm9310_vm1 = vcmask 277504  }
 0x7fd   :  { %12494 = vmatpush3.bf16.msra.mxu1 %v14592_v17 }
 0x7fe   :  { %12496 = vmatprep.subr.bf16.mxu1 %v14604_v42 }
 0x801   :  { %12498 = vmatpush3.bf16.msra.mxu1 %v14604_v42 }
 0x802   :  { %12287 = vmatprep.subr.msk.mxu1 %vm8921_vm5, %v14611_v45 }
 0x805   :  { %12288 = vmatpush3.msk.msra.mxu1 %vm8921_vm5, %v14611_v45 }
 0x806   :  { %12500 = vmatprep.subr.bf16.mxu1 %v14592_v17 }
 0x887   :  { %v7283_v35 = vpop.f32.mrb[56].mxu1 }
 0x888   :  { %v7285_v1 = vpop.f32.mrb[57].mxu1 }
 0x88b   :  { %v7289_v32 = vpop.f32.mrb[58].mxu1 }
 0x88c   :  { %v7291_v2 = vpop.f32.mrb[59].mxu1 }
 0x8be   :  { %v8732_v31 = vpop.f32.mrb[16].mxu0 }
 0x8bf   :  { %v12693_v6 = vadd.f32 %v8732_v31, %v7283_v35  ;;  %v8734_v7 = vpop.f32.mrb[17].mxu0 }
 0x8c0   :  { %v12694_v9 = vadd.f32 %v8734_v7, %v7285_v1 }
 0x8c1   :  { %v8834_v36 = vadd.f32 %v12693_v6, %v8827_v5 }
 0x8c2   :  { %v8835_v10 = vadd.f32 %v12694_v9, %v8827_v5  ;;  %v8738_v12 = vpop.f32.mrb[18].mxu0 }
 0x8c3   :  { %v8840_v14 = vmax.f32 %v8834_v36, 0.0  ;;  %v12695_v41 = vadd.f32 %v8738_v12, %v7289_v32  ;;  %v8740_v44 = vpop.f32.mrb[19].mxu0 }
 0x8c4   :  { %v8841_v39 = vmax.f32 %v8835_v10, 0.0  ;;  %v12696_v15 = vadd.f32 %v8740_v44, %v7291_v2 }
 0x8c5   :  { %v8837_v16 = vadd.f32 %v12695_v41, %v8832_v46  ;;  %8852 = vrot.lane.b32.xlu1 %v8840_v14, %s12910_s24 }
 0x8c6   :  { %8854 = vrot.lane.b32.xlu0 %v8841_v39, %s12910_s24  ;;  %v8838_v24 = vadd.f32 %v12696_v15, %v8832_v46 }
 0x8c7   :  { %v8843_v18 = vmax.f32 %v8837_v16, 0.0  ;;  %v11471_v16 = vld [vmem:[%s15363_s6 + $0x50] sm:$0xff] }
 0x8c8   :  { %v8844_v61 = vmax.f32 %v8838_v24, 0.0 }
 0x8ca   :  { %8858 = vrot.lane.b32.xlu0 %v8843_v18, %s12910_s24 }
 0x8cf   :  { %v12278_v20 = vpop.f32.mrb[60].mxu1 }
 0x8d0   :  { %v8839_v21 = vadd.f32 %v12278_v20, %v8832_v46  ;;  %v8809_v22 = vpop.f32.mrb[61].mxu1  ;;  %v11472_v46 = vld [vmem:[%s15363_s6 + $0x58] sm:$0xff] }
 0x8d1   :  { %v8836_v23 = vadd.f32 %v8827_v5, %v8809_v22  ;;  %v11476_v22 = vld [vmem:[%s15363_s6 + $0x78] sm:$0xff] }
 0x8d2   :  { %v8845_v13 = vmax.f32 %v8839_v21, 0.0 }
 0x8d3   :  { %v8842_v25 = vmax.f32 %v8836_v23, 0.0  ;;  %v11478_v23 = vld [vmem:[%s15363_s6 + $0x88] sm:$0xff] }
 0x8d4   :  { %8862 = vrot.lane.b32.xlu0 %v8845_v13, %s12910_s24  ;;  %v12527_v24 = vpack.c.bf16 %v11478_v23, %v11476_v22  ;;  %v11504_v23 = vld [vmem:[%s15363_s6 + $0x110] sm:$0xff] }
 0x8d5   :  { %8856 = vrot.lane.b32.xlu1 %v8842_v25, %s12910_s24 }
 0x8d9   :  { %8860 = vrot.lane.b32.xlu1 %v8844_v61, %s12910_s24 }
 0x937   :  { %v8853_v19 = vpop.permute.xlu1 %8852 }
 0x938   :  { %v8855_v4 = vpop.permute.xlu0 %8854 }
 0x939   :  { %v8864_v30 = vsel %vm98_vm0, %v8853_v19, %v8855_v4  ;;  %v9285_v19 = vld [vmem:[%s15363_s6 + $0x18] sm:$0xff] }
 0x93a   :  { %v8874_v8 = vmax.f32 %v8840_v14, %v8864_v30 }
 0x93c   :  { %8886 = vrot.lane.b32.xlu1 %v8874_v8, %s12932_s23  ;;  %v8859_v37 = vpop.permute.xlu0 %8858 }
 0x946   :  { %v8863_v28 = vpop.permute.xlu0 %8862 }
 0x947   :  { %v8857_v34 = vpop.permute.xlu1 %8856  ;;  %v8879_v53 = vmax.f32 %v8845_v13, %v8863_v28 }
 0x948   :  { %v8865_v43 = vsel %vm98_vm0, %v8855_v4, %v8857_v34  ;;  %v8876_v54 = vmax.f32 %v8842_v25, %v8857_v34  ;;  %v11475_v25 = vld [vmem:[%s15363_s6 + $0x70] sm:$0xff]  ;;  %v9282_v34 = vld [vmem:[%s15363_s6] sm:$0xff] }
 0x949   :  { %v8875_v47 = vmax.f32 %v8841_v39, %v8865_v43  ;;  %v11474_v39 = vld [vmem:[%s15363_s6 + $0x68] sm:$0xff]  ;;  %v11479_v4 = vld [vmem:[%s15363_s6 + $0x90] sm:$0x3] }
 0x94a   :  { %v12523_v15 = vpack.c.bf16 %v11474_v39, %v11472_v46  ;;  %v9284_v43 = vld [vmem:[%s15363_s6 + $0x10] sm:$0xff]  ;;  %v11505_v39 = vld [vmem:[%s15363_s6 + $0x118] sm:$0xff] }
 0x94b   :  { %v8861_v11 = vpop.permute.xlu1 %8860  ;;  %8888 = vrot.lane.b32.xlu0 %v8875_v47, %s12932_s23 }
 0x94c   :  { %v8866_v48 = vsel %vm98_vm0, %v8859_v37, %v8861_v11  ;;  %v8867_v49 = vsel %vm98_vm0, %v8861_v11, %v8863_v28  ;;  %vm9000_vm0 = vcmask 138240   ;;  %12524 = vmatprep.subr.bf16.mxu0 %v12523_v15  ;;  %v9289_v28 = vld [vmem:[%s15363_s6 + $0x38] sm:$0xff]  ;;  %v11507_v15 = vld [vmem:[%s15363_s6 + $0x128] sm:$0xff] }
 0x94d   :  { %v8877_v52 = vmax.f32 %v8843_v18, %v8866_v48  ;;  %v8878_v51 = vmax.f32 %v8844_v61, %v8867_v49  ;;  %v11473_v18 = vld [vmem:[%s15363_s6 + $0x60] sm:$0xff]  ;;  %v12533_v49 = vpack.c.bf16 %v9284_v43, %v9282_v34  ;;  %v12551_v22 = vpack.c.bf16 %v11507_v15, %v11505_v39  ;;  %v10864_v43 = vld [vmem:[%s15366_s8 + $0x10] sm:$0xff] }
 0x94e   :  { %v12525_v20 = vpack.c.bf16 %v11473_v18, %v11471_v16  ;;  %v11477_v61 = vld [vmem:[%s15363_s6 + $0x80] sm:$0xff] }
 0x94f   :  { %8892 = vrot.lane.b32.xlu1 %v8877_v52, %s12932_s23  ;;  %8894 = vrot.lane.b32.xlu0 %v8878_v51, %s12932_s23  ;;  %v12529_v27 = vpack.c.bf16 %v11477_v61, %v11475_v25  ;;  %v11495_v16 = vld [vmem:[%s15363_s6 + $0xe0] sm:$0x3]  ;;  %v11509_v61 = vld [vmem:[%s15363_s6 + $0x138] sm:$0x3] }
 0x950   :  { %12526 = vmatpush1.bf16.msra.mxu0 %v12525_v20 }
 0x951   :  { %12528 = vmatprep.subr.bf16.mxu0 %v12527_v24 }
 0x953   :  { %8890 = vrot.lane.b32.xlu1 %v8876_v54, %s12932_s23  ;;  %8896 = vrot.lane.b32.xlu0 %v8879_v53, %s12932_s23  ;;  %s12938_s23 = smov 96  }
 0x954   :  { %12530 = vmatpush1.bf16.msra.mxu0 %v12529_v27  ;;  %v11514_v27 = vld [vmem:[%s15363_s6 + $0x148] sm:$0xff] }
 0x955   :  { %11481 = vmatprep.subr.msk.mxu0 %vm9313_vm14, %v11480_v0 }
 0x958   :  { %11482 = vmatpush1.msk.msra.mxu0 %vm9313_vm14, %v11479_v4  ;;  %v10888_v4 = vld [vmem:[%s15364_s9] sm:$0xff] }
 0x9ae   :  { %v8887_v56 = vpop.permute.xlu1 %8886 }
 0x9bd   :  { %v8889_v57 = vpop.permute.xlu0 %8888 }
 0x9be   :  { %v8898_v59 = vsel %vm7726_vm9, %v8887_v56, %v8889_v57 }
 0x9bf   :  { %v8908_v55 = vmax.f32 %v8874_v8, %v8898_v59 }
 0x9c1   :  { %v8893_v29 = vpop.permute.xlu1 %8892  ;;  %9003 = vrot.lane.b32.xlu1 %v8908_v55, %s12935_s2  ;;  %12289 = vmatprep.mubr.msk.f32.mxu1 %vm8914_vm13, %v8908_v55  ;;  %v8895_v60 = vpop.permute.xlu0 %8894  ;;  %v9291_v55 = vld [vmem:[%s15363_s6 + $0x48] sm:$0x3] }
 0x9c2   :  { %v8900_v62 = vsel %vm7726_vm9, %v8893_v29, %v8895_v60  ;;  %v11488_v29 = vld [vmem:[%s15363_s6 + $0xa8] sm:$0xff] }
 0x9c3   :  { %v8911_v26 = vmax.f32 %v8877_v52, %v8900_v62  ;;  %v11487_v62 = vld [vmem:[%s15363_s6 + $0xa0] sm:$0xff] }
 0x9c5   :  { %v8891_v50 = vpop.permute.xlu1 %8890  ;;  %9005 = vrot.lane.b32.xlu0 %v8911_v26, %s12935_s2  ;;  %12290 = vmatmul.mubr.msk.f32.vlgmr.msra.gmra.mrb[62].mxu1 %vm8914_vm13, %v8911_v26  ;;  %v8897_v63 = vpop.permute.xlu0 %8896  ;;  %s12939_s2 = smov 17   ;;  %v11489_v26 = vld [vmem:[%s15363_s6 + $0xb0] sm:$0xff] }
 0x9c6   :  { %v8899_v33 = vsel %vm7726_vm9, %v8889_v57, %v8891_v50  ;;  %v8901_v35 = vsel %vm7726_vm9, %v8895_v60, %v8897_v63  ;;  %12502 = vmatpush3.bf16.msra.mxu1 %v14592_v17  ;;  %v8910_v2 = vmax.f32 %v8876_v54, %v8891_v50  ;;  %v8913_v31 = vmax.f32 %v8879_v53, %v8897_v63  ;;  %v9286_v53 = vld [vmem:[%s15363_s6 + $0x20] sm:$0xff]  ;;  %v9288_v54 = vld [vmem:[%s15363_s6 + $0x30] sm:$0xff]  ;;  %v11490_v60 = vld [vmem:[%s15363_s6 + $0xb8] sm:$0xff] }
 0x9c7   :  { %v8909_v1 = vmax.f32 %v8875_v47, %v8899_v33  ;;  %v8912_v32 = vmax.f32 %v8878_v51, %v8901_v35  ;;  %12504 = vmatprep.subr.bf16.mxu1 %v14604_v42  ;;  %v9287_v47 = vld [vmem:[%s15363_s6 + $0x28] sm:$0xff]  ;;  %v12537_v57 = vpack.c.bf16 %v9288_v54, %v9286_v53  ;;  %v11494_v33 = vld [vmem:[%s15363_s6 + $0xd8] sm:$0xff]  ;;  %v9290_v35 = vld [vmem:[%s15363_s6 + $0x40] sm:$0x3] }
 0x9c8   :  { %v12535_v51 = vpack.c.bf16 %v9289_v28, %v9287_v47  ;;  %v11492_v63 = vld [vmem:[%s15363_s6 + $0xc8] sm:$0xff]  ;;  %v10865_v47 = vld [vmem:[%s15366_s8 + $0x18] sm:$0xff]  ;;  %v11508_v28 = vld [vmem:[%s15363_s6 + $0x130] sm:$0x3] }
 0x9c9   :  { %9099 = vrot.lane.b32.xlu1 %v8909_v1, %s12937_s14  ;;  %9101 = vrot.lane.b32.xlu0 %v8912_v32, %s12937_s14  ;;  %v12539_v1 = vpack.c.bf16 %v11490_v60, %v11488_v29  ;;  %v12541_v32 = vpack.c.bf16 %v11489_v26, %v11487_v62  ;;  %v11519_v53 = vld [vmem:[%s15363_s6 + $0x170] sm:$0xff]  ;;  %v12655_v54 = vpack.c.bf16 %v10865_v47, %v10864_v43  ;;  %v11522_v62 = vld [vmem:[%s15363_s6 + $0x188] sm:$0x3] }
 0x9ca   :  { %12506 = vmatpush3.bf16.msra.mxu1 %v14604_v42  ;;  %v11527_v26 = vld [vmem:[%s15363_s6 + $0x198] sm:$0xff] }
 0x9cb   :  { %12300 = vmatprep.subr.msk.mxu1 %vm8921_vm5, %v14611_v45 }
 0x9cd   :  { %9187 = vrot.lane.b32.xlu1 %v8910_v2, %s12938_s23  ;;  %9189 = vrot.lane.b32.xlu0 %v8913_v31, %s12938_s23  ;;  %v12543_v31 = vpack.c.bf16 %v11494_v33, %v11492_v63  ;;  %v11526_v63 = vld [vmem:[%s15363_s6 + $0x190] sm:$0xff]  ;;  %v11528_v33 = vld [vmem:[%s15363_s6 + $0x1a0] sm:$0xff] }
 0x9ce   :  { %12301 = vmatpush3.msk.msra.mxu1 %vm8921_vm5, %v14611_v45 }
 0x9cf   :  { %12508 = vmatprep.subr.bf16.mxu1 %v14592_v17 }
 0xa33   :  { %v9004_v5 = vpop.permute.xlu1 %9003 }
 0xa34   :  { %12302 = vmatprep.mubr.msk.f32.mxu1 %vm8914_vm13, %v9004_v5  ;;  %v11491_v5 = vld [vmem:[%s15363_s6 + $0xc0] sm:$0xff] }
 0xa37   :  { %v9006_v6 = vpop.permute.xlu0 %9005 }
 0xa38   :  { %12303 = vmatmul.mubr.msk.f32.vlgmr.msra.gmra.mrb[64].mxu1 %vm8914_vm13, %v9006_v6  ;;  %v11493_v6 = vld [vmem:[%s15363_s6 + $0xd0] sm:$0xff] }
 0xa39   :  { %12510 = vmatpush3.bf16.msra.mxu1 %v14592_v17 }
 0xa3a   :  { %12512 = vmatprep.subr.bf16.mxu1 %v14604_v42 }
 0xa3b   :  { %v9100_v7 = vpop.permute.xlu1 %9099  ;;  %v9102_v9 = vpop.permute.xlu0 %9101 }
 0xa3c   :  { %12315 = vmatprep.mubr.msk.f32.mxu1 %vm8914_vm13, %v9100_v7 }
 0xa3d   :  { %12514 = vmatpush3.bf16.msra.mxu1 %v14604_v42 }
 0xa3e   :  { %12313 = vmatprep.subr.msk.mxu1 %vm8921_vm5, %v14611_v45 }
 0xa3f   :  { %v9188_v36 = vpop.permute.xlu1 %9187  ;;  %v9190_v10 = vpop.permute.xlu0 %9189 }
 0xa41   :  { %12314 = vmatpush3.msk.msra.mxu1 %vm8921_vm5, %v14611_v45 }
 0xa42   :  { %12316 = vmatmul.mubr.msk.f32.vlgmr.msra.gmra.mrb[66].mxu1 %vm8914_vm13, %v9102_v9  ;;  %12516 = vmatprep.subr.bf16.mxu1 %v14592_v17  ;;  %v12545_v9 = vpack.c.bf16 %v11493_v6, %v11491_v5  ;;  %v11521_v5 = vld [vmem:[%s15363_s6 + $0x180] sm:$0x3] }
 0xa43   :  { %12518 = vmatpush3.bf16.msra.mxu1 %v14592_v17  ;;  %12328 = vmatprep.mubr.msk.f32.mxu1 %vm8914_vm13, %v9188_v36  ;;  %v9283_v17 = vld [vmem:[%s15363_s6 + $0x8] sm:$0xff] }
 0xa44   :  { %12520 = vmatprep.subr.bf16.mxu1 %v14604_v42  ;;  %v12531_v30 = vpack.c.bf16 %v9285_v19, %v9283_v17  ;;  %v11516_v17 = vld [vmem:[%s15363_s6 + $0x158] sm:$0xff]  ;;  %v11513_v19 = vld [vmem:[%s15363_s6 + $0x140] sm:$0xff] }
 0xa46   :  { %12532 = vmatprep.subr.bf16.mxu0 %v12531_v30  ;;  %v10887_v30 = vld [vmem:[%s15365_s1] sm:$0x3] }
 0xa47   :  { %12522 = vmatpush3.bf16.msra.mxu1 %v14604_v42 }
 0xa48   :  { %12326 = vmatprep.subr.msk.mxu1 %vm8921_vm5, %v14611_v45 }
 0xa4b   :  { %12327 = vmatpush3.msk.msra.mxu1 %vm8921_vm5, %v14611_v45 }
 0xa4c   :  { %12329 = vmatmul.mubr.msk.f32.vlgmr.msra.gmra.mrb[68].mxu1 %vm8914_vm13, %v9190_v10  ;;  %12331 = vmatprep.subr.mxu1 %v12909_v3  ;;  %v11496_v10 = vld [vmem:[%s15363_s6 + $0xe8] sm:$0x3] }
 0xa4d   :  { %12333 = vmatprep.mubr.msk.f32.mxu1 %vm12919_vm3, %v12909_v3  ;;  %12332 = vmatpush3.msra.mxu1 %v10888_v4 }
 0xa4e   :  { %12651 = vmatprep.subr.bf16.mxu1 %v12920_v58 }
 0xa50   :  { %12334 = vmatmul.mubr.msk.f32.vlgmr.msra.gmra.mrb[70].mxu1 %vm10889_vm2, %v10887_v30 }
 0xa98   :  { %v12291_v12 = vpop.f32.mrb[62].mxu1 }
 0xa99   :  { %9002 = vst.msk [vmem:[#allocation3 + $0x8] sm:$0xff] %vm9000_vm0, %v12291_v12  ;;  %v8991_v14 = vpop.f32.mrb[63].mxu1  ;;  %v11501_v12 = vld [vmem:[%s15363_s6 + $0xf8] sm:$0xff] }
 0xa9a   :  { %9001 = vst.msk [vmem:[#allocation3] sm:$0xff] %vm9000_vm0, %v8991_v14  ;;  %v11503_v14 = vld [vmem:[%s15363_s6 + $0x108] sm:$0xff] }
 0xa9b   :  { %v12547_v18 = vpack.c.bf16 %v11503_v14, %v11501_v12  ;;  %v11532_v12 = vld [vmem:[%s15363_s6 + $0x1c0] sm:$0xff] }
 0xb0b   :  { %v12304_v41 = vpop.f32.mrb[64].mxu1 }
 0xb0c   :  { %v9077_v44 = vpop.f32.mrb[65].mxu1 }
 0xb0d   :  { %9088 = vrot.lane.b32.xlu0 %v9077_v44, %s12939_s2  ;;  %v11502_v44 = vld [vmem:[%s15363_s6 + $0x100] sm:$0xff] }
 0xb11   :  { %9090 = vrot.lane.b32.xlu0 %v12304_v41, %s12939_s2  ;;  %v11500_v41 = vld [vmem:[%s15363_s6 + $0xf0] sm:$0xff] }
 0xb12   :  { %v12549_v20 = vpack.c.bf16 %v11502_v44, %v11500_v41  ;;  %v10870_v44 = vld [vmem:[%s15366_s8 + $0x40] sm:$0xff] }
 0xb15   :  { %v12317_v21 = vpop.f32.mrb[66].mxu1 }
 0xb16   :  { %9184 = vst.msk [vmem:[#allocation3 + $0x18] sm:$0xff] %vm9000_vm0, %v12317_v21  ;;  %v9173_v13 = vpop.f32.mrb[67].mxu1 }
 0xb17   :  { %9183 = vst.msk [vmem:[#allocation3 + $0x10] sm:$0xff] %vm9000_vm0, %v9173_v13  ;;  %v11506_v13 = vld [vmem:[%s15363_s6 + $0x120] sm:$0xff] }
 0xb18   :  { %v12553_v25 = vpack.c.bf16 %v11506_v13, %v11504_v23  ;;  %v11541_v23 = vld [vmem:[%s15363_s6 + $0x1f0] sm:$0xff]  ;;  %v11544_v13 = vld [vmem:[%s15363_s6 + $0x208] sm:$0xff] }
 0xb1f   :  { %v12330_v8 = vpop.f32.mrb[68].mxu1 }
 0xb20   :  { %v9261_v40 = vpop.f32.mrb[69].mxu1 }
 0xb21   :  { %9272 = vrot.lane.b32.xlu1 %v9261_v40, %s12939_s2  ;;  %v11515_v40 = vld [vmem:[%s15363_s6 + $0x150] sm:$0xff] }
 0xb25   :  { %9274 = vrot.lane.b32.xlu1 %v12330_v8, %s12939_s2  ;;  %v10862_v8 = vld [vmem:[%s15366_s8] sm:$0xff] }
 0xb7f   :  { %v9089_v38 = vpop.permute.xlu0 %9088 }
 0xb80   :  { %9095 = vst.msk [vmem:[#allocation3] sm:$0xff] %vm9094_vm15, %v9089_v38  ;;  %v11518_v38 = vld [vmem:[%s15363_s6 + $0x168] sm:$0xff] }
 0xb83   :  { %v9091_v42 = vpop.permute.xlu0 %9090 }
 0xb84   :  { %9096 = vst.msk [vmem:[#allocation3 + $0x8] sm:$0xff] %vm9094_vm15, %v9091_v42  ;;  %v10863_v42 = vld [vmem:[%s15366_s8 + $0x8] sm:$0xff] }
 0xb85   :  { %v12652_v34 = vpack.c.bf16 %v10863_v42, %v10862_v8  ;;  %v11543_v8 = vld [vmem:[%s15363_s6 + $0x200] sm:$0xff] }
 0xb87   :  { %v9292_v52 = vld [vmem:[#allocation3 + $0x1] sm:$0x1]  ;;  %v9280_v2 = vld [vmem:[#allocation3] sm:$0x1]  ;;  %v9474_v21 = vld [vmem:[#allocation3 + $0x2] sm:$0x1]  ;;  %12653 = vmatpush1.bf16.msra.mxu1 %v12652_v34 }
 0xb88   :  { %12654 = vmatprep.subr.bf16.mxu1 %v12920_v58  ;;  %v9768_v4 = vld [vmem:[#allocation3 + $0x5] sm:$0x1] }
 0xb8b   :  { %12656 = vmatpush1.bf16.msra.mxu1 %v12655_v54  ;;  %v11559_v54 = vld [vmem:[%s15363_s6 + $0x268] sm:$0xff] }
 0xb8c   :  { %12657 = vmatprep.subr.bf16.mxu1 %v12920_v58 }
 0xb93   :  { %v9273_v45 = vpop.permute.xlu1 %9272 }
 0xb94   :  { %9278 = vst.msk [vmem:[#allocation3 + $0x10] sm:$0xff] %vm9094_vm15, %v9273_v45 }
 0xb97   :  { %v9275_v37 = vpop.permute.xlu1 %9274 }
 0xb98   :  { %9279 = vst.msk [vmem:[#allocation3 + $0x18] sm:$0xff] %vm9094_vm15, %v9275_v37  ;;  %v11520_v37 = vld [vmem:[%s15363_s6 + $0x178] sm:$0xff] }
 0xb9b   :  { %v9293_v11 = vld [vmem:[#allocation3 + $0x11] sm:$0x1]  ;;  %v9281_v59 = vld [vmem:[#allocation3 + $0x10] sm:$0x1]  ;;  %v9475_v36 = vld [vmem:[#allocation3 + $0x12] sm:$0x1] }
 0xb9c   :  { %v9307_v48 = vrot.slane %v9293_v11, 7  ;;  %v9393_v50 = vrot.slane %v9281_v59, 7  ;;  %v9489_v46 = vrot.slane %v9475_v36, 7  ;;  %v9573_v0 = vld [vmem:[#allocation3 + $0x13] sm:$0x1]  ;;  %v12555_v11 = vpack.c.bf16 %v11516_v17, %v11514_v27  ;;  %v10867_v59 = vld [vmem:[%s15366_s8 + $0x28] sm:$0xff] }
 0xb9d   :  { %v9587_v45 = vrot.slane %v9573_v0, 7  ;;  %v9671_v29 = vld [vmem:[#allocation3 + $0x14] sm:$0x1]  ;;  %v9769_v15 = vld [vmem:[#allocation3 + $0x15] sm:$0x1]  ;;  %v10873_v27 = vld [vmem:[%s15366_s8 + $0x58] sm:$0xff] }
 0xb9e   :  { %v9309_v56 = vsel %vm9308_vm6, %v9307_v48, %v9292_v52  ;;  %v9394_v7 = vsel %vm9308_vm6, %v9393_v50, %v9280_v2  ;;  %v9490_v24 = vsel %vm9308_vm6, %v9489_v46, %v9474_v21  ;;  %v12557_v48 = vpack.c.bf16 %v11515_v40, %v11513_v19  ;;  %v11529_v50 = vld [vmem:[%s15363_s6 + $0x1a8] sm:$0xff]  ;;  %v10868_v2 = vld [vmem:[%s15366_s8 + $0x30] sm:$0xff]  ;;  %v11542_v21 = vld [vmem:[%s15363_s6 + $0x1f8] sm:$0xff] }
 0xb9f   :  { %11483 = vmatmul.mubr.msk.f32.vlgmr.msra.gmra.mrb[20].mxu0 %vm9310_vm1, %v9309_v56  ;;  %v12559_v52 = vpack.c.bf16 %v11520_v37, %v11518_v38  ;;  %v12563_v6 = vpack.c.bf16 %v11529_v50, %v11527_v26  ;;  %v10871_v46 = vld [vmem:[%s15366_s8 + $0x48] sm:$0xff]  ;;  %v11534_v0 = vld [vmem:[%s15363_s6 + $0x1d0] sm:$0x3]  ;;  %v9867_v43 = vld [vmem:[#allocation3 + $0x16] sm:$0x1] }
 0xba0   :  { %12534 = vmatpush1.bf16.msra.mxu0 %v12533_v49  ;;  %9467 = vmatprep.mubr.f32.mxu0 %v12909_v3  ;;  %v9572_v49 = vld [vmem:[#allocation3 + $0x3] sm:$0x1]  ;;  %v11545_v40 = vld [vmem:[%s15363_s6 + $0x210] sm:$0xff]  ;;  %v10875_v37 = vld [vmem:[%s15366_s8 + $0x68] sm:$0xff] }
 0xba1   :  { %12536 = vmatprep.subr.bf16.mxu0 %v12535_v51  ;;  %v11517_v51 = vld [vmem:[%s15363_s6 + $0x160] sm:$0xff]  ;;  %v9588_v56 = vsel %vm9308_vm6, %v9587_v45, %v9572_v49  ;;  %v12577_v34 = vpack.c.bf16 %v11545_v40, %v11543_v8  ;;  %v11552_v49 = vld [vmem:[%s15363_s6 + $0x230] sm:$0xff]  ;;  %v11583_v40 = vld [vmem:[%s15363_s6 + $0x2f8] sm:$0xff] }
 0xba2   :  { %v10874_v45 = vld [vmem:[%s15366_s8 + $0x60] sm:$0xff]  ;;  %v11556_v26 = vld [vmem:[%s15363_s6 + $0x250] sm:$0xff] }
 0xba3   :  { %v12670_v47 = vpack.c.bf16 %v10875_v37, %v10874_v45  ;;  %v11558_v50 = vld [vmem:[%s15363_s6 + $0x260] sm:$0xff] }
 0xba4   :  { %12538 = vmatpush1.bf16.msra.mxu0 %v12537_v57  ;;  %v10866_v57 = vld [vmem:[%s15366_s8 + $0x20] sm:$0xff] }
 0xba5   :  { %11484 = vmatprep.subr.msk.mxu0 %vm9313_vm14, %v9291_v55  ;;  %v12561_v55 = vpack.c.bf16 %v11519_v53, %v11517_v51  ;;  %v12658_v60 = vpack.c.bf16 %v10867_v59, %v10866_v57  ;;  %v11557_v51 = vld [vmem:[%s15363_s6 + $0x258] sm:$0xff]  ;;  %v9881_v53 = vrot.slane %v9867_v43, 7  ;;  %v11547_v59 = vld [vmem:[%s15363_s6 + $0x220] sm:$0x3] }
 0xba6   :  { %v10877_v57 = vld [vmem:[%s15366_s8 + $0x78] sm:$0xff] }
 0xba7   :  { %12659 = vmatpush1.bf16.msra.mxu1 %v12658_v60  ;;  %v9866_v60 = vld [vmem:[#allocation3 + $0x6] sm:$0x1] }
 0xba8   :  { %11485 = vmatpush1.msk.msra.mxu0 %vm9313_vm14, %v9290_v35  ;;  %v11531_v35 = vld [vmem:[%s15363_s6 + $0x1b8] sm:$0xff]  ;;  %12660 = vmatprep.subr.bf16.mxu1 %v12920_v58 }
 0xba9   :  { %11486 = vmatmul.mubr.msk.f32.vlgmr.msra.gmra.mrb[20].mxu0 %vm9310_vm1, %v9394_v7  ;;  %12540 = vmatprep.subr.bf16.mxu0 %v12539_v1  ;;  %v9685_v1 = vrot.slane %v9671_v29, 7  ;;  %v12565_v7 = vpack.c.bf16 %v11528_v33, %v11526_v63  ;;  %v9882_v33 = vsel %vm9308_vm6, %v9881_v53, %v9866_v60  ;;  %v11594_v53 = vld [vmem:[%s15363_s6 + $0x338] sm:$0xff] }
 0xbaa   :  { %12542 = vmatpush1.bf16.msra.mxu0 %v12541_v32  ;;  %9563 = vmatprep.mubr.f32.mxu0 %v12909_v3  ;;  %v11533_v32 = vld [vmem:[%s15363_s6 + $0x1c8] sm:$0xff] }
 0xbab   :  { %12544 = vmatprep.subr.bf16.mxu0 %v12543_v31  ;;  %v10869_v31 = vld [vmem:[%s15366_s8 + $0x38] sm:$0xff]  ;;  %v12567_v36 = vpack.c.bf16 %v11533_v32, %v11531_v35  ;;  %v10878_v35 = vld [vmem:[%s15366_s8 + $0x80] sm:$0xff]  ;;  %v12585_v32 = vpack.c.bf16 %v11558_v50, %v11556_v26  ;;  %v10160_v26 = vld [vmem:[#allocation3 + $0x9] sm:$0x1] }
 0xbac   :  { %v12661_v14 = vpack.c.bf16 %v10869_v31, %v10868_v2  ;;  %v9965_v2 = vld [vmem:[#allocation3 + $0x17] sm:$0x1] }
 0xbae   :  { %12546 = vmatpush1.bf16.msra.mxu0 %v12545_v9  ;;  %v9670_v9 = vld [vmem:[#allocation3 + $0x4] sm:$0x1]  ;;  %12662 = vmatpush1.bf16.msra.mxu1 %v12661_v14  ;;  %v11572_v14 = vld [vmem:[%s15363_s6 + $0x2b8] sm:$0xff] }
 0xbaf   :  { %11497 = vmatprep.subr.msk.mxu0 %vm9313_vm14, %v11496_v10  ;;  %v11530_v10 = vld [vmem:[%s15363_s6 + $0x1b0] sm:$0xff]  ;;  %v9686_v41 = vsel %vm9308_vm6, %v9685_v1, %v9670_v9  ;;  %12663 = vmatprep.subr.bf16.mxu1 %v12920_v58  ;;  %v10879_v1 = vld [vmem:[%s15366_s8 + $0x88] sm:$0xff]  ;;  %v11565_v9 = vld [vmem:[%s15363_s6 + $0x280] sm:$0xff] }
 0xbb0   :  { %v12569_v39 = vpack.c.bf16 %v11532_v12, %v11530_v10  ;;  %v12676_v31 = vpack.c.bf16 %v10879_v1, %v10878_v35  ;;  %v11570_v10 = vld [vmem:[%s15363_s6 + $0x2a8] sm:$0xff]  ;;  %v9979_v12 = vrot.slane %v9965_v2, 7 }
 0xbb1   :  { %v11600_v2 = vld [vmem:[%s15363_s6 + $0x368] sm:$0x3] }
 0xbb2   :  { %11498 = vmatpush1.msk.msra.mxu0 %vm9313_vm14, %v11495_v16  ;;  %v12664_v16 = vpack.c.bf16 %v10871_v46, %v10870_v44  ;;  %v10881_v44 = vld [vmem:[%s15366_s8 + $0x98] sm:$0xff]  ;;  %v11560_v46 = vld [vmem:[%s15363_s6 + $0x270] sm:$0x3] }
 0xbb3   :  { %11499 = vmatmul.mubr.msk.f32.vlgmr.msra.gmra.mrb[20].mxu0 %vm9310_vm1, %v9490_v24  ;;  %12548 = vmatprep.subr.bf16.mxu0 %v12547_v18  ;;  %v11535_v18 = vld [vmem:[%s15363_s6 + $0x1d8] sm:$0x3]  ;;  %v9783_v24 = vrot.slane %v9769_v15, 7 }
 0xbb4   :  { %12550 = vmatpush1.bf16.msra.mxu0 %v12549_v20  ;;  %9661 = vmatprep.mubr.f32.mxu0 %v12909_v3  ;;  %v11540_v20 = vld [vmem:[%s15363_s6 + $0x1e8] sm:$0xff] }
 0xbb5   :  { %12552 = vmatprep.subr.bf16.mxu0 %v12551_v22  ;;  %v11539_v22 = vld [vmem:[%s15363_s6 + $0x1e0] sm:$0xff]  ;;  %v12571_v17 = vpack.c.bf16 %v11542_v21, %v11540_v20  ;;  %12665 = vmatpush1.bf16.msra.mxu1 %v12664_v16  ;;  %v9784_v42 = vsel %vm9308_vm6, %v9783_v24, %v9768_v4  ;;  %v11571_v21 = vld [vmem:[%s15363_s6 + $0x2b0] sm:$0xff]  ;;  %v10883_v24 = vld [vmem:[%s15366_s8 + $0xa8] sm:$0xff] }
 0xbb6   :  { %v12573_v19 = vpack.c.bf16 %v11541_v23, %v11539_v22  ;;  %12666 = vmatprep.subr.bf16.mxu1 %v12920_v58  ;;  %v9964_v16 = vld [vmem:[#allocation3 + $0x7] sm:$0x1]  ;;  %v11578_v4 = vld [vmem:[%s15363_s6 + $0x2d0] sm:$0xff] }
 0xbb7   :  { %v11569_v20 = vld [vmem:[%s15363_s6 + $0x2a0] sm:$0xff]  ;;  %v9980_v23 = vsel %vm9308_vm6, %v9979_v12, %v9964_v16 }
 0xbb8   :  { %12554 = vmatpush1.bf16.msra.mxu0 %v12553_v25  ;;  %v11546_v25 = vld [vmem:[%s15363_s6 + $0x218] sm:$0xff]  ;;  %v11599_v12 = vld [vmem:[%s15363_s6 + $0x360] sm:$0x3] }
 0xbb9   :  { %11510 = vmatprep.subr.msk.mxu0 %vm9313_vm14, %v11509_v61  ;;  %v10872_v61 = vld [vmem:[%s15366_s8 + $0x50] sm:$0xff]  ;;  %v12575_v30 = vpack.c.bf16 %v11546_v25, %v11544_v13  ;;  %v10882_v13 = vld [vmem:[%s15366_s8 + $0xa0] sm:$0xff]  ;;  %v12593_v25 = vpack.c.bf16 %v11571_v21, %v11569_v20  ;;  %v10357_v20 = vld [vmem:[#allocation3 + $0x1b] sm:$0x1] }
 0xbba   :  { %v12667_v38 = vpack.c.bf16 %v10873_v27, %v10872_v61  ;;  %v10063_v61 = vld [vmem:[#allocation3 + $0x18] sm:$0x1]  ;;  %v12682_v27 = vpack.c.bf16 %v10883_v24, %v10882_v13  ;;  %v11617_v13 = vld [vmem:[%s15363_s6 + $0x3c0] sm:$0xff]  ;;  %v11619_v24 = vld [vmem:[%s15363_s6 + $0x3d0] sm:$0xff] }
 0xbbb   :  { %v10077_v8 = vrot.slane %v10063_v61, 7  ;;  %v11613_v21 = vld [vmem:[%s15363_s6 + $0x3b8] sm:$0x3]  ;;  %v11622_v61 = vld [vmem:[%s15363_s6 + $0x3e8] sm:$0xff] }
 0xbbc   :  { %11511 = vmatpush1.msk.msra.mxu0 %vm9313_vm14, %v11508_v28  ;;  %12668 = vmatpush1.bf16.msra.mxu1 %v12667_v38  ;;  %v11548_v28 = vld [vmem:[%s15363_s6 + $0x228] sm:$0x3] }
 0xbbd   :  { %11512 = vmatmul.mubr.msk.f32.vlgmr.msra.gmra.mrb[20].mxu0 %vm9310_vm1, %v9588_v56  ;;  %12556 = vmatprep.subr.bf16.mxu0 %v12555_v11  ;;  %v11553_v11 = vld [vmem:[%s15363_s6 + $0x238] sm:$0xff]  ;;  %v10876_v56 = vld [vmem:[%s15366_s8 + $0x70] sm:$0xff]  ;;  %v11585_v38 = vld [vmem:[%s15363_s6 + $0x308] sm:$0xff] }
 0xbbe   :  { %12558 = vmatpush1.bf16.msra.mxu0 %v12557_v48  ;;  %9759 = vmatprep.mubr.f32.mxu0 %v12909_v3  ;;  %v11555_v48 = vld [vmem:[%s15363_s6 + $0x248] sm:$0xff]  ;;  %v12673_v63 = vpack.c.bf16 %v10877_v57, %v10876_v56  ;;  %v12599_v43 = vpack.c.bf16 %v11585_v38, %v11583_v40  ;;  %v11593_v56 = vld [vmem:[%s15363_s6 + $0x330] sm:$0xff] }
 0xbbf   :  { %12560 = vmatprep.subr.bf16.mxu0 %v12559_v52  ;;  %12669 = vmatprep.subr.bf16.mxu1 %v12920_v58  ;;  %v11554_v52 = vld [vmem:[%s15363_s6 + $0x240] sm:$0xff]  ;;  %v11623_v40 = vld [vmem:[%s15363_s6 + $0x3f0] sm:$0xff] }
 0xbc0   :  { %12671 = vmatpush1.bf16.msra.mxu1 %v12670_v47  ;;  %v12581_v29 = vpack.c.bf16 %v11554_v52, %v11552_v49  ;;  %v11582_v47 = vld [vmem:[%s15363_s6 + $0x2f0] sm:$0xff]  ;;  %v10161_v49 = vld [vmem:[#allocation3 + $0x19] sm:$0x1] }
 0xbc1   :  { %12672 = vmatprep.subr.bf16.mxu1 %v12920_v58  ;;  %v11587_v52 = vld [vmem:[%s15363_s6 + $0x318] sm:$0x3]  ;;  %v10175_v57 = vrot.slane %v10161_v49, 7  ;;  %v11637_v49 = vld [vmem:[%s15363_s6 + $0x448] sm:$0xff] }
 0xbc2   :  { %12562 = vmatpush1.bf16.msra.mxu0 %v12561_v55  ;;  %v12579_v55 = vpack.c.bf16 %v11555_v48, %v11553_v11 }
 0xbc3   :  { %11523 = vmatprep.subr.msk.mxu0 %vm9313_vm14, %v11522_v62  ;;  %v12583_v62 = vpack.c.bf16 %v11559_v54, %v11557_v51  ;;  %v11592_v51 = vld [vmem:[%s15363_s6 + $0x328] sm:$0xff]  ;;  %v11591_v54 = vld [vmem:[%s15363_s6 + $0x320] sm:$0xff]  ;;  %v10176_v35 = vsel %vm9308_vm6, %v10175_v57, %v10160_v26  ;;  %v11634_v57 = vld [vmem:[%s15363_s6 + $0x430] sm:$0xff] }
 0xbc4   :  { %12674 = vmatpush1.bf16.msra.mxu1 %v12673_v63  ;;  %v12603_v60 = vpack.c.bf16 %v11594_v53, %v11592_v51  ;;  %v11595_v63 = vld [vmem:[%s15363_s6 + $0x340] sm:$0xff]  ;;  %v11644_v26 = vld [vmem:[%s15363_s6 + $0x468] sm:$0xff] }
 0xbc5   :  { %12675 = vmatprep.subr.bf16.mxu1 %v12920_v58 }
 0xbc6   :  { %11524 = vmatpush1.msk.msra.mxu0 %vm9313_vm14, %v11521_v5  ;;  %v11561_v5 = vld [vmem:[%s15363_s6 + $0x278] sm:$0x3] }
 0xbc7   :  { %11525 = vmatmul.mubr.msk.f32.vlgmr.msra.gmra.mrb[20].mxu0 %vm9310_vm1, %v9686_v41  ;;  %12564 = vmatprep.subr.bf16.mxu0 %v12563_v6  ;;  %v11566_v6 = vld [vmem:[%s15363_s6 + $0x288] sm:$0xff]  ;;  %v10880_v41 = vld [vmem:[%s15366_s8 + $0x90] sm:$0xff] }
 0xbc8   :  { %12566 = vmatpush1.bf16.msra.mxu0 %v12565_v7  ;;  %9857 = vmatprep.mubr.f32.mxu0 %v12909_v3  ;;  %v11568_v7 = vld [vmem:[%s15363_s6 + $0x298] sm:$0xff]  ;;  %v12679_v22 = vpack.c.bf16 %v10881_v44, %v10880_v41  ;;  %v10258_v44 = vld [vmem:[#allocation3 + $0xa] sm:$0x1] }
 0xbc9   :  { %12568 = vmatprep.subr.bf16.mxu0 %v12567_v36  ;;  %v11567_v36 = vld [vmem:[%s15363_s6 + $0x290] sm:$0xff]  ;;  %12677 = vmatpush1.bf16.msra.mxu1 %v12676_v31  ;;  %v11605_v31 = vld [vmem:[%s15363_s6 + $0x378] sm:$0xff] }
 0xbca   :  { %v12589_v15 = vpack.c.bf16 %v11567_v36, %v11565_v9  ;;  %12678 = vmatprep.subr.bf16.mxu1 %v12920_v58  ;;  %v11609_v36 = vld [vmem:[%s15363_s6 + $0x398] sm:$0xff] }
 0xbcc   :  { %12570 = vmatpush1.bf16.msra.mxu0 %v12569_v39  ;;  %v12587_v39 = vpack.c.bf16 %v11568_v7, %v11566_v6  ;;  %v11604_v6 = vld [vmem:[%s15363_s6 + $0x370] sm:$0xff]  ;;  %v11606_v7 = vld [vmem:[%s15363_s6 + $0x380] sm:$0xff] }
 0xbcd   :  { %11536 = vmatprep.subr.msk.mxu0 %vm9313_vm14, %v11535_v18  ;;  %v12591_v18 = vpack.c.bf16 %v11572_v14, %v11570_v10  ;;  %12680 = vmatpush1.bf16.msra.mxu1 %v12679_v22  ;;  %v11611_v10 = vld [vmem:[%s15363_s6 + $0x3a8] sm:$0xff]  ;;  %v12613_v41 = vpack.c.bf16 %v11606_v7, %v11604_v6 }
 0xbce   :  { %12681 = vmatprep.subr.bf16.mxu1 %v12920_v58  ;;  %v11618_v22 = vld [vmem:[%s15363_s6 + $0x3c8] sm:$0xff] }
 0xbcf   :  { %v10552_v6 = vld [vmem:[#allocation3 + $0xd] sm:$0x1] }
 0xbd0   :  { %11537 = vmatpush1.msk.msra.mxu0 %vm9313_vm14, %v11534_v0  ;;  %v11574_v0 = vld [vmem:[%s15363_s6 + $0x2c8] sm:$0x3] }
 0xbd1   :  { %11538 = vmatmul.mubr.msk.f32.vlgmr.msra.gmra.mrb[20].mxu0 %vm9310_vm1, %v9784_v42  ;;  %12572 = vmatprep.subr.bf16.mxu0 %v12571_v17  ;;  %v11579_v17 = vld [vmem:[%s15363_s6 + $0x2d8] sm:$0xff]  ;;  %v11573_v42 = vld [vmem:[%s15363_s6 + $0x2c0] sm:$0x3] }
 0xbd2   :  { %12574 = vmatpush1.bf16.msra.mxu0 %v12573_v19  ;;  %9955 = vmatprep.mubr.f32.mxu0 %v12909_v3  ;;  %v11581_v19 = vld [vmem:[%s15363_s6 + $0x2e8] sm:$0xff] }
 0xbd3   :  { %12576 = vmatprep.subr.bf16.mxu0 %v12575_v30  ;;  %v11580_v30 = vld [vmem:[%s15363_s6 + $0x2e0] sm:$0xff]  ;;  %v12595_v45 = vpack.c.bf16 %v11581_v19, %v11579_v17  ;;  %12683 = vmatpush1.bf16.msra.mxu1 %v12682_v27  ;;  %v11624_v27 = vld [vmem:[%s15363_s6 + $0x3f8] sm:$0xff]  ;;  %v12621_v19 = vpack.c.bf16 %v11619_v24, %v11617_v13  ;;  %v10650_v13 = vld [vmem:[#allocation3 + $0xe] sm:$0x1] }
 0xbd4   :  { %v12597_v37 = vpack.c.bf16 %v11580_v30, %v11578_v4  ;;  %12684 = vmatprep.subr.bf16.mxu1 %v12920_v58  ;;  %v10356_v4 = vld [vmem:[#allocation3 + $0xb] sm:$0x1]  ;;  %v12623_v30 = vpack.c.bf16 %v11624_v27, %v11622_v61  ;;  %v11662_v61 = vld [vmem:[%s15363_s6 + $0x4e0] sm:$0xff] }
 0xbd6   :  { %12578 = vmatpush1.bf16.msra.mxu0 %v12577_v34  ;;  %v10062_v34 = vld [vmem:[#allocation3 + $0x8] sm:$0x1] }
 0xbd7   :  { %11549 = vmatprep.subr.msk.mxu0 %vm9313_vm14, %v11548_v28  ;;  %v11584_v28 = vld [vmem:[%s15363_s6 + $0x300] sm:$0xff]  ;;  %v10078_v11 = vsel %vm9308_vm6, %v10077_v8, %v10062_v34  ;;  %v11631_v34 = vld [vmem:[%s15363_s6 + $0x418] sm:$0xff] }
 0xbd8   :  { %v12601_v48 = vpack.c.bf16 %v11584_v28, %v11582_v47  ;;  %v11621_v8 = vld [vmem:[%s15363_s6 + $0x3e0] sm:$0xff]  ;;  %v11630_v47 = vld [vmem:[%s15363_s6 + $0x410] sm:$0xff] }
 0xbd9   :  { %v11632_v28 = vld [vmem:[%s15363_s6 + $0x420] sm:$0xff] }
 0xbda   :  { %11550 = vmatpush1.msk.msra.mxu0 %vm9313_vm14, %v11547_v59  ;;  %v11596_v59 = vld [vmem:[%s15363_s6 + $0x348] sm:$0xff]  ;;  %v12629_v53 = vpack.c.bf16 %v11632_v28, %v11630_v47  ;;  %v10848_v47 = vlaneseq }
 0xbdb   :  { %11551 = vmatmul.mubr.msk.f32.vlgmr.msra.gmra.mrb[20].mxu0 %vm9310_vm1, %v9882_v33  ;;  %12580 = vmatprep.subr.bf16.mxu0 %v12579_v55  ;;  %v11598_v55 = vld [vmem:[%s15363_s6 + $0x358] sm:$0xff]  ;;  %v11597_v33 = vld [vmem:[%s15363_s6 + $0x350] sm:$0xff] }
 0xbdc   :  { %12582 = vmatpush1.bf16.msra.mxu0 %v12581_v29  ;;  %10053 = vmatprep.mubr.f32.mxu0 %v12909_v3  ;;  %v11586_v29 = vld [vmem:[%s15363_s6 + $0x310] sm:$0x3]  ;;  %v12607_v50 = vpack.c.bf16 %v11598_v55, %v11596_v59  ;;  %v12609_v1 = vpack.c.bf16 %v11597_v33, %v11595_v63  ;;  %v11636_v59 = vld [vmem:[%s15363_s6 + $0x440] sm:$0xff]  ;;  %v10849_v28 = vshrl.u32 %v10848_v47, 7 }
 0xbdd   :  { %12584 = vmatprep.subr.bf16.mxu0 %v12583_v62  ;;  %v12605_v62 = vpack.c.bf16 %v11593_v56, %v11591_v54  ;;  %v10454_v54 = vld [vmem:[#allocation3 + $0xc] sm:$0x1]  ;;  %v11643_v63 = vld [vmem:[%s15363_s6 + $0x460] sm:$0xff]  ;;  %v11645_v33 = vld [vmem:[%s15363_s6 + $0x470] sm:$0xff] }
 0xbe0   :  { %12586 = vmatpush1.bf16.msra.mxu0 %v12585_v32  ;;  %v10259_v32 = vld [vmem:[#allocation3 + $0x1a] sm:$0x1] }
 0xbe1   :  { %11562 = vmatprep.subr.msk.mxu0 %vm9313_vm14, %v11561_v5  ;;  %v11607_v5 = vld [vmem:[%s15363_s6 + $0x388] sm:$0xff]  ;;  %v10273_v9 = vrot.slane %v10259_v32, 7  ;;  %v11650_v32 = vld [vmem:[%s15363_s6 + $0x498] sm:$0xff] }
 0xbe2   :  { %v12611_v14 = vpack.c.bf16 %v11607_v5, %v11605_v31  ;;  %v12637_v5 = vpack.c.bf16 %v11645_v33, %v11643_v63 }
 0xbe3   :  { %v10274_v16 = vsel %vm9308_vm6, %v10273_v9, %v10258_v44  ;;  %v11647_v9 = vld [vmem:[%s15363_s6 + $0x480] sm:$0xff]  ;;  %v11657_v44 = vld [vmem:[%s15363_s6 + $0x4b8] sm:$0xff] }
 0xbe4   :  { %11563 = vmatpush1.msk.msra.mxu0 %vm9313_vm14, %v11560_v46  ;;  %v12615_v46 = vpack.c.bf16 %v11611_v10, %v11609_v36  ;;  %v11649_v36 = vld [vmem:[%s15363_s6 + $0x490] sm:$0xff] }
 0xbe5   :  { %11564 = vmatmul.mubr.msk.f32.vlgmr.msra.gmra.mrb[20].mxu0 %vm9310_vm1, %v9980_v23  ;;  %12588 = vmatprep.subr.bf16.mxu0 %v12587_v39  ;;  %v11608_v39 = vld [vmem:[%s15363_s6 + $0x390] sm:$0xff]  ;;  %v11620_v23 = vld [vmem:[%s15363_s6 + $0x3d8] sm:$0xff] }
 0xbe6   :  { %12590 = vmatpush1.bf16.msra.mxu0 %v12589_v15  ;;  %10151 = vmatprep.mubr.f32.mxu0 %v12909_v3  ;;  %v11610_v15 = vld [vmem:[%s15363_s6 + $0x3a0] sm:$0xff]  ;;  %v12619_v17 = vpack.c.bf16 %v11620_v23, %v11618_v22 }
 0xbe7   :  { %12592 = vmatprep.subr.bf16.mxu0 %v12591_v18  ;;  %v12617_v18 = vpack.c.bf16 %v11610_v15, %v11608_v39  ;;  %v11656_v39 = vld [vmem:[%s15363_s6 + $0x4b0] sm:$0xff]  ;;  %v11658_v15 = vld [vmem:[%s15363_s6 + $0x4c0] sm:$0xff] }
 0xbe8   :  { %v12645_v23 = vpack.c.bf16 %v11658_v15, %v11656_v39 }
 0xbea   :  { %12594 = vmatpush1.bf16.msra.mxu0 %v12593_v25  ;;  %v10371_v25 = vrot.slane %v10357_v20, 7  ;;  %v11663_v20 = vld [vmem:[%s15363_s6 + $0x4e8] sm:$0xff] }
 0xbeb   :  { %11575 = vmatprep.subr.msk.mxu0 %vm9313_vm14, %v11574_v0  ;;  %v11612_v0 = vld [vmem:[%s15363_s6 + $0x3b0] sm:$0x3] }
 0xbec   :  { %v10372_v38 = vsel %vm9308_vm6, %v10371_v25, %v10356_v4  ;;  %v11660_v25 = vld [vmem:[%s15363_s6 + $0x4d0] sm:$0xff] }
 0xbee   :  { %11576 = vmatpush1.msk.msra.mxu0 %vm9313_vm14, %v11573_v42  ;;  %v12625_v42 = vpack.c.bf16 %v11623_v40, %v11621_v8  ;;  %v10748_v8 = vld [vmem:[#allocation3 + $0xf] sm:$0x1] }
 0xbef   :  { %11577 = vmatmul.mubr.msk.f32.vlgmr.msra.gmra.mrb[20].mxu0 %vm9310_vm1, %v10078_v11  ;;  %12596 = vmatprep.subr.bf16.mxu0 %v12595_v45  ;;  %v10455_v45 = vld [vmem:[#allocation3 + $0x1c] sm:$0x1] }
 0xbf0   :  { %12598 = vmatpush1.bf16.msra.mxu0 %v12597_v37  ;;  %10249 = vmatprep.mubr.f32.mxu0 %v12909_v3  ;;  %v11626_v37 = vld [vmem:[%s15363_s6 + $0x408] sm:$0x3]  ;;  %v10469_v11 = vrot.slane %v10455_v45, 7 }
 0xbf1   :  { %12600 = vmatprep.subr.bf16.mxu0 %v12599_v43  ;;  %v11633_v43 = vld [vmem:[%s15363_s6 + $0x428] sm:$0xff] }
 0xbf2   :  { %v12627_v51 = vpack.c.bf16 %v11633_v43, %v11631_v34  ;;  %v10470_v55 = vsel %vm9308_vm6, %v10469_v11, %v10454_v54  ;;  %v10886_v34 = vld [vmem:[%s15366_s8 + $0xc0] sm:$0xff]  ;;  %v10850_v11 = vsub.s32 0, %v10849_v28 }
 0xbf4   :  { %12602 = vmatpush1.bf16.msra.mxu0 %v12601_v48  ;;  %v11635_v48 = vld [vmem:[%s15363_s6 + $0x438] sm:$0xff] }
 0xbf5   :  { %11588 = vmatprep.subr.msk.mxu0 %vm9313_vm14, %v11587_v52  ;;  %v11625_v52 = vld [vmem:[%s15363_s6 + $0x400] sm:$0x3]  ;;  %v12631_v56 = vpack.c.bf16 %v11637_v49, %v11635_v48  ;;  %v10854_v49 = vsub.s32 1, %v10849_v28 }
 0xbf6   :  { %v10846_v48 = vld [vmem:[%s15367_s7] sm:$0x3] }
 0xbf8   :  { %11589 = vmatpush1.msk.msra.mxu0 %vm9313_vm14, %v11586_v29  ;;  %v12633_v29 = vpack.c.bf16 %v11636_v59, %v11634_v57 }
 0xbf9   :  { %11590 = vmatmul.mubr.msk.f32.vlgmr.msra.gmra.mrb[20].mxu0 %vm9310_vm1, %v10176_v35  ;;  %12604 = vmatprep.subr.bf16.mxu0 %v12603_v60  ;;  %v10553_v60 = vld [vmem:[#allocation3 + $0x1d] sm:$0x1] }
 0xbfa   :  { %12606 = vmatpush1.bf16.msra.mxu0 %v12605_v62  ;;  %10347 = vmatprep.mubr.f32.mxu0 %v12909_v3  ;;  %v11639_v62 = vld [vmem:[%s15363_s6 + $0x458] sm:$0x3]  ;;  %v10567_v35 = vrot.slane %v10553_v60, 7  ;;  %v11047_v60 = vld [vmem:[%s15368_s11 + $0x8] sm:$0xff] }
 0xbfb   :  { %12608 = vmatprep.subr.bf16.mxu0 %v12607_v50  ;;  %v11646_v50 = vld [vmem:[%s15363_s6 + $0x478] sm:$0xff] }
 0xbfc   :  { %v12635_v31 = vpack.c.bf16 %v11646_v50, %v11644_v26  ;;  %v10568_v10 = vsel %vm9308_vm6, %v10567_v35, %v10552_v6  ;;  %v11048_v26 = vld [vmem:[%s15368_s11 + $0x10] sm:$0xff]  ;;  %v11049_v50 = vld [vmem:[%s15368_s11 + $0x18] sm:$0xff]  ;;  %v11671_v35 = vld [vmem:[%s15370_s10] ss:$0 sm:$0xff] }
 0xbfd   :  { %v12691_v63 = vpack.c.bf16 %v11049_v50, %v11048_v26 }
 0xbfe   :  { %12610 = vmatpush1.bf16.msra.mxu0 %v12609_v1  ;;  %v11648_v1 = vld [vmem:[%s15363_s6 + $0x488] sm:$0xff] }
 0xbff   :  { %11601 = vmatprep.subr.msk.mxu0 %vm9313_vm14, %v11600_v2  ;;  %v11638_v2 = vld [vmem:[%s15363_s6 + $0x450] sm:$0x3]  ;;  %v12639_v7 = vpack.c.bf16 %v11650_v32, %v11648_v1 }
 0xc02   :  { %11602 = vmatpush1.msk.msra.mxu0 %vm9313_vm14, %v11599_v12  ;;  %v12641_v12 = vpack.c.bf16 %v11649_v36, %v11647_v9 }
 0xc03   :  { %11603 = vmatmul.mubr.msk.f32.vlgmr.msra.gmra.mrb[20].mxu0 %vm9310_vm1, %v10274_v16  ;;  %12612 = vmatprep.subr.bf16.mxu0 %v12611_v14  ;;  %v10651_v14 = vld [vmem:[#allocation3 + $0x1e] sm:$0x1] }
 0xc04   :  { %12614 = vmatpush1.bf16.msra.mxu0 %v12613_v41  ;;  %10445 = vmatprep.mubr.f32.mxu0 %v12909_v3  ;;  %v11652_v41 = vld [vmem:[%s15363_s6 + $0x4a8] sm:$0x3]  ;;  %v10665_v16 = vrot.slane %v10651_v14, 7 }
 0xc05   :  { %12616 = vmatprep.subr.bf16.mxu0 %v12615_v46  ;;  %v11659_v46 = vld [vmem:[%s15363_s6 + $0x4c8] sm:$0xff] }
 0xc06   :  { %v12643_v22 = vpack.c.bf16 %v11659_v46, %v11657_v44  ;;  %v10666_v27 = vsel %vm9308_vm6, %v10665_v16, %v10650_v13 }
 0xc08   :  { %12618 = vmatpush1.bf16.msra.mxu0 %v12617_v18  ;;  %v11661_v18 = vld [vmem:[%s15363_s6 + $0x4d8] sm:$0xff] }
 0xc09   :  { %11614 = vmatprep.subr.msk.mxu0 %vm9313_vm14, %v11613_v21  ;;  %v11651_v21 = vld [vmem:[%s15363_s6 + $0x4a0] sm:$0x3]  ;;  %v12647_v24 = vpack.c.bf16 %v11663_v20, %v11661_v18 }
 0xc0c   :  { %11615 = vmatpush1.msk.msra.mxu0 %vm9313_vm14, %v11612_v0  ;;  %v12649_v0 = vpack.c.bf16 %v11662_v61, %v11660_v25 }
 0xc0d   :  { %11616 = vmatmul.mubr.msk.f32.vlgmr.msra.gmra.mrb[20].mxu0 %vm9310_vm1, %v10372_v38  ;;  %12620 = vmatprep.subr.bf16.mxu0 %v12619_v17  ;;  %v10749_v17 = vld [vmem:[#allocation3 + $0x1f] sm:$0x1]  ;;  %v10884_v38 = vld [vmem:[%s15366_s8 + $0xb0] sm:$0xff] }
 0xc0e   :  { %12622 = vmatpush1.bf16.msra.mxu0 %v12621_v19  ;;  %10543 = vmatprep.mubr.f32.mxu0 %v12909_v3  ;;  %v11665_v19 = vld [vmem:[%s15363_s6 + $0x4f8] sm:$0x3]  ;;  %v10763_v4 = vrot.slane %v10749_v17, 7 }
 0xc0f   :  { %12624 = vmatprep.subr.bf16.mxu0 %v12623_v30  ;;  %v11664_v30 = vld [vmem:[%s15363_s6 + $0x4f0] sm:$0x3] }
 0xc10   :  { %v10764_v40 = vsel %vm9308_vm6, %v10763_v4, %v10748_v8 }
 0xc12   :  { %12626 = vmatpush1.bf16.msra.mxu0 %v12625_v42  ;;  %v10885_v42 = vld [vmem:[%s15366_s8 + $0xb8] sm:$0xff] }
 0xc13   :  { %11627 = vmatprep.subr.msk.mxu0 %vm9313_vm14, %v11626_v37  ;;  %v12685_v45 = vpack.c.bf16 %v10885_v42, %v10884_v38  ;;  %v10959_v37 = vpop.f32.mrb[70].mxu1 }
 0xc14   :  { %v12335_v43 = vpop.f32.mrb[71].mxu1 }
 0xc15   :  { %12686 = vmatpush1.bf16.msra.mxu1 %v12685_v45 }
 0xc16   :  { %11628 = vmatpush1.msk.msra.mxu0 %vm9313_vm14, %v11625_v52  ;;  %11015 = vmatprep.subr.mxu1 %v12909_v3  ;;  %v10851_v52 = vrot.slane %v10846_v48, %v10850_v11 }
 0xc17   :  { %11629 = vmatmul.mubr.msk.f32.vlgmr.msra.gmra.mrb[20].mxu0 %vm9310_vm1, %v10470_v55  ;;  %12628 = vmatprep.subr.bf16.mxu0 %v12627_v51  ;;  %v10855_v51 = vrot.slane %v10846_v48, %v10854_v49 }
 0xc18   :  { %12630 = vmatpush1.bf16.msra.mxu0 %v12629_v53  ;;  %10641 = vmatprep.mubr.f32.mxu0 %v12909_v3 }
 0xc19   :  { %12632 = vmatprep.subr.bf16.mxu0 %v12631_v56  ;;  %11016 = vmatpush1.msra.mxu1 %v10886_v34 }
 0xc1a   :  { %12687 = vmatprep.subr.bf16.mxu1 %v12920_v58 }
 0xc1c   :  { %12634 = vmatpush1.bf16.msra.mxu0 %v12633_v29  ;;  %v11046_v29 = vld [vmem:[%s15368_s11] sm:$0xff] }
 0xc1d   :  { %11640 = vmatprep.subr.msk.mxu0 %vm9313_vm14, %v11639_v62  ;;  %v12688_v62 = vpack.c.bf16 %v11047_v60, %v11046_v29 }
 0xc20   :  { %11641 = vmatpush1.msk.msra.mxu0 %vm9313_vm14, %v11638_v2 }
 0xc21   :  { %11642 = vmatmul.mubr.msk.f32.vlgmr.msra.gmra.mrb[20].mxu0 %vm9310_vm1, %v10568_v10  ;;  %12636 = vmatprep.subr.bf16.mxu0 %v12635_v31 }
 0xc22   :  { %12638 = vmatpush1.bf16.msra.mxu0 %v12637_v5  ;;  %10739 = vmatprep.mubr.f32.mxu0 %v12909_v3 }
 0xc23   :  { %12640 = vmatprep.subr.bf16.mxu0 %v12639_v7 }
 0xc26   :  { %12642 = vmatpush1.bf16.msra.mxu0 %v12641_v12 }
 0xc27   :  { %11653 = vmatprep.subr.msk.mxu0 %vm9313_vm14, %v11652_v41 }
 0xc2a   :  { %11654 = vmatpush1.msk.msra.mxu0 %vm9313_vm14, %v11651_v21 }
 0xc2b   :  { %11655 = vmatmul.mubr.msk.f32.vlgmr.msra.gmra.mrb[20].mxu0 %vm9310_vm1, %v10666_v27  ;;  %12644 = vmatprep.subr.bf16.mxu0 %v12643_v22 }
 0xc2c   :  { %12646 = vmatpush1.bf16.msra.mxu0 %v12645_v23  ;;  %10837 = vmatprep.mubr.f32.mxu0 %v12909_v3 }
 0xc2d   :  { %12648 = vmatprep.subr.bf16.mxu0 %v12647_v24 }
 0xc30   :  { %12650 = vmatpush1.bf16.msra.mxu0 %v12649_v0 }
 0xc31   :  { %11666 = vmatprep.subr.msk.mxu0 %vm9313_vm14, %v11665_v19 }
 0xc34   :  { %11667 = vmatpush1.msk.msra.mxu0 %vm9313_vm14, %v11664_v30 }
 0xc35   :  { %11668 = vmatmul.mubr.msk.f32.vlgmr.msra.gmra.mrb[20].mxu0 %vm9310_vm1, %v10764_v40 }
 0xd08   :  { %v10839_v53 = vpop.f32.mrb[20].mxu0 }
 0xd09   :  { %v10858_v54 = vadd.f32 %v10851_v52, %v10839_v53  ;;  %v10841_v56 = vpop.f32.mrb[21].mxu0 }
 0xd0a   :  { %v10859_v57 = vadd.f32 %v10855_v51, %v10841_v56 }
 0xd0b   :  { %v10860_v55 = vmax.f32 %v10858_v54, 0.0 }
 0xd0c   :  { %v10861_v59 = vmax.f32 %v10859_v57, 0.0 }
 0xd0e   :  { %11670 = vmatprep.mubr.msk.f32.mxu1 %vm10963_vm7, %v10861_v59 }
 0xd0f   :  { %11032 = vmatmul.mubr.f32.vlgmr.msra.gmra.mrb[72].mxu1 %v10860_v55 }
 0xd10   :  { %12344 = vmatprep.mubr.msk.f32.mxu1 %vm12919_vm3, %v12909_v3  ;;  %12689 = vmatpush3.bf16.msra.mxu1 %v12688_v62  ;;  %v20_v3 = vstv %s15369_s12  ;;  %vm11057_vm3 = vcmask 261120  }
 0xd11   :  { %12690 = vmatprep.subr.bf16.mxu1 %v12920_v58  ;;  %21 = vst [vmem:[#allocation4] sm:$0x1] %v20_v3 }
 0xd14   :  { %12692 = vmatpush3.bf16.msra.mxu1 %v12691_v63 }
 0xd18   :  { %v11672_v5 = vld [vmem:[#allocation4] ss:$0 sm:$0xff] }
 0xde2   :  { %v11033_v33 = vpop.f32.mrb[72].mxu1 }
 0xde3   :  { %v11034_v1 = vadd.f32 %v11033_v33, %v10959_v37  ;;  %v11035_v32 = vpop.f32.mrb[73].mxu1 }
 0xde5   :  { %v11044_v2 = vadd.f32 %v11671_v35, %v11034_v1 }
 0xde7   :  { %v11045_v31 = vmax.f32 %v11044_v2, 0.0 }
 0xde9   :  { %12345 = vmatmul.mubr.msk.f32.vlgmr.msra.gmra.mrb[74].mxu1 %vm11057_vm3, %v11045_v31 }
 0xebc   :  { %v11127_v6 = vpop.f32.mrb[74].mxu1 }
 0xebd   :  { %v11128_v58 = vadd.f32 %v11672_v5, %v11127_v6  ;;  %v12346_v7 = vpop.f32.mrb[75].mxu1 }
 0xebf   :  { %11132 = vst.msk [vmem:[%s15371_s15] sm:$0x3] %vm11131_vm8, %v11128_v58 }

</bundles_post_ra>
